<compile_context>
chip_gen: v6e
topology: v6e:2x2x1
jax: 0.10.0
libtpu: 0.0.40
codegen_flags: <defaults>
</compile_context>

<pallas_src>
import functools

import numpy as np
import jax
import jax.numpy as jnp
from jax import lax
from jax.experimental import pallas as pl
from jax.experimental.pallas import tpu as pltpu


def _gat_kernel(out_feats,                              # static, bound via functools.partial
                nnz_ref, bj_ref,                        # scalar prefetch (SMEM)
                feat_q_ref, feat_kv_ref, adj_ref,
                wq_ref, bq_ref, wkv_ref, bkv_ref, wl_ref, bl_ref,
                out_ref,
                q_scratch, m_scratch, acc_scratch):
    del bj_ref  # only consumed by the BlockSpec index_maps
    i = pl.program_id(0)
    j = pl.program_id(1)
    nnz_i = nnz_ref[i]                                  # nonzero src tiles for this dst tile (>=1)
    out_pad = acc_scratch.shape[-1]

    @pl.when(j == 0)
    def _init():
        # Q projection for this dst tile (bf16 inputs, f32 accumulation).
        q = jnp.dot(feat_q_ref[...], wq_ref[...],
                    preferred_element_type=jnp.float32) + bq_ref[...]
        q_scratch[...] = q.astype(jnp.bfloat16)
        m_scratch[...] = jnp.full_like(m_scratch, -jnp.inf)
        acc_scratch[...] = jnp.zeros_like(acc_scratch)

    @pl.when(j < nnz_i)                                 # skip padded / empty adjacency tiles
    def _step():
        # Fused K|V projection for this src tile.
        kv = jnp.dot(feat_kv_ref[...], wkv_ref[...],
                     preferred_element_type=jnp.float32) + bkv_ref[...]
        k = kv[:, :out_pad].astype(jnp.bfloat16)        # [TK, out_pad]
        v = kv[:, out_pad:].astype(jnp.bfloat16)        # [TK, out_pad]; col out_feats == 1.0

        # scores[i, j] = q_i . k_j  (dst i attends over src j), f32 accumulation.
        scores = lax.dot_general(q_scratch[...], k, (((1,), (1,)), ((), ())),
                                 preferred_element_type=jnp.float32)   # [TQ, TK]

        mask = adj_ref[...] != 0                        # int8 compare, no f32 unpack
        masked = jnp.where(mask, scores, -1e30)

        m_prev = m_scratch[...]
        m_new = jnp.maximum(m_prev, jnp.max(masked, axis=1, keepdims=True))
        alpha = jnp.exp(m_prev - m_new)                 # 0 on the first executed tile
        # Explicit zero on non-edges keeps fully-masked rows at p == 0.
        p = jnp.where(mask, jnp.exp(masked - m_new), 0.0).astype(jnp.bfloat16)

        # Denominator folded into the PV matmul via V's ones column (col out_feats).
        acc_scratch[...] = alpha * acc_scratch[...] + jnp.dot(
            p, v, preferred_element_type=jnp.float32)
        m_scratch[...] = m_new

    @pl.when(j == nnz_i - 1)
    def _finalize():
        acc = acc_scratch[...]
        l = acc[:, out_feats:out_feats + 1]             # softmax denominator (ones column)
        # approx reciprocal (~2^-12 rel err) + tiny clamp for zero-in-degree rows.
        inv_l = pl.reciprocal(jnp.maximum(l, 1e-30), approx=True)
        agg = (acc * inv_l).astype(jnp.bfloat16)        # extra col -> ~1, zeroed by wl row
        out = jnp.dot(agg, wl_ref[...],
                      preferred_element_type=jnp.float32) + bl_ref[...]
        out_ref[...] = jnp.maximum(out, 0.0).astype(out_ref.dtype)


def gat_layer(feature, adj, params, *, tq=256, tk=256):
    N, in_feats = feature.shape
    out_feats = params["wq"].shape[0]
    # +1 guarantees a spare lane for the softmax-denominator "ones" column.
    out_pad = ((out_feats + 1 + 127) // 128) * 128

    tq = min(tq, N)
    tk = min(tk, N)
    assert N % tq == 0 and N % tk == 0, "N must be divisible by the tile sizes"
    gi, gj = N // tq, N // tk

    # --- block-sparsity map (host side) ---
    adj_np = np.asarray(adj) > 0
    blk_any = adj_np.reshape(gi, tq, gj, tk).any(axis=(1, 3))          # [gi, gj] bool
    nnz = blk_any.sum(axis=1).astype(np.int32)                         # nonzero src tiles / dst tile
    gj_eff = max(1, int(nnz.max()))
    blkj = np.zeros((gi, gj_eff), dtype=np.int32)
    for ii in range(gi):
        idx = np.nonzero(blk_any[ii])[0].astype(np.int32)
        if idx.size == 0:
            idx = np.zeros((1,), np.int32)
        blkj[ii, :idx.size] = idx
        blkj[ii, idx.size:] = idx[-1]   # repeat last index -> pipeline skips the DMA
    nnz = np.maximum(nnz, 1)
    n_blocks = int(nnz.sum())

    nnz_arr = jnp.asarray(nnz, dtype=jnp.int32)                        # [gi]
    bj_arr = jnp.asarray(blkj.reshape(-1), dtype=jnp.int32)            # [gi * gj_eff], flat (SMEM friendly)

    # --- weight packing (done once, outside the kernel) ---
    def pad_cols(w_t, b, ones_col=False):
        wp = jnp.zeros((w_t.shape[0], out_pad), jnp.float32).at[:, :out_feats].set(w_t)
        bp = jnp.zeros((1, out_pad), jnp.float32).at[:, :out_feats].set(b)
        if ones_col:
            bp = bp.at[:, out_feats].set(1.0)   # V's ones column -> softmax denominator
        return wp, bp

    wq_t, bq = pad_cols(params["wq"].T, params["bq"])
    wk_t, bk = pad_cols(params["wk"].T, params["bk"])
    wv_t, bv = pad_cols(params["wv"].T, params["bv"], ones_col=True)
    wkv_t = jnp.concatenate([wk_t, wv_t], axis=1)          # [in, 2*out_pad]
    bkv = jnp.concatenate([bk, bv], axis=1)                # [1, 2*out_pad]
    wl_t = (jnp.zeros((out_pad, out_pad), jnp.float32)
            .at[:out_feats, :out_feats].set(params["wl"].T))
    bl = jnp.zeros((1, out_pad), jnp.float32).at[:, :out_feats].set(params["bl"])

    feat_bf = feature.astype(jnp.bfloat16)
    adj_i8 = (adj > 0).astype(jnp.int8)
    wq_bf = wq_t.astype(jnp.bfloat16)
    wkv_bf = wkv_t.astype(jnp.bfloat16)
    wl_bf = wl_t.astype(jnp.bfloat16)

    # --- specs ---
    def dst_map(i, j, nnz_ref, bj_ref):
        return (i, 0)

    def src_map(i, j, nnz_ref, bj_ref):
        return (bj_ref[i * gj_eff + j], 0)

    def adj_map(i, j, nnz_ref, bj_ref):
        return (i, bj_ref[i * gj_eff + j])

    def w_map(i, j, nnz_ref, bj_ref):
        return (0, 0)

    in_specs = [
        pl.BlockSpec((tq, in_feats), dst_map),               # feature rows for Q (dst)
        pl.BlockSpec((tk, in_feats), src_map),               # feature rows for K/V (compacted src)
        pl.BlockSpec((tq, tk), adj_map),                     # adjacency tile (int8, compacted)
        pl.BlockSpec((in_feats, out_pad), w_map),            # Wq^T
        pl.BlockSpec((1, out_pad), w_map),                   # bq
        pl.BlockSpec((in_feats, 2 * out_pad), w_map),        # Wk^T | Wv^T
        pl.BlockSpec((1, 2 * out_pad), w_map),               # bk | bv (with ones column)
        pl.BlockSpec((out_pad, out_pad), w_map),             # Wl^T
        pl.BlockSpec((1, out_pad), w_map),                   # bl
    ]
    out_spec = pl.BlockSpec((tq, out_pad), dst_map)

    # --- VMEM budget: actual footprint (double-buffered tiles) + headroom ---
    bytes_tiles = 2 * (tq * in_feats * 2 + tk * in_feats * 2 + tq * tk + tq * out_pad * 4)
    bytes_weights = 2 * ((in_feats * out_pad + in_feats * 2 * out_pad + out_pad * out_pad) * 2
                         + 4 * out_pad * 4 * 2)
    bytes_scratch = tq * out_pad * 2 + tq * 4 + tq * out_pad * 4
    vmem_limit = int(min(96 * 2**20, max(8 * 2**20, 2 * (bytes_tiles + bytes_weights + bytes_scratch))))

    flops = (2 * N * in_feats * out_pad                       # Q projection
             + 2 * n_blocks * tk * in_feats * 2 * out_pad     # K|V projection (visited tiles)
             + 2 * n_blocks * tq * tk * out_pad * 2           # QK^T and PV (visited tiles)
             + 2 * N * out_pad * out_pad)                     # final linear
    bytes_accessed = (N * in_feats * 2                        # dst features
                      + n_blocks * tk * in_feats * 2          # src features (re-streamed)
                      + n_blocks * tq * tk                    # adjacency (int8)
                      + N * out_pad * 4                       # output
                      + bytes_weights)
    cost = pl.CostEstimate(flops=int(flops),
                           transcendentals=int(n_blocks * tq * tk),
                           bytes_accessed=int(bytes_accessed))

    kernel = functools.partial(_gat_kernel, out_feats)

    out_padded = pl.pallas_call(
        kernel,
        out_shape=jax.ShapeDtypeStruct((N, out_pad), jnp.float32),
        grid_spec=pltpu.PrefetchScalarGridSpec(
            num_scalar_prefetch=2,
            grid=(gi, gj_eff),
            in_specs=in_specs,
            out_specs=out_spec,
            scratch_shapes=[
                pltpu.VMEM((tq, out_pad), jnp.bfloat16),   # q tile
                pltpu.VMEM((tq, 1), jnp.float32),          # running max
                pltpu.VMEM((tq, out_pad), jnp.float32),    # output accumulator (+denominator col)
            ]),
        compiler_params=pltpu.CompilerParams(
            dimension_semantics=("parallel", "arbitrary"),
            vmem_limit_bytes=vmem_limit),
        cost_estimate=cost,
    )(nnz_arr, bj_arr, feat_bf, feat_bf, adj_i8, wq_bf, bq, wkv_bf, bkv, wl_bf, bl)

    return out_padded[:, :out_feats]


def init_params(key, in_feats, out_feats):
    ks = jax.random.split(key, 8)

    def lin(kw, kb, fan_in, fan_out):
        bound = 1.0 / jnp.sqrt(fan_in)
        w = jax.random.uniform(kw, (fan_out, fan_in), jnp.float32, -bound, bound)
        b = jax.random.uniform(kb, (1, fan_out), jnp.float32, -bound, bound)
        return w, b

    wq, bq = lin(ks[0], ks[1], in_feats, out_feats)
    wk, bk = lin(ks[2], ks[3], in_feats, out_feats)
    wv, bv = lin(ks[4], ks[5], in_feats, out_feats)
    wl, bl = lin(ks[6], ks[7], out_feats, out_feats)
    return dict(wq=wq, bq=bq, wk=wk, bk=bk, wv=wv, bv=bv, wl=wl, bl=bl)


def gat_reference(feature, adj, p):
    # plain-JAX f32 reference for verification
    q = feature @ p["wq"].T + p["bq"]
    k = feature @ p["wk"].T + p["bk"]
    v = feature @ p["wv"].T + p["bv"]
    scores = q @ k.T
    mask = adj > 0.0
    masked = jnp.where(mask, scores, -1e30)
    e = jnp.where(mask, jnp.exp(masked - masked.max(1, keepdims=True)), 0.0)
    s = e / e.sum(1, keepdims=True)
    agg = s @ v
    return jnp.maximum(agg @ p["wl"].T + p["bl"], 0.0)


if __name__ == "__main__":
    key = jax.random.PRNGKey(0)
    k_feat, k_param = jax.random.split(key)

    N, in_feats, out_feats = 512, 32, 32
    feature = jax.random.normal(k_feat, (N, in_feats), jnp.float32)

    # directed ring + self-loops: every node has in-degree >= 1
    eye = jnp.eye(N, dtype=jnp.float32)
    ring = jnp.roll(eye, shift=1, axis=1)       # edge (i-1) -> i
    adj = jnp.clip(eye + ring, 0.0, 1.0)        # adj[dst, src]
    # Cut the single edge crossing into the second dst tile so one adjacency block is
    # entirely empty -> exercises the block-sparsity skip path (node keeps its self-loop).
    adj = adj.at[N // 2, N // 2 - 1].set(0.0)

    params = init_params(k_param, in_feats, out_feats)

    out = gat_layer(feature, adj, params, tq=256, tk=256)
    out = jax.block_until_ready(out)

    ref = gat_reference(feature, adj, params)
    max_err = float(jnp.max(jnp.abs(out - ref)))
    # bf16 matmul inputs => relaxed tolerance vs the f32 reference
    assert jnp.allclose(out, ref, atol=5e-2, rtol=5e-2), f"mismatch vs reference (max|err|={max_err})"

    print("KERNEL_OK")
</pallas_src>

<mosaic_0001>
module attributes {stable_mosaic.version = 11 : i64} {
  func.func @_gat_kernel(%arg0: i32, %arg1: i32, %arg2: memref<2xi32, #tpu.memory_space<smem>>, %arg3: memref<4xi32, #tpu.memory_space<smem>>, %arg4: memref<256x32xbf16, #tpu.memory_space<vmem>>, %arg5: memref<256x32xbf16, #tpu.memory_space<vmem>>, %arg6: memref<256x256xi8, #tpu.memory_space<vmem>>, %arg7: memref<32x128xbf16, #tpu.memory_space<vmem>>, %arg8: memref<1x128xf32, #tpu.memory_space<vmem>>, %arg9: memref<32x256xbf16, #tpu.memory_space<vmem>>, %arg10: memref<1x256xf32, #tpu.memory_space<vmem>>, %arg11: memref<128x128xbf16, #tpu.memory_space<vmem>>, %arg12: memref<1x128xf32, #tpu.memory_space<vmem>>, %arg13: memref<256x128xf32, #tpu.memory_space<vmem>>, %arg14: memref<256x128xbf16, #tpu.memory_space<vmem>>, %arg15: memref<256x1xf32, #tpu.memory_space<vmem>>, %arg16: memref<256x128xf32, #tpu.memory_space<vmem>>) attributes {dimension_semantics = [#tpu.dimension_semantics<parallel>, #tpu.dimension_semantics<arbitrary>], iteration_bounds = array<i64: 2, 2>, scalar_prefetch = 2 : i64, scratch_operands = 3 : i64, tpu.core_type = #tpu.core_type<tc>, window_params = [{transform_indices = @transform_0, window_bounds = array<i64: 256, 32>}, {transform_indices = @transform_1, window_bounds = array<i64: 256, 32>}, {transform_indices = @transform_2, window_bounds = array<i64: 256, 256>}, {pipeline_mode = #tpu.pipeline_mode<synchronous>, transform_indices = @transform_3, window_bounds = array<i64: 32, 128>}, {pipeline_mode = #tpu.pipeline_mode<synchronous>, transform_indices = @transform_4, window_bounds = array<i64: 1, 128>}, {pipeline_mode = #tpu.pipeline_mode<synchronous>, transform_indices = @transform_5, window_bounds = array<i64: 32, 256>}, {pipeline_mode = #tpu.pipeline_mode<synchronous>, transform_indices = @transform_6, window_bounds = array<i64: 1, 256>}, {pipeline_mode = #tpu.pipeline_mode<synchronous>, transform_indices = @transform_7, window_bounds = array<i64: 128, 128>}, {pipeline_mode = #tpu.pipeline_mode<synchronous>, transform_indices = @transform_8, window_bounds = array<i64: 1, 128>}, {transform_indices = @transform_9, window_bounds = array<i64: 256, 128>}]} {
    %0 = arith.index_cast %arg0 : i32 to index
    %1 = memref.load %arg2[%0] : memref<2xi32, #tpu.memory_space<smem>>
    %c0_i32 = arith.constant 0 : i32
    %2 = arith.cmpi eq, %arg1, %c0_i32 : i32
    %3 = arith.extui %2 : i1 to i32
    %c0_i32_0 = arith.constant 0 : i32
    %4 = arith.cmpi ne, %3, %c0_i32_0 : i32
    scf.if %4 {
      %c0 = arith.constant 0 : index
      %c0_3 = arith.constant 0 : index
      %12 = vector.load %arg4[%c0, %c0_3] : memref<256x32xbf16, #tpu.memory_space<vmem>>, vector<256x32xbf16>
      %c0_4 = arith.constant 0 : index
      %c0_5 = arith.constant 0 : index
      %13 = vector.load %arg7[%c0_4, %c0_5] : memref<32x128xbf16, #tpu.memory_space<vmem>>, vector<32x128xbf16>
      %cst = arith.constant dense<0.000000e+00> : vector<256x128xf32>
      %14 = tpu.matmul %12, %13, %cst {dimension_numbers = #tpu.dot_dimension_numbers<[1], [0], [0], [1], [0, 0, 1, 1], [], []>} : vector<256x32xbf16>, vector<32x128xbf16>, vector<256x128xf32> -> vector<256x128xf32>
      %c0_6 = arith.constant 0 : index
      %c0_7 = arith.constant 0 : index
      %15 = vector.load %arg8[%c0_6, %c0_7] : memref<1x128xf32, #tpu.memory_space<vmem>>, vector<1x128xf32>
      %16 = vector.broadcast %15 : vector<1x128xf32> to vector<256x128xf32>
      %17 = arith.addf %14, %16 : vector<256x128xf32>
      %18 = arith.truncf %17 : vector<256x128xf32> to vector<256x128xbf16>
      %c0_8 = arith.constant 0 : index
      %c0_9 = arith.constant 0 : index
      %19 = vector.load %arg14[%c0_8, %c0_9] : memref<256x128xbf16, #tpu.memory_space<vmem>>, vector<256x128xbf16>
      tpu.vector_store %arg14[%c0_8, %c0_9], %18 {strides = array<i32>} : memref<256x128xbf16, #tpu.memory_space<vmem>>, vector<256x128xbf16>,
      %cst_10 = arith.constant 0xFF800000 : f32
      %20 = vector.broadcast %cst_10 : f32 to vector<256x1xf32>
      %c0_11 = arith.constant 0 : index
      %c0_12 = arith.constant 0 : index
      %21 = vector.load %arg15[%c0_11, %c0_12] : memref<256x1xf32, #tpu.memory_space<vmem>>, vector<256x1xf32>
      tpu.vector_store %arg15[%c0_11, %c0_12], %20 {strides = array<i32>} : memref<256x1xf32, #tpu.memory_space<vmem>>, vector<256x1xf32>,
      %cst_13 = arith.constant 0.000000e+00 : f32
      %22 = vector.broadcast %cst_13 : f32 to vector<256x128xf32>
      %c0_14 = arith.constant 0 : index
      %c0_15 = arith.constant 0 : index
      %23 = vector.load %arg16[%c0_14, %c0_15] : memref<256x128xf32, #tpu.memory_space<vmem>>, vector<256x128xf32>
      tpu.vector_store %arg16[%c0_14, %c0_15], %22 {strides = array<i32>} : memref<256x128xf32, #tpu.memory_space<vmem>>, vector<256x128xf32>,
    } else {
    }
    %5 = arith.cmpi slt, %arg1, %1 : i32
    %6 = arith.extui %5 : i1 to i32
    %c0_i32_1 = arith.constant 0 : i32
    %7 = arith.cmpi ne, %6, %c0_i32_1 : i32
    scf.if %7 {
      %c0 = arith.constant 0 : index
      %c0_3 = arith.constant 0 : index
      %12 = vector.load %arg5[%c0, %c0_3] : memref<256x32xbf16, #tpu.memory_space<vmem>>, vector<256x32xbf16>
      %c0_4 = arith.constant 0 : index
      %c0_5 = arith.constant 0 : index
      %13 = vector.load %arg9[%c0_4, %c0_5] : memref<32x256xbf16, #tpu.memory_space<vmem>>, vector<32x256xbf16>
      %cst = arith.constant dense<0.000000e+00> : vector<256x256xf32>
      %14 = tpu.matmul %12, %13, %cst {dimension_numbers = #tpu.dot_dimension_numbers<[1], [0], [0], [1], [0, 0, 1, 1], [], []>} : vector<256x32xbf16>, vector<32x256xbf16>, vector<256x256xf32> -> vector<256x256xf32>
      %c0_6 = arith.constant 0 : index
      %c0_7 = arith.constant 0 : index
      %15 = vector.load %arg10[%c0_6, %c0_7] : memref<1x256xf32, #tpu.memory_space<vmem>>, vector<1x256xf32>
      %16 = vector.broadcast %15 : vector<1x256xf32> to vector<256x256xf32>
      %17 = arith.addf %14, %16 : vector<256x256xf32>
      %18 = vector.extract_strided_slice %17 {offsets = [0, 0], sizes = [256, 128], strides = [1, 1]} : vector<256x256xf32> to vector<256x128xf32>
      %19 = arith.truncf %18 : vector<256x128xf32> to vector<256x128xbf16>
      %20 = vector.extract_strided_slice %17 {offsets = [0, 128], sizes = [256, 128], strides = [1, 1]} : vector<256x256xf32> to vector<256x128xf32>
      %21 = arith.truncf %20 : vector<256x128xf32> to vector<256x128xbf16>
      %c0_8 = arith.constant 0 : index
      %c0_9 = arith.constant 0 : index
      %22 = vector.load %arg14[%c0_8, %c0_9] : memref<256x128xbf16, #tpu.memory_space<vmem>>, vector<256x128xbf16>
      %cst_10 = arith.constant dense<0.000000e+00> : vector<256x256xf32>
      %23 = tpu.matmul %22, %19, %cst_10 {dimension_numbers = #tpu.dot_dimension_numbers<[1], [1], [0], [0], [0, 0, 1, 0], [], []>} : vector<256x128xbf16>, vector<256x128xbf16>, vector<256x256xf32> -> vector<256x256xf32>
      %c0_11 = arith.constant 0 : index
      %c0_12 = arith.constant 0 : index
      %24 = vector.load %arg6[%c0_11, %c0_12] : memref<256x256xi8, #tpu.memory_space<vmem>>, vector<256x256xi8>
      %c0_i8 = arith.constant 0 : i8
      %25 = vector.broadcast %c0_i8 : i8 to vector<256x256xi8>
      %26 = arith.cmpi ne, %24, %25 : vector<256x256xi8>
      %cst_13 = arith.constant -1.000000e+30 : f32
      %27 = vector.broadcast %cst_13 : f32 to vector<256x256xf32>
      %28 = arith.select %26, %23, %27 : vector<256x256xi1>, vector<256x256xf32>
      %c0_14 = arith.constant 0 : index
      %c0_15 = arith.constant 0 : index
      %29 = vector.load %arg15[%c0_14, %c0_15] : memref<256x1xf32, #tpu.memory_space<vmem>>, vector<256x1xf32>
      %cst_16 = arith.constant dense<0xFF800000> : vector<256xf32>
      %30 = vector.multi_reduction <maximumf>, %28, %cst_16 [1] : vector<256x256xf32> to vector<256xf32>
      %31 = vector.shape_cast %30 : vector<256xf32> to vector<256x1xf32>
      %32 = arith.maximumf %29, %31 : vector<256x1xf32>
      %33 = arith.subf %29, %32 : vector<256x1xf32>
      %34 = math.exp %33 : vector<256x1xf32>
      %35 = vector.broadcast %32 : vector<256x1xf32> to vector<256x256xf32>
      %36 = arith.subf %28, %35 : vector<256x256xf32>
      %37 = math.exp %36 : vector<256x256xf32>
      %cst_17 = arith.constant 0.000000e+00 : f32
      %38 = vector.broadcast %cst_17 : f32 to vector<256x256xf32>
      %39 = arith.select %26, %37, %38 : vector<256x256xi1>, vector<256x256xf32>
      %40 = arith.truncf %39 : vector<256x256xf32> to vector<256x256xbf16>
      %c0_18 = arith.constant 0 : index
      %c0_19 = arith.constant 0 : index
      %41 = vector.load %arg16[%c0_18, %c0_19] : memref<256x128xf32, #tpu.memory_space<vmem>>, vector<256x128xf32>
      %42 = vector.broadcast %34 : vector<256x1xf32> to vector<256x128xf32>
      %43 = arith.mulf %42, %41 : vector<256x128xf32>
      %cst_20 = arith.constant dense<0.000000e+00> : vector<256x128xf32>
      %44 = tpu.matmul %40, %21, %cst_20 {dimension_numbers = #tpu.dot_dimension_numbers<[1], [0], [0], [1], [0, 0, 1, 1], [], []>} : vector<256x256xbf16>, vector<256x128xbf16>, vector<256x128xf32> -> vector<256x128xf32>
      %45 = arith.addf %43, %44 : vector<256x128xf32>
      %c0_21 = arith.constant 0 : index
      %c0_22 = arith.constant 0 : index
      %46 = vector.load %arg16[%c0_21, %c0_22] : memref<256x128xf32, #tpu.memory_space<vmem>>, vector<256x128xf32>
      tpu.vector_store %arg16[%c0_21, %c0_22], %45 {strides = array<i32>} : memref<256x128xf32, #tpu.memory_space<vmem>>, vector<256x128xf32>,
      %c0_23 = arith.constant 0 : index
      %c0_24 = arith.constant 0 : index
      %47 = vector.load %arg15[%c0_23, %c0_24] : memref<256x1xf32, #tpu.memory_space<vmem>>, vector<256x1xf32>
      tpu.vector_store %arg15[%c0_23, %c0_24], %32 {strides = array<i32>} : memref<256x1xf32, #tpu.memory_space<vmem>>, vector<256x1xf32>,
    } else {
    }
    %c1_i32 = arith.constant 1 : i32
    %8 = arith.subi %1, %c1_i32 : i32
    %9 = arith.cmpi eq, %arg1, %8 : i32
    %10 = arith.extui %9 : i1 to i32
    %c0_i32_2 = arith.constant 0 : i32
    %11 = arith.cmpi ne, %10, %c0_i32_2 : i32
    scf.if %11 {
      %c0 = arith.constant 0 : index
      %c0_3 = arith.constant 0 : index
      %12 = vector.load %arg16[%c0, %c0_3] : memref<256x128xf32, #tpu.memory_space<vmem>>, vector<256x128xf32>
      %13 = vector.extract_strided_slice %12 {offsets = [0, 32], sizes = [256, 1], strides = [1, 1]} : vector<256x128xf32> to vector<256x1xf32>
      %cst = arith.constant 1.000000e-30 : f32
      %14 = vector.broadcast %cst : f32 to vector<256x1xf32>
      %15 = arith.maximumf %13, %14 : vector<256x1xf32>
      %16 = tpu.reciprocal %15 {approx = true} : vector<256x1xf32> -> vector<256x1xf32>
      %17 = vector.broadcast %16 : vector<256x1xf32> to vector<256x128xf32>
      %18 = arith.mulf %12, %17 : vector<256x128xf32>
      %19 = arith.truncf %18 : vector<256x128xf32> to vector<256x128xbf16>
      %c0_4 = arith.constant 0 : index
      %c0_5 = arith.constant 0 : index
      %20 = vector.load %arg11[%c0_4, %c0_5] : memref<128x128xbf16, #tpu.memory_space<vmem>>, vector<128x128xbf16>
      %cst_6 = arith.constant dense<0.000000e+00> : vector<256x128xf32>
      %21 = tpu.matmul %19, %20, %cst_6 {dimension_numbers = #tpu.dot_dimension_numbers<[1], [0], [0], [1], [0, 0, 1, 1], [], []>} : vector<256x128xbf16>, vector<128x128xbf16>, vector<256x128xf32> -> vector<256x128xf32>
      %c0_7 = arith.constant 0 : index
      %c0_8 = arith.constant 0 : index
      %22 = vector.load %arg12[%c0_7, %c0_8] : memref<1x128xf32, #tpu.memory_space<vmem>>, vector<1x128xf32>
      %23 = vector.broadcast %22 : vector<1x128xf32> to vector<256x128xf32>
      %24 = arith.addf %21, %23 : vector<256x128xf32>
      %cst_9 = arith.constant 0.000000e+00 : f32
      %25 = vector.broadcast %cst_9 : f32 to vector<256x128xf32>
      %26 = arith.maximumf %24, %25 : vector<256x128xf32>
      %c0_10 = arith.constant 0 : index
      %c0_11 = arith.constant 0 : index
      %27 = vector.load %arg13[%c0_10, %c0_11] : memref<256x128xf32, #tpu.memory_space<vmem>>, vector<256x128xf32>
      tpu.vector_store %arg13[%c0_10, %c0_11], %26 {strides = array<i32>} : memref<256x128xf32, #tpu.memory_space<vmem>>, vector<256x128xf32>,
    } else {
    }
    return
  }
  func.func @transform_0(%arg0: i32, %arg1: i32, %arg2: memref<2xi32, #tpu.memory_space<smem>>, %arg3: memref<4xi32, #tpu.memory_space<smem>>) -> (i32, i32) {
    %c0_i32 = arith.constant 0 : i32
    %c0_i32_0 = arith.constant 0 : i32
    return %arg0, %c0_i32 : i32, i32
  }
  func.func @transform_1(%arg0: i32, %arg1: i32, %arg2: memref<2xi32, #tpu.memory_space<smem>>, %arg3: memref<4xi32, #tpu.memory_space<smem>>) -> (i32, i32) {
    %c2_i32 = arith.constant 2 : i32
    %0 = arith.muli %arg0, %c2_i32 : i32
    %1 = arith.addi %0, %arg1 : i32
    %2 = arith.index_cast %1 : i32 to index
    %3 = memref.load %arg3[%2] : memref<4xi32, #tpu.memory_space<smem>>
    %c0_i32 = arith.constant 0 : i32
    %c0_i32_0 = arith.constant 0 : i32
    return %3, %c0_i32 : i32, i32
  }
  func.func @transform_2(%arg0: i32, %arg1: i32, %arg2: memref<2xi32, #tpu.memory_space<smem>>, %arg3: memref<4xi32, #tpu.memory_space<smem>>) -> (i32, i32) {
    %c2_i32 = arith.constant 2 : i32
    %0 = arith.muli %arg0, %c2_i32 : i32
    %1 = arith.addi %0, %arg1 : i32
    %2 = arith.index_cast %1 : i32 to index
    %3 = memref.load %arg3[%2] : memref<4xi32, #tpu.memory_space<smem>>
    %c0_i32 = arith.constant 0 : i32
    return %arg0, %3 : i32, i32
  }
  func.func @transform_3(%arg0: i32, %arg1: i32, %arg2: memref<2xi32, #tpu.memory_space<smem>>, %arg3: memref<4xi32, #tpu.memory_space<smem>>) -> (i32, i32) {
    %c0_i32 = arith.constant 0 : i32
    %c0_i32_0 = arith.constant 0 : i32
    %c0_i32_1 = arith.constant 0 : i32
    return %c0_i32, %c0_i32_0 : i32, i32
  }
  func.func @transform_4(%arg0: i32, %arg1: i32, %arg2: memref<2xi32, #tpu.memory_space<smem>>, %arg3: memref<4xi32, #tpu.memory_space<smem>>) -> (i32, i32) {
    %c0_i32 = arith.constant 0 : i32
    %c0_i32_0 = arith.constant 0 : i32
    %c0_i32_1 = arith.constant 0 : i32
    return %c0_i32, %c0_i32_0 : i32, i32
  }
  func.func @transform_5(%arg0: i32, %arg1: i32, %arg2: memref<2xi32, #tpu.memory_space<smem>>, %arg3: memref<4xi32, #tpu.memory_space<smem>>) -> (i32, i32) {
    %c0_i32 = arith.constant 0 : i32
    %c0_i32_0 = arith.constant 0 : i32
    %c0_i32_1 = arith.constant 0 : i32
    return %c0_i32, %c0_i32_0 : i32, i32
  }
  func.func @transform_6(%arg0: i32, %arg1: i32, %arg2: memref<2xi32, #tpu.memory_space<smem>>, %arg3: memref<4xi32, #tpu.memory_space<smem>>) -> (i32, i32) {
    %c0_i32 = arith.constant 0 : i32
    %c0_i32_0 = arith.constant 0 : i32
    %c0_i32_1 = arith.constant 0 : i32
    return %c0_i32, %c0_i32_0 : i32, i32
  }
  func.func @transform_7(%arg0: i32, %arg1: i32, %arg2: memref<2xi32, #tpu.memory_space<smem>>, %arg3: memref<4xi32, #tpu.memory_space<smem>>) -> (i32, i32) {
    %c0_i32 = arith.constant 0 : i32
    %c0_i32_0 = arith.constant 0 : i32
    %c0_i32_1 = arith.constant 0 : i32
    return %c0_i32, %c0_i32_0 : i32, i32
  }
  func.func @transform_8(%arg0: i32, %arg1: i32, %arg2: memref<2xi32, #tpu.memory_space<smem>>, %arg3: memref<4xi32, #tpu.memory_space<smem>>) -> (i32, i32) {
    %c0_i32 = arith.constant 0 : i32
    %c0_i32_0 = arith.constant 0 : i32
    %c0_i32_1 = arith.constant 0 : i32
    return %c0_i32, %c0_i32_0 : i32, i32
  }
  func.func @transform_9(%arg0: i32, %arg1: i32, %arg2: memref<2xi32, #tpu.memory_space<smem>>, %arg3: memref<4xi32, #tpu.memory_space<smem>>) -> (i32, i32) {
    %c0_i32 = arith.constant 0 : i32
    %c0_i32_0 = arith.constant 0 : i32
    return %arg0, %c0_i32 : i32, i32
  }
}

</mosaic_0001>

<bundles_post_ra>
// kernel: tpu_custom_call.1
= control target key start
LH: loop header
LB: loop body
LE: loop exit
PB: predicated region body
PF: predicated region fallthrough
CT: control target
= control target key end

     0   :  { %s7771_s0 = inlined_call_operand.vmem [shape: s32[2], index: 0, kind: input, shape index: {}]   ;;  %s7772_s2 = inlined_call_operand.vmem [shape: bf16[512,32], index: 2, kind: input, shape index: {}]   ;;  %s7773_s3 = inlined_call_operand.vmem [shape: bf16[512,32], index: 3, kind: input, shape index: {}]   ;;  %s7774_s4 = inlined_call_operand.vmem [shape: s8[512,512], index: 4, kind: input, shape index: {}]   ;;  %s7775_s5 = inlined_call_operand.vmem [shape: bf16[32,128], index: 5, kind: input, shape index: {}]   ;;  %s7776_s6 = inlined_call_operand.vmem [shape: f32[1,128], index: 6, kind: input, shape index: {}]   ;;  %s7777_s7 = inlined_call_operand.vmem [shape: bf16[32,256], index: 7, kind: input, shape index: {}]   ;;  %s7778_s8 = inlined_call_operand.vmem [shape: f32[1,256], index: 8, kind: input, shape index: {}]   ;;  %s7779_s9 = inlined_call_operand.vmem [shape: bf16[128,128], index: 9, kind: input, shape index: {}]   ;;  %s7780_s10 = inlined_call_operand.vmem [shape: f32[1,128], index: 10, kind: input, shape index: {}]   ;;  %s7781_s11 = inlined_call_operand.hbm [shape: f32[512,128], index: 11, kind: output, shape index: {}]   ;;  %s7782_s1 = inlined_call_operand.vmem [shape: s32[4], index: 1, kind: input, shape index: {}]  }
   0x1   :  { %8039 = sst [smem:[#allocation152_spill]] %s7774_s4  ;;  %s16_s19 = sshll.u32 %s7771_s0, 4  ;;  %s17_s19 = int_to_ptr.vmem [resolvable:$true] %s16_s19 }
   0x2   :  { %8040 = sst [smem:[#allocation153_spill]] %s7777_s7  ;;  %s20_s22 = sshll.u32 %s7782_s1, 4  ;;  %s21_s22 = int_to_ptr.vmem [resolvable:$true] %s20_s22 }
   0x3   :  { %8041 = sst [smem:[#allocation154_spill]] %s7778_s8  ;;  %s5271_s23 = scalar_lea.vmem %s17_s19, 16 }
   0x4   :  { %8042 = sst [smem:[#allocation155_spill]] %s7779_s9  ;;  %p5272_p0 = scmp.ne.s32.totalorder %s17_s19, %s5271_s23 }
   0x5   :  { %8043 = sst [smem:[#allocation156_spill]] %s7780_s10  ;;  %p5276_p1 = scmp.lt.s32.totalorder %s17_s19, %s17_s19 }
   0x6   :  { %8044 = sst [smem:[#allocation157_spill]] %s7781_s11  ;;  %p5277_p2 = scmp.lt.s32.totalorder %s5271_s23, %s5271_s23 }
   0x8   :  { %p5278_p3 = por %p5277_p2, %p5276_p1 }
   0xa   :  { %p5279_p4 = pnand %p5278_p3, %p5272_p0 }
   0xc   :  { %5282 = shalt.err (!%p5279_p4)  }
   0xd   :  { %s5407_s24 = smov [#allocation6]   ;;  %s5283_s25 = scalar_lea.vmem %s21_s22, 16 }
   0xe   :  { %19 = dma.vmem_to_smem %s17_s19, 16, %s5407_s24, [#allocation5] }
   0xf   :  { %p5284_p5 = scmp.ne.s32.totalorder %s21_s22, %s5283_s25  ;;  %p5288_p6 = scmp.lt.s32.totalorder %s21_s22, %s21_s22 }
  0x10   :  { %p5289_p7 = scmp.lt.s32.totalorder %s5283_s25, %s5283_s25 }
  0x12   :  { %p5290_p8 = por %p5289_p7, %p5288_p6 }
  0x14   :  { %p5291_p9 = pnand %p5290_p8, %p5284_p5 }
  0x16   :  { %5294 = shalt.err (!%p5291_p9)  }
  0x17   :  { %s5408_s0 = smov [#allocation7]  }
  0x18   :  { %23 = dma.vmem_to_smem %s21_s22, 16, %s5408_s0, [#allocation5] }
  0x19   :  { %5361 = dma.done.wait [#allocation5], 32 }
  0x1a   :  { %5362 = vsyncadd [#allocation5], 4294967264 }
  0x1b   :  { %25 = sfence }
  0x1c   :  { %26 = vsyncpa [#allocation10], 0 }
  0x1d   :  { %28 = vsyncpa [#allocation10 + $0x1], 0  ;;  %s5482_s1 = smov 0   ;;  %s5484_s26 = smov 0  }
  0x1e   :  { %s5486_s27 = smov 0   ;;  %s5488_s28 = smov 0  }
  0x1f   :  { %s5490_s29 = smov 0   ;;  %s5492_s30 = smov 0  }
  0x20   :  { %s5494_s12 = smov 0   ;;  %s5496_s13 = smov 0  }
  0x21   :  { %s5498_s14 = smov 0   ;;  %s5500_s15 = smov 0  }
  0x22 LB: > { %8045 = sst [smem:[#allocation13_spill]] %s5397_s13  ;;  %s4158_s16 = sadd.s32 4294967295, %s5405_s15   ;;  %s5405_s15 = sphi %s5500_s15, %s34_s15   ;;  %s5401_s14 = sphi %s5498_s14, %s8612_s14   ;;  %s5397_s13 = sphi %s5496_s13, %s8603_s13   ;;  %s5393_s12 = sphi %s5494_s12, %s8611_s12   ;;  %s5389_s30 = sphi %s5492_s30, %s8610_s30   ;;  %s5385_s29 = sphi %s5490_s29, %s8609_s29   ;;  %s5381_s28 = sphi %s5488_s28, %s8608_s28   ;;  %s5377_s27 = sphi %s5486_s27, %s8607_s27   ;;  %s5373_s26 = sphi %s5484_s26, %s8606_s26   ;;  %s5369_s1 = sphi %s5482_s1, %s8605_s1  }
  0x23   : > { %s43_s17 = sadd.s32 1, %s5397_s13  ;;  %s46_s18 = sadd.s32 1, %s5401_s14 }
  0x24   : > { %p44_p10 = scmp.ge.s32.totalorder %s43_s17, 2  ;;  %s4162_s19 = sshll.u32 %s5401_s14, 1 }
  0x25   : > { %s4159_s20 = sadd.s32 4294967294, %s5405_s15   ;;  %s109_s21 = sadd.s32 %s5397_s13, %s4162_s19 }
  0x26   : > { %s8614_s17 = smov (%p44_p10, %s43_s17), 0  ;;  %s8616_s18 = smov (!%p44_p10, %s46_s18), %s5401_s14 }
  0x27   : > { %8046 = sst [smem:[#allocation14_spill]] %s8614_s17  ;;  %p126_p11 = scmp.ne.s32.totalorder %s5385_s29, %s5381_s28 }
  0x28   : > { %s110_s22 = sld [smem:[#allocation7 + %s109_s21]]  ;;  %p48_p12 = scmp.ge.s32.totalorder %s8616_s18, 2 }
  0x29   : > { %p127_p13 = scmp.eq.s32.totalorder %s5405_s15, 0  ;;  %s271_s23 = sadd.s32 1, %s5377_s27 }
  0x2a   : > { %p281_p0 = scmp.ne.s32.totalorder %s5377_s27, %s5373_s26  ;;  %s8618_s18 = smov (%p48_p12, %s8616_s18), 0 }
  0x2b   : > { %8047 = sst [smem:[#allocation15_spill]] %s8618_s18  ;;  %p5549_p1 = por %p127_p13, %p126_p11 }
  0x2c   : > { %p282_p2 = scmp.eq.s32.totalorder %s4158_s16, 3  ;;  %s4163_s25 = sshll.u32 %s8618_s18, 1 }
  0x2d   : > { %s114_s0 = ssub.s32 %s5401_s14, %s8618_s18  ;;  %s112_s19 = sadd.s32 %s4163_s25, %s8614_s17 }
  0x2e   : > { %p269_p3 = scmp.eq.s32.totalorder %s114_s0, 0  ;;  %s113_s13 = sld [smem:[#allocation7 + %s112_s19]] }
  0x2f   : > { %p5557_p4 = por %p282_p2, %p281_p0  ;;  %p287_p5 = scmp.ne.s32.totalorder %s5373_s26, %s5369_s1 }
  0x30   : > { %s5562_s10 = scalar_select %p269_p3, %s5377_s27, %s271_s23  }
  0x31   : > { %p288_p6 = scmp.eq.s32.totalorder %s4159_s20, 3  ;;  %s119_s16 = sadd.s32 1, %s5385_s29 }
  0x32   : > { %8050 = sst [smem:[#allocation16_spill]] %s5562_s10  ;;  %p4165_p9 = scmp.ge.s32.totalorder %s5405_s15, 4 }
  0x33   : > { %p5566_p7 = por %p288_p6, %p287_p5 }
  0x34   : > { %s115_s8 = ssub.s32 %s110_s22, %s113_s13  ;;  %322 = sbr.rel (%p4165_p9) target bundleno = 76 (0x4c), region = 40 }
  0x35   : > { %s116_s7 = sor.u32 %s115_s8, %s114_s0 }
  0x36   : > { %p117_p8 = scmp.eq.s32.totalorder %s116_s7, 0 }
  0x38   : > { %s5572_s18 = scalar_select %p117_p8, %s5385_s29, %s119_s16  }
  0x39   : > { %349 = sbr.rel (!%p5549_p1) target bundleno = 76 (0x4c), region = 52  ;;  %s356_s23 = sld [smem:[#allocation7 + %s109_s21]] (%p5549_p1) }
  0x3a   : > { %s351_s20 = sand.u32 (%p5549_p1), 1, %s5385_s29   ;;  %s4413_s25 = sshll.u32 (%p5549_p1), %s5401_s14, 5 }
  0x3b   : > { %s4166_s19 = sshll.u32 (%p5549_p1), %s351_s20, 7  ;;  %s8052_s4 = sld [smem:[#allocation152_spill]] (%p5549_p1) }
  0x3c   : > { %s353_s21 = scalar_lea.vmem (%p5549_p1), [#allocation8], %s4166_s19 }
  0x3f   : > { %s4169_s17 = sshll.u32 %s356_s23, 1 }
  0x40   : > { %s360_s10 = sadd.s32 %s4413_s25, %s4169_s17 }
  0x41   : > { %s4171_s13 = sshll.u32 %s360_s10, 3 }
  0x42   : > { %s5582_s7 = scalar_lea.vmem %s8052_s4, %s4171_s13 }
  0x43   : > { %v375_v0 = vld [vmem:[%s5582_s7] sm:$0xff]  ;;  %v377_v1 = vld [vmem:[%s5582_s7 + $0x8] sm:$0xff] }
  0x44   : > { %v379_v2 = vld [vmem:[%s5582_s7 + $0x20] sm:$0xff]  ;;  %376 = vst [vmem:[%s353_s21] sm:$0xff] %v375_v0  ;;  %378 = vst [vmem:[%s353_s21 + $0x8] sm:$0xff] %v377_v1  ;;  %v381_v3 = vld [vmem:[%s5582_s7 + $0x28] sm:$0xff] }
  0x45   : > { %380 = vst [vmem:[%s353_s21 + $0x10] sm:$0xff] %v379_v2  ;;  %v383_v4 = vld [vmem:[%s5582_s7 + $0x40] sm:$0xff]  ;;  %v385_v5 = vld [vmem:[%s5582_s7 + $0x48] sm:$0xff]  ;;  %382 = vst [vmem:[%s353_s21 + $0x18] sm:$0xff] %v381_v3 }
  0x46   : > { %384 = vst [vmem:[%s353_s21 + $0x20] sm:$0xff] %v383_v4  ;;  %386 = vst [vmem:[%s353_s21 + $0x28] sm:$0xff] %v385_v5  ;;  %v387_v6 = vld [vmem:[%s5582_s7 + $0x60] sm:$0xff]  ;;  %v389_v7 = vld [vmem:[%s5582_s7 + $0x68] sm:$0xff] }
  0x47   : > { %v391_v8 = vld [vmem:[%s5582_s7 + $0x80] sm:$0xff]  ;;  %388 = vst [vmem:[%s353_s21 + $0x30] sm:$0xff] %v387_v6  ;;  %390 = vst [vmem:[%s353_s21 + $0x38] sm:$0xff] %v389_v7  ;;  %v393_v9 = vld [vmem:[%s5582_s7 + $0x88] sm:$0xff] }
  0x48   : > { %392 = vst [vmem:[%s353_s21 + $0x40] sm:$0xff] %v391_v8  ;;  %v395_v10 = vld [vmem:[%s5582_s7 + $0xa0] sm:$0xff]  ;;  %v397_v11 = vld [vmem:[%s5582_s7 + $0xa8] sm:$0xff]  ;;  %394 = vst [vmem:[%s353_s21 + $0x48] sm:$0xff] %v393_v9 }
  0x49   : > { %396 = vst [vmem:[%s353_s21 + $0x50] sm:$0xff] %v395_v10  ;;  %398 = vst [vmem:[%s353_s21 + $0x58] sm:$0xff] %v397_v11  ;;  %v399_v12 = vld [vmem:[%s5582_s7 + $0xc0] sm:$0xff]  ;;  %v401_v13 = vld [vmem:[%s5582_s7 + $0xc8] sm:$0xff] }
  0x4a   : > { %v403_v14 = vld [vmem:[%s5582_s7 + $0xe0] sm:$0xff]  ;;  %400 = vst [vmem:[%s353_s21 + $0x60] sm:$0xff] %v399_v12  ;;  %402 = vst [vmem:[%s353_s21 + $0x68] sm:$0xff] %v401_v13  ;;  %v405_v15 = vld [vmem:[%s5582_s7 + $0xe8] sm:$0xff] }
  0x4b   : > { %404 = vst [vmem:[%s353_s21 + $0x70] sm:$0xff] %v403_v14  ;;  %406 = vst [vmem:[%s353_s21 + $0x78] sm:$0xff] %v405_v15 }
  0x4c PF: > { %p4172_p10 = scmp.ge.s32.totalorder %s5405_s15, 1  ;;  %p411_p11 = scmp.lt.s32.totalorder %s5405_s15, 5 }
  0x4e   : > { %p412_p12 = pnand %p4172_p10, %p411_p11 }
  0x4f   : > { %s418_s10 = sand.u32 (!%p412_p12), 1, %s5381_s28   ;;  %s7789_s17 = sand.u32 (!%p412_p12), 1, %s5373_s26  }
  0x50   : > { %415 = sbr.rel (%p412_p12) target bundleno = 2030 (0x7ee), region = 75  ;;  %s4173_s24 = sshll.u32 (!%p412_p12), %s418_s10, 7 }
  0x51   : > { %s4174_s0 = sshll.u32 (!%p412_p12), %s7789_s17, 8  ;;  %s4175_s16 = sshll.u32 (!%p412_p12), %s5393_s12, 5 }
  0x52   : > { %s4177_s23 = sshll.u32 (!%p412_p12), %s5393_s12, 1  ;;  %p467_p13 = scmp.lt.s32.totalorder (!%p412_p12), %s4175_s16, 63 }
  0x53   : > { %s473_s20 = sadd.s32 (!%p412_p12), %s5389_s30, %s4177_s23  ;;  %s5610_s19 = sld [smem:[#allocation6 + %s5393_s12]] (!%p412_p12) }
  0x54   : > { %s474_s25 = sld [smem:[#allocation7 + %s473_s20]] (!%p412_p12)  ;;  %s5622_s23 = scalar_lea.vmem (!%p412_p12), [#allocation8], %s4173_s24 }
  0x55   : > { %s8620_s16 = smov (!%p467_p13, %s4175_s16), 63  ;;  %s5624_s20 = scalar_lea.vmem [#allocation9], %s4174_s0 }
  0x56   : > { %s4176_s13 = sshll.u32 %s8620_s16, 2  ;;  %p4180_p1 = scmp.ne.s32.totalorder %s5389_s30, 0 }
  0x57   : > { %s5615_s7 = scalar_lea.vmem %s7772_s2, %s4176_s13 }
  0x5a   : > { %s4178_s21 = sshll.u32 %s474_s25, 5 }
  0x5b   : > { %p476_p0 = scmp.lt.s32.totalorder %s4178_s21, 63  ;;  %497 = sbr.rel (%p4180_p1) target bundleno = 333 (0x14d), region = 83 }
  0x5d   : > { %s8622_s21 = smov (!%p476_p0, %s4178_s21), 63 }
  0x5e   : > { %s4179_s28 = sshll.u32 %s8622_s21, 2 }
  0x5f   : > { %s5620_s4 = scalar_lea.vmem %s7773_s3, %s4179_s28 }
  0x60   : > { %v4947_v16 = vld [vmem:[%s7775_s5 + $0x8] sm:$0xff]   ;;  %v4948_v17 = vld [vmem:[%s7775_s5] sm:$0xff]   ;;  %vm633_vm0 = vcmask 261120   ;;  %v4953_v22 = vld [vmem:[%s5615_s7 + $0x10] sm:$0xff]   ;;  %vm1003_vm1 = vcmask 7168   ;;  %v5409_v34 = vmov -inf  }
  0x61   : > { %4744 = vmatprep.subr.bf16.mxu0 %v4947_v16  ;;  %4828 = vmatprep.subr.bf16.mxu1 %v4947_v16  ;;  %v4949_v18 = vld [vmem:[%s5615_s7] sm:$0xff]   ;;  %v4951_v20 = vld [vmem:[%s5615_s7 + $0x8] sm:$0xff]   ;;  %v4954_v23 = vld [vmem:[%s5615_s7 + $0x50] sm:$0xff]   ;;  %1004 = vst.msk [vmem:[#allocation3] sm:$0xff] %vm1003_vm1, %v5409_v34  ;;  %v5410_v35 = vmov 0.0  }
  0x62   : > { %4745 = vmatpush3.bf16.msra.mxu0 %v4947_v16  ;;  %4830 = vmatpush3.bf16.msra.mxu1 %v4947_v16  ;;  %v4950_v19 = vld [vmem:[%s5615_s7 + $0x40] sm:$0xff]   ;;  %v4952_v21 = vld [vmem:[%s5615_s7 + $0x48] sm:$0xff]   ;;  %v4955_v24 = vld [vmem:[%s5615_s7 + $0x18] sm:$0xff]   ;;  %1005 = vst.msk [vmem:[#allocation3 + $0x8] sm:$0xff] %vm1003_vm1, %v5409_v34 }
  0x63   : > { %4746 = vmatprep.subr.bf16.mxu0 %v4948_v17  ;;  %4829 = vmatprep.subr.bf16.mxu1 %v4948_v17  ;;  %v4956_v25 = vld [vmem:[%s5615_s7 + $0x58] sm:$0xff]   ;;  %v4957_v26 = vld [vmem:[%s5615_s7 + $0x20] sm:$0xff]   ;;  %v4959_v28 = vld [vmem:[%s5615_s7 + $0x28] sm:$0xff]   ;;  %1006 = vst.msk [vmem:[#allocation3 + $0x10] sm:$0xff] %vm1003_vm1, %v5409_v34 }
  0x64   : > { %4748 = vmatprep.mubr.msk.bf16.mxu0 %vm633_vm0, %v4949_v18  ;;  %4764 = vmatprep.mubr.msk.bf16.mxu1 %vm633_vm0, %v4950_v19  ;;  %v4958_v27 = vld [vmem:[%s5615_s7 + $0x60] sm:$0xff]   ;;  %v4960_v29 = vld [vmem:[%s5615_s7 + $0x68] sm:$0xff]   ;;  %v4961_v30 = vld [vmem:[%s5615_s7 + $0x30] sm:$0xff]   ;;  %1007 = vst.msk [vmem:[#allocation3 + $0x18] sm:$0xff] %vm1003_vm1, %v5409_v34 }
  0x65   : > { %v4962_v31 = vld [vmem:[%s5615_s7 + $0x70] sm:$0xff]   ;;  %v4963_v32 = vld [vmem:[%s5615_s7 + $0x38] sm:$0xff]   ;;  %1008 = vst.msk [vmem:[#allocation3 + $0x20] sm:$0xff] %vm1003_vm1, %v5409_v34  ;;  %1009 = vst.msk [vmem:[#allocation3 + $0x28] sm:$0xff] %vm1003_vm1, %v5409_v34 }
  0x66   : > { %4747 = vmatpush3.bf16.msra.mxu0 %v4948_v17  ;;  %4831 = vmatpush3.bf16.msra.mxu1 %v4948_v17  ;;  %v4964_v33 = vld [vmem:[%s5615_s7 + $0x78] sm:$0xff]   ;;  %1010 = vst.msk [vmem:[#allocation3 + $0x30] sm:$0xff] %vm1003_vm1, %v5409_v34  ;;  %1011 = vst.msk [vmem:[#allocation3 + $0x38] sm:$0xff] %vm1003_vm1, %v5409_v34  ;;  %v5700_v38 = vld [vmem:[%s7776_s6] ss:$0 sm:$0xff] }
  0x67   : > { %1012 = vst.msk [vmem:[#allocation3 + $0x40] sm:$0xff] %vm1003_vm1, %v5409_v34  ;;  %1013 = vst.msk [vmem:[#allocation3 + $0x48] sm:$0xff] %vm1003_vm1, %v5409_v34 }
  0x68   : > { %1014 = vst.msk [vmem:[#allocation3 + $0x50] sm:$0xff] %vm1003_vm1, %v5409_v34  ;;  %1015 = vst.msk [vmem:[#allocation3 + $0x58] sm:$0xff] %vm1003_vm1, %v5409_v34 }
  0x69   : > { %4749 = vmatmul.mubr.msk.bf16.vlgmr.msra.gmra.mxu0 %vm633_vm0, %v4951_v20  ;;  %4765 = vmatmul.mubr.msk.bf16.vlgmr.msra.gmra.mxu1 %vm633_vm0, %v4952_v21  ;;  %1016 = vst.msk [vmem:[#allocation3 + $0x60] sm:$0xff] %vm1003_vm1, %v5409_v34  ;;  %1017 = vst.msk [vmem:[#allocation3 + $0x68] sm:$0xff] %vm1003_vm1, %v5409_v34 }
  0x6a   : > { %4752 = vmatprep.mubr.msk.bf16.mxu0 %vm633_vm0, %v4953_v22  ;;  %4768 = vmatprep.mubr.msk.bf16.mxu1 %vm633_vm0, %v4954_v23  ;;  %1018 = vst.msk [vmem:[#allocation3 + $0x70] sm:$0xff] %vm1003_vm1, %v5409_v34  ;;  %1019 = vst.msk [vmem:[#allocation3 + $0x78] sm:$0xff] %vm1003_vm1, %v5409_v34 }
  0x6b   : > { %1020 = vst.msk [vmem:[#allocation3 + $0x80] sm:$0xff] %vm1003_vm1, %v5409_v34  ;;  %1021 = vst.msk [vmem:[#allocation3 + $0x88] sm:$0xff] %vm1003_vm1, %v5409_v34 }
  0x6c   : > { %1022 = vst.msk [vmem:[#allocation3 + $0x90] sm:$0xff] %vm1003_vm1, %v5409_v34  ;;  %1023 = vst.msk [vmem:[#allocation3 + $0x98] sm:$0xff] %vm1003_vm1, %v5409_v34 }
  0x6d   : > { %1024 = vst.msk [vmem:[#allocation3 + $0xa0] sm:$0xff] %vm1003_vm1, %v5409_v34  ;;  %1025 = vst.msk [vmem:[#allocation3 + $0xa8] sm:$0xff] %vm1003_vm1, %v5409_v34 }
  0x6e   : > { %1026 = vst.msk [vmem:[#allocation3 + $0xb0] sm:$0xff] %vm1003_vm1, %v5409_v34  ;;  %1027 = vst.msk [vmem:[#allocation3 + $0xb8] sm:$0xff] %vm1003_vm1, %v5409_v34 }
  0x6f   : > { %1028 = vst.msk [vmem:[#allocation3 + $0xc0] sm:$0xff] %vm1003_vm1, %v5409_v34  ;;  %1029 = vst.msk [vmem:[#allocation3 + $0xc8] sm:$0xff] %vm1003_vm1, %v5409_v34 }
  0x70   : > { %1030 = vst.msk [vmem:[#allocation3 + $0xd0] sm:$0xff] %vm1003_vm1, %v5409_v34  ;;  %1031 = vst.msk [vmem:[#allocation3 + $0xd8] sm:$0xff] %vm1003_vm1, %v5409_v34 }
  0x71   : > { %4753 = vmatmul.mubr.msk.bf16.gmra.mxu0 %vm633_vm0, %v4955_v24  ;;  %4769 = vmatmul.mubr.msk.bf16.gmra.mxu1 %vm633_vm0, %v4956_v25  ;;  %1032 = vst.msk [vmem:[#allocation3 + $0xe0] sm:$0xff] %vm1003_vm1, %v5409_v34  ;;  %1033 = vst.msk [vmem:[#allocation3 + $0xe8] sm:$0xff] %vm1003_vm1, %v5409_v34 }
  0x72   : > { %4756 = vmatprep.mubr.msk.bf16.mxu0 %vm633_vm0, %v4957_v26  ;;  %4772 = vmatprep.mubr.msk.bf16.mxu1 %vm633_vm0, %v4958_v27  ;;  %1034 = vst.msk [vmem:[#allocation3 + $0xf0] sm:$0xff] %vm1003_vm1, %v5409_v34  ;;  %1035 = vst.msk [vmem:[#allocation3 + $0xf8] sm:$0xff] %vm1003_vm1, %v5409_v34 }
  0x73   : > { %1036 = vst [vmem:[#allocation4 + $0xb0] sm:$0xff] %v5410_v35  ;;  %1037 = vst [vmem:[#allocation4] sm:$0xff] %v5410_v35 }
  0x74   : > { %1038 = vst [vmem:[#allocation4 + $0xd8] sm:$0xff] %v5410_v35  ;;  %1039 = vst [vmem:[#allocation4 + $0x18] sm:$0xff] %v5410_v35 }
  0x75   : > { %1040 = vst [vmem:[#allocation4 + $0x50] sm:$0xff] %v5410_v35  ;;  %1041 = vst [vmem:[#allocation4 + $0x68] sm:$0xff] %v5410_v35 }
  0x76   : > { %1042 = vst [vmem:[#allocation4 + $0x30] sm:$0xff] %v5410_v35  ;;  %1043 = vst [vmem:[#allocation4 + $0x48] sm:$0xff] %v5410_v35 }
  0x77   : > { %1044 = vst [vmem:[#allocation4 + $0x80] sm:$0xff] %v5410_v35  ;;  %1045 = vst [vmem:[#allocation4 + $0x88] sm:$0xff] %v5410_v35 }
  0x78   : > { %1046 = vst [vmem:[#allocation4 + $0xe8] sm:$0xff] %v5410_v35  ;;  %1047 = vst [vmem:[#allocation4 + $0xb8] sm:$0xff] %v5410_v35 }
  0x79   : > { %4757 = vmatmul.mubr.msk.bf16.gmra.mxu0 %vm633_vm0, %v4959_v28  ;;  %4773 = vmatmul.mubr.msk.bf16.gmra.mxu1 %vm633_vm0, %v4960_v29  ;;  %1048 = vst [vmem:[#allocation4 + $0x60] sm:$0xff] %v5410_v35  ;;  %1049 = vst [vmem:[#allocation4 + $0xf0] sm:$0xff] %v5410_v35 }
  0x7a   : > { %4760 = vmatprep.mubr.msk.bf16.mxu0 %vm633_vm0, %v4961_v30  ;;  %4776 = vmatprep.mubr.msk.bf16.mxu1 %vm633_vm0, %v4962_v31  ;;  %1050 = vst [vmem:[#allocation4 + $0x8] sm:$0xff] %v5410_v35  ;;  %1051 = vst [vmem:[#allocation4 + $0x78] sm:$0xff] %v5410_v35 }
  0x7b   : > { %1052 = vst [vmem:[#allocation4 + $0x38] sm:$0xff] %v5410_v35  ;;  %1053 = vst [vmem:[#allocation4 + $0x58] sm:$0xff] %v5410_v35 }
  0x7c   : > { %1054 = vst [vmem:[#allocation4 + $0x40] sm:$0xff] %v5410_v35  ;;  %1055 = vst [vmem:[#allocation4 + $0xc8] sm:$0xff] %v5410_v35 }
  0x7d   : > { %1056 = vst [vmem:[#allocation4 + $0xe0] sm:$0xff] %v5410_v35  ;;  %1057 = vst [vmem:[#allocation4 + $0x90] sm:$0xff] %v5410_v35 }
  0x7e   : > { %1058 = vst [vmem:[#allocation4 + $0x70] sm:$0xff] %v5410_v35  ;;  %1059 = vst [vmem:[#allocation4 + $0xc0] sm:$0xff] %v5410_v35 }
  0x7f   : > { %1060 = vst [vmem:[#allocation4 + $0xa8] sm:$0xff] %v5410_v35  ;;  %1061 = vst [vmem:[#allocation4 + $0xd0] sm:$0xff] %v5410_v35 }
  0x80   : > { %1062 = vst [vmem:[#allocation4 + $0x10] sm:$0xff] %v5410_v35  ;;  %1063 = vst [vmem:[#allocation4 + $0x28] sm:$0xff] %v5410_v35 }
  0x81   : > { %4761 = vmatmul.mubr.msk.bf16.gmra.mxu0 %vm633_vm0, %v4963_v32  ;;  %4777 = vmatmul.mubr.msk.bf16.gmra.mxu1 %vm633_vm0, %v4964_v33  ;;  %1064 = vst [vmem:[#allocation4 + $0xa0] sm:$0xff] %v5410_v35  ;;  %1065 = vst [vmem:[#allocation4 + $0xf8] sm:$0xff] %v5410_v35 }
  0x82   : > { %1066 = vst [vmem:[#allocation4 + $0x20] sm:$0xff] %v5410_v35  ;;  %1067 = vst [vmem:[#allocation4 + $0x98] sm:$0xff] %v5410_v35 }
 0x129   : > { %v4750_v36 = vpop.f32.mrf.mxu0  ;;  %v4766_v37 = vpop.f32.mrf.mxu1 }
 0x12a   : > { %v725_v43 = vadd.f32 %v4750_v36, %v5700_v38  ;;  %v789_v44 = vadd.f32 %v4766_v37, %v5700_v38 }
 0x12b   : > { %v716_v39 = vpop.f32.mrf.mxu0  ;;  %v780_v40 = vpop.f32.mrf.mxu1 }
 0x12c   : > { %v717_v47 = vadd.f32 %v5700_v38, %v716_v39  ;;  %v781_v48 = vadd.f32 %v5700_v38, %v780_v40 }
 0x12d   : > { %v4751_v41 = vpop.f32.mrf.mxu0  ;;  %v4767_v42 = vpop.f32.mrf.mxu1 }
 0x12e   : > { %v728_v45 = vadd.f32 %v4751_v41, %v5700_v38  ;;  %v792_v46 = vadd.f32 %v4767_v42, %v5700_v38 }
 0x12f   : > { %v719_v49 = vpop.f32.mrf.mxu0  ;;  %v783_v50 = vpop.f32.mrf.mxu1 }
 0x130   : > { %v4455_v51 = vpack.c.bf16 %v728_v45, %v725_v43  ;;  %v4495_v52 = vpack.c.bf16 %v792_v46, %v789_v44  ;;  %v720_v53 = vadd.f32 %v5700_v38, %v719_v49  ;;  %v784_v54 = vadd.f32 %v5700_v38, %v783_v50 }
 0x131   : > { %v4754_v55 = vpop.f32.mrf.mxu0  ;;  %v4770_v56 = vpop.f32.mrf.mxu1 }
 0x132   : > { %4527 = vst [vmem:[#allocation2 + $0x8] sm:$0xff] %v4455_v51   ;;  %4535 = vst [vmem:[#allocation2 + $0x48] sm:$0xff] %v4495_v52   ;;  %v4450_v57 = vpack.c.bf16 %v720_v53, %v717_v47  ;;  %v4490_v58 = vpack.c.bf16 %v784_v54, %v781_v48  ;;  %v741_v63 = vadd.f32 %v4754_v55, %v5700_v38 }
 0x133   : > { %v732_v59 = vpop.f32.mrf.mxu0  ;;  %v796_v60 = vpop.f32.mrf.mxu1  ;;  %v805_v0 = vadd.f32 %v4770_v56, %v5700_v38 }
 0x134   : > { %4451 = vst [vmem:[#allocation2] sm:$0xff] %v4450_v57   ;;  %4534 = vst [vmem:[#allocation2 + $0x40] sm:$0xff] %v4490_v58   ;;  %v733_v3 = vadd.f32 %v5700_v38, %v732_v59  ;;  %v797_v4 = vadd.f32 %v5700_v38, %v796_v60 }
 0x135   : > { %v4755_v61 = vpop.f32.mrf.mxu0  ;;  %v4771_v62 = vpop.f32.mrf.mxu1 }
 0x136   : > { %v744_v1 = vadd.f32 %v4755_v61, %v5700_v38  ;;  %v808_v2 = vadd.f32 %v4771_v62, %v5700_v38 }
 0x137   : > { %v735_v5 = vpop.f32.mrf.mxu0  ;;  %v799_v6 = vpop.f32.mrf.mxu1 }
 0x138   : > { %v4465_v7 = vpack.c.bf16 %v744_v1, %v741_v63  ;;  %v4505_v8 = vpack.c.bf16 %v808_v2, %v805_v0  ;;  %v736_v9 = vadd.f32 %v5700_v38, %v735_v5  ;;  %v800_v10 = vadd.f32 %v5700_v38, %v799_v6 }
 0x139   : > { %v4758_v11 = vpop.f32.mrf.mxu0  ;;  %v4774_v12 = vpop.f32.mrf.mxu1 }
 0x13a   : > { %4529 = vst [vmem:[#allocation2 + $0x18] sm:$0xff] %v4465_v7   ;;  %4537 = vst [vmem:[#allocation2 + $0x58] sm:$0xff] %v4505_v8   ;;  %v4460_v13 = vpack.c.bf16 %v736_v9, %v733_v3  ;;  %v4500_v14 = vpack.c.bf16 %v800_v10, %v797_v4  ;;  %v757_v19 = vadd.f32 %v4758_v11, %v5700_v38 }
 0x13b   : > { %v748_v15 = vpop.f32.mrf.mxu0  ;;  %v812_v16 = vpop.f32.mrf.mxu1  ;;  %v821_v20 = vadd.f32 %v4774_v12, %v5700_v38 }
 0x13c   : > { %4528 = vst [vmem:[#allocation2 + $0x10] sm:$0xff] %v4460_v13   ;;  %4536 = vst [vmem:[#allocation2 + $0x50] sm:$0xff] %v4500_v14   ;;  %v749_v23 = vadd.f32 %v5700_v38, %v748_v15  ;;  %v813_v24 = vadd.f32 %v5700_v38, %v812_v16 }
 0x13d   : > { %v4759_v17 = vpop.f32.mrf.mxu0  ;;  %v4775_v18 = vpop.f32.mrf.mxu1 }
 0x13e   : > { %v760_v21 = vadd.f32 %v4759_v17, %v5700_v38  ;;  %v824_v22 = vadd.f32 %v4775_v18, %v5700_v38 }
 0x13f   : > { %v751_v25 = vpop.f32.mrf.mxu0  ;;  %v815_v26 = vpop.f32.mrf.mxu1 }
 0x140   : > { %v4475_v27 = vpack.c.bf16 %v760_v21, %v757_v19  ;;  %v4515_v28 = vpack.c.bf16 %v824_v22, %v821_v20  ;;  %v752_v29 = vadd.f32 %v5700_v38, %v751_v25  ;;  %v816_v30 = vadd.f32 %v5700_v38, %v815_v26 }
 0x141   : > { %v4762_v31 = vpop.f32.mrf.mxu0  ;;  %v4778_v32 = vpop.f32.mrf.mxu1 }
 0x142   : > { %4531 = vst [vmem:[#allocation2 + $0x28] sm:$0xff] %v4475_v27   ;;  %4539 = vst [vmem:[#allocation2 + $0x68] sm:$0xff] %v4515_v28   ;;  %v4470_v33 = vpack.c.bf16 %v752_v29, %v749_v23  ;;  %v4510_v34 = vpack.c.bf16 %v816_v30, %v813_v24  ;;  %v773_v40 = vadd.f32 %v4762_v31, %v5700_v38 }
 0x143   : > { %v764_v35 = vpop.f32.mrf.mxu0  ;;  %v828_v36 = vpop.f32.mrf.mxu1  ;;  %v837_v41 = vadd.f32 %v4778_v32, %v5700_v38 }
 0x144   : > { %4530 = vst [vmem:[#allocation2 + $0x20] sm:$0xff] %v4470_v33   ;;  %4538 = vst [vmem:[#allocation2 + $0x60] sm:$0xff] %v4510_v34   ;;  %v765_v44 = vadd.f32 %v5700_v38, %v764_v35  ;;  %v829_v45 = vadd.f32 %v5700_v38, %v828_v36 }
 0x145   : > { %v4763_v37 = vpop.f32.mrf.mxu0  ;;  %v4779_v39 = vpop.f32.mrf.mxu1 }
 0x146   : > { %v776_v42 = vadd.f32 %v4763_v37, %v5700_v38  ;;  %v840_v43 = vadd.f32 %v4779_v39, %v5700_v38 }
 0x147   : > { %v767_v46 = vpop.f32.mrf.mxu0  ;;  %v831_v47 = vpop.f32.mrf.mxu1 }
 0x148   : > { %v4485_v48 = vpack.c.bf16 %v776_v42, %v773_v40  ;;  %v4525_v49 = vpack.c.bf16 %v840_v43, %v837_v41  ;;  %v768_v50 = vadd.f32 %v5700_v38, %v767_v46  ;;  %v832_v51 = vadd.f32 %v5700_v38, %v831_v47 }
 0x14a   : > { %4533 = vst [vmem:[#allocation2 + $0x38] sm:$0xff] %v4485_v48   ;;  %4541 = vst [vmem:[#allocation2 + $0x78] sm:$0xff] %v4525_v49   ;;  %v4480_v52 = vpack.c.bf16 %v768_v50, %v765_v44  ;;  %v4520_v53 = vpack.c.bf16 %v832_v51, %v829_v45 }
 0x14c   : > { %4532 = vst [vmem:[#allocation2 + $0x30] sm:$0xff] %v4480_v52   ;;  %4540 = vst [vmem:[#allocation2 + $0x70] sm:$0xff] %v4520_v53  }
 0x14d PF: > { %p4248_p2 = scmp.ge.s32.totalorder %s5389_s30, %s5610_s19 }
 0x14f   : > { %1071 = sbr.rel (%p4248_p2) target bundleno = 1586 (0x632), region = 87 }
 0x154   : > { %s8053_s7 = sld [smem:[#allocation153_spill]]  ;;  %v7790_v55 = vmov 0   ;;  %v4973_v58 = vld [vmem:[%s5620_s4] sm:$0xff]   ;;  %vm1220_vm2 = vcmask 261120   ;;  %v4975_v60 = vld [vmem:[%s5620_s4 + $0x8] sm:$0xff]   ;;  %v4977_v62 = vld [vmem:[%s5620_s4 + $0x10] sm:$0xff]   ;;  %v1110_v10 = vlaneseq }
 0x155   : > { %1301 = vmatprep.mubr.bf16.mxu0 %v7790_v55  ;;  %1381 = vmatprep.mubr.bf16.mxu1 %v7790_v55  ;;  %v4974_v59 = vld [vmem:[%s5620_s4 + $0x40] sm:$0xff]   ;;  %v4976_v61 = vld [vmem:[%s5620_s4 + $0x48] sm:$0xff]   ;;  %v4978_v63 = vld [vmem:[%s5620_s4 + $0x50] sm:$0xff]   ;;  %s8055_s0 = sld [smem:[#allocation154_spill]] }
 0x156   : > { %4965 = vset.pattern.permute.xlu0 %v7790_v55  ;;  %4966 = vset.pattern.permute.xlu1 %v7790_v55  ;;  %v4979_v0 = vld [vmem:[%s5620_s4 + $0x18] sm:$0xff]   ;;  %v4981_v2 = vld [vmem:[%s5620_s4 + $0x20] sm:$0xff]   ;;  %v4983_v4 = vld [vmem:[%s5620_s4 + $0x28] sm:$0xff]   ;;  %v1111_v11 = vshrl.u32 %v1110_v10, 7 }
 0x157   : > { %v4980_v1 = vld [vmem:[%s5620_s4 + $0x58] sm:$0xff]   ;;  %v4982_v3 = vld [vmem:[%s5620_s4 + $0x60] sm:$0xff]   ;;  %v4984_v5 = vld [vmem:[%s5620_s4 + $0x68] sm:$0xff]  }
 0x158   : > { %v4985_v6 = vld [vmem:[%s5620_s4 + $0x30] sm:$0xff]   ;;  %v4987_v8 = vld [vmem:[%s5620_s4 + $0x38] sm:$0xff]   ;;  %v5798_v12 = vld [vmem:[#allocation2] sm:$0xff]   ;;  %v1112_v13 = vsub.s32 0, %v1111_v11  ;;  %v1116_v15 = vsub.s32 1, %v1111_v11 }
 0x159   : > { %v4986_v7 = vld [vmem:[%s5620_s4 + $0x70] sm:$0xff]   ;;  %v4988_v9 = vld [vmem:[%s5620_s4 + $0x78] sm:$0xff]   ;;  %8054 = vst [vmem:[#allocation17_spill] sm:$0xff] %v5798_v12 }
 0x15a   : > { %v4967_v54 = vld [vmem:[%s8053_s7 + $0x14] ss:$8 sps:$4 sm:$0xff]   ;;  %v4969_v38 = vld [vmem:[%s8053_s7 + $0x10] ss:$8 sps:$4 sm:$0xff]   ;;  %v4970_v56 = vld [vmem:[%s8053_s7 + $0x4] ss:$8 sps:$4 sm:$0xff]  }
 0x15b   : > { %1281 = vmatprep.subr.bf16.mxu0 %v4967_v54  ;;  %4832 = vmatprep.subr.bf16.mxu1 %v4967_v54  ;;  %v4972_v57 = vld [vmem:[%s8053_s7] ss:$8 sps:$4 sm:$0xff]  }
 0x15c   : > { %1282 = vmatpush1.bf16.msra.mxu0 %v4969_v38  ;;  %4834 = vmatpush1.bf16.msra.mxu1 %v4969_v38  ;;  %v1108_v14 = vld [vmem:[%s8055_s0] sm:$0x3] }
 0x15d   : > { %1283 = vmatprep.subr.bf16.mxu0 %v4970_v56  ;;  %4833 = vmatprep.subr.bf16.mxu1 %v4970_v56  ;;  %v5804_v18 = vrot.slane %v1108_v14, %v1112_v13  ;;  %v5806_v19 = vrot.slane %v1108_v14, %v1116_v15 }
 0x160   : > { %1284 = vmatpush1.bf16.msra.mxu0 %v4972_v57  ;;  %4835 = vmatpush1.bf16.msra.mxu1 %v4972_v57 }
 0x163   : > { %4269 = vmatmul.mubr.msk.bf16.vlgmr.msra.gmra.mxu0 %vm1220_vm2, %v4973_v58  ;;  %4277 = vmatmul.mubr.msk.bf16.vlgmr.msra.gmra.mxu1 %vm1220_vm2, %v4974_v59 }
 0x164   : > { %1311 = vmatprep.mubr.bf16.mxu0 %v7790_v55  ;;  %1391 = vmatprep.mubr.bf16.mxu1 %v7790_v55 }
 0x16b   : > { %4270 = vmatmul.mubr.msk.bf16.gmra.mxu0 %vm1220_vm2, %v4975_v60  ;;  %4278 = vmatmul.mubr.msk.bf16.gmra.mxu1 %vm1220_vm2, %v4976_v61 }
 0x16c   : > { %1321 = vmatprep.mubr.bf16.mxu0 %v7790_v55  ;;  %1401 = vmatprep.mubr.bf16.mxu1 %v7790_v55 }
 0x173   : > { %4271 = vmatmul.mubr.msk.bf16.gmra.mxu0 %vm1220_vm2, %v4977_v62  ;;  %4279 = vmatmul.mubr.msk.bf16.gmra.mxu1 %vm1220_vm2, %v4978_v63 }
 0x174   : > { %1331 = vmatprep.mubr.bf16.mxu0 %v7790_v55  ;;  %1411 = vmatprep.mubr.bf16.mxu1 %v7790_v55 }
 0x17b   : > { %4272 = vmatmul.mubr.msk.bf16.gmra.mxu0 %vm1220_vm2, %v4979_v0  ;;  %4280 = vmatmul.mubr.msk.bf16.gmra.mxu1 %vm1220_vm2, %v4980_v1 }
 0x17c   : > { %1341 = vmatprep.mubr.bf16.mxu0 %v7790_v55  ;;  %1421 = vmatprep.mubr.bf16.mxu1 %v7790_v55 }
 0x183   : > { %4273 = vmatmul.mubr.msk.bf16.gmra.mxu0 %vm1220_vm2, %v4981_v2  ;;  %4281 = vmatmul.mubr.msk.bf16.gmra.mxu1 %vm1220_vm2, %v4982_v3 }
 0x184   : > { %1351 = vmatprep.mubr.bf16.mxu0 %v7790_v55  ;;  %1431 = vmatprep.mubr.bf16.mxu1 %v7790_v55 }
 0x18b   : > { %4274 = vmatmul.mubr.msk.bf16.gmra.mxu0 %vm1220_vm2, %v4983_v4  ;;  %4282 = vmatmul.mubr.msk.bf16.gmra.mxu1 %vm1220_vm2, %v4984_v5 }
 0x18c   : > { %1361 = vmatprep.mubr.bf16.mxu0 %v7790_v55  ;;  %1441 = vmatprep.mubr.bf16.mxu1 %v7790_v55 }
 0x193   : > { %4275 = vmatmul.mubr.msk.bf16.gmra.mxu0 %vm1220_vm2, %v4985_v6  ;;  %4283 = vmatmul.mubr.msk.bf16.gmra.mxu1 %vm1220_vm2, %v4986_v7 }
 0x194   : > { %1371 = vmatprep.mubr.bf16.mxu0 %v7790_v55  ;;  %1451 = vmatprep.mubr.bf16.mxu1 %v7790_v55 }
 0x19b   : > { %4276 = vmatmul.mubr.msk.bf16.gmra.mxu0 %vm1220_vm2, %v4987_v8  ;;  %4284 = vmatmul.mubr.msk.bf16.gmra.mxu1 %vm1220_vm2, %v4988_v9 }
 0x19c   : > { %4576 = vmatprep.mubr.bf16.mxu1 %v5798_v12 }
 0x223   : > { %v1303_v16 = vpop.f32.mrf.mxu0  ;;  %v1383_v17 = vpop.f32.mrf.mxu1 }
 0x224   : > { %v5809_v24 = vadd.f32 %v1303_v16, %v5804_v18  ;;  %v5812_v25 = vadd.f32 %v1383_v17, %v5804_v18 }
 0x225   : > { %v1305_v20 = vpop.f32.mrf.mxu0  ;;  %v1385_v21 = vpop.f32.mrf.mxu1 }
 0x226   : > { %8056 = vst [vmem:[#allocation18_spill] sm:$0xff] %v5809_v24  ;;  %8057 = vst [vmem:[#allocation19_spill] sm:$0xff] %v5812_v25  ;;  %v5821_v28 = vadd.f32 %v1305_v20, %v5806_v19  ;;  %v5824_v29 = vadd.f32 %v1385_v21, %v5806_v19 }
 0x227   : > { %v1307_v22 = vpop.f32.mrf.mxu0  ;;  %v1387_v23 = vpop.f32.mrf.mxu1 }
 0x228   : > { %v5815_v26 = vadd.f32 %v1307_v22, %v5804_v18  ;;  %v5818_v27 = vadd.f32 %v1387_v23, %v5804_v18 }
 0x229   : > { %v1309_v30 = vpop.f32.mrf.mxu0  ;;  %v1389_v31 = vpop.f32.mrf.mxu1 }
 0x22a   : > { %8058 = vst [vmem:[#allocation20_spill] sm:$0xff] %v5815_v26  ;;  %8059 = vst [vmem:[#allocation21_spill] sm:$0xff] %v5818_v27  ;;  %v5831_v34 = vadd.f32 %v1309_v30, %v5806_v19  ;;  %v5834_v35 = vadd.f32 %v1389_v31, %v5806_v19 }
 0x22b   : > { %v1313_v36 = vpop.f32.mrf.mxu0  ;;  %v1393_v37 = vpop.f32.mrf.mxu1 }
 0x22c   : > { %v5841_v45 = vadd.f32 %v1313_v36, %v5804_v18  ;;  %v5844_v46 = vadd.f32 %v1393_v37, %v5804_v18 }
 0x22d   : > { %v1315_v41 = vpop.f32.mrf.mxu0  ;;  %v1395_v42 = vpop.f32.mrf.mxu1 }
 0x22e   : > { %8060 = vst [vmem:[#allocation22_spill] sm:$0xff] %v5841_v45  ;;  %8061 = vst [vmem:[#allocation23_spill] sm:$0xff] %v5844_v46  ;;  %v5853_v49 = vadd.f32 %v1315_v41, %v5806_v19  ;;  %v5856_v50 = vadd.f32 %v1395_v42, %v5806_v19 }
 0x22f   : > { %v1317_v43 = vpop.f32.mrf.mxu0  ;;  %v1397_v44 = vpop.f32.mrf.mxu1 }
 0x230   : > { %v5847_v47 = vadd.f32 %v1317_v43, %v5804_v18  ;;  %v5850_v48 = vadd.f32 %v1397_v44, %v5804_v18 }
 0x231   : > { %v1319_v51 = vpop.f32.mrf.mxu0  ;;  %v1399_v52 = vpop.f32.mrf.mxu1 }
 0x232   : > { %8062 = vst [vmem:[#allocation24_spill] sm:$0xff] %v5847_v47  ;;  %8063 = vst [vmem:[#allocation25_spill] sm:$0xff] %v5850_v48  ;;  %v5863_v38 = vadd.f32 %v1319_v51, %v5806_v19  ;;  %v5866_v56 = vadd.f32 %v1399_v52, %v5806_v19 }
 0x233   : > { %v1323_v57 = vpop.f32.mrf.mxu0  ;;  %v1403_v58 = vpop.f32.mrf.mxu1 }
 0x234   : > { %v5877_v1 = vadd.f32 %v1323_v57, %v5804_v18  ;;  %v5880_v2 = vadd.f32 %v1403_v58, %v5804_v18 }
 0x235   : > { %v5872_v61 = vpop.f32.mrf.mxu0  ;;  %v5874_v62 = vpop.f32.mrf.mxu1 }
 0x236   : > { %8064 = vst [vmem:[#allocation26_spill] sm:$0xff] %v5877_v1  ;;  %8065 = vst [vmem:[#allocation27_spill] sm:$0xff] %v5880_v2 }
 0x237   : > { %v1327_v63 = vpop.f32.mrf.mxu0  ;;  %v1407_v0 = vpop.f32.mrf.mxu1 }
 0x238   : > { %v5883_v3 = vadd.f32 %v1327_v63, %v5804_v18  ;;  %v5886_v4 = vadd.f32 %v1407_v0, %v5804_v18 }
 0x239   : > { %v5888_v5 = vpop.f32.mrf.mxu0  ;;  %v5890_v6 = vpop.f32.mrf.mxu1 }
 0x23a   : > { %8066 = vst [vmem:[#allocation28_spill] sm:$0xff] %v5883_v3  ;;  %8067 = vst [vmem:[#allocation29_spill] sm:$0xff] %v5886_v4 }
 0x23b   : > { %v1333_v9 = vpop.f32.mrf.mxu0  ;;  %v5896_v10 = vpop.f32.mrf.mxu1 }
 0x23c   : > { %v5905_v16 = vadd.f32 %v1333_v9, %v5804_v18 }
 0x23d   : > { %v5898_v11 = vpop.f32.mrf.mxu0  ;;  %v5900_v13 = vpop.f32.mrf.mxu1 }
 0x23e   : > { %8068 = vst [vmem:[#allocation30_spill] sm:$0xff] %v5905_v16 }
 0x23f   : > { %v1337_v14 = vpop.f32.mrf.mxu0  ;;  %v5902_v15 = vpop.f32.mrf.mxu1 }
 0x240   : > { %v5908_v17 = vadd.f32 %v1337_v14, %v5804_v18 }
 0x241   : > { %v5910_v20 = vpop.f32.mrf.mxu0  ;;  %v5912_v21 = vpop.f32.mrf.mxu1 }
 0x242   : > { %8069 = vst [vmem:[#allocation31_spill] sm:$0xff] %v5908_v17 }
 0x243   : > { %v5916_v23 = vpop.f32.mrf.mxu0  ;;  %v5918_v30 = vpop.f32.mrf.mxu1 }
 0x245   : > { %v5920_v31 = vpop.f32.mrf.mxu0  ;;  %v5922_v36 = vpop.f32.mrf.mxu1 }
 0x247   : > { %v5924_v37 = vpop.f32.mrf.mxu0  ;;  %v5926_v41 = vpop.f32.mrf.mxu1 }
 0x249   : > { %v5928_v42 = vpop.f32.mrf.mxu0  ;;  %v1429_v43 = vpop.f32.mrf.mxu1 }
 0x24b   : > { %v5930_v44 = vpop.f32.mrf.mxu0  ;;  %v1433_v51 = vpop.f32.mrf.mxu1 }
 0x24d   : > { %v1355_v52 = vpop.f32.mrf.mxu0  ;;  %v1435_v57 = vpop.f32.mrf.mxu1 }
 0x24f   : > { %v5932_v58 = vpop.f32.mrf.mxu0  ;;  %v1437_v63 = vpop.f32.mrf.mxu1 }
 0x251   : > { %v1359_v0 = vpop.f32.mrf.mxu0  ;;  %v1439_v9 = vpop.f32.mrf.mxu1 }
 0x253   : > { %v1363_v14 = vpop.f32.mrf.mxu0  ;;  %v1443_v55 = vpop.f32.mrf.mxu1 }
 0x254   : > { %v1444_v47 = vadd.f32 %v1443_v55, %v5804_v18 }
 0x255   : > { %v1365_v32 = vpop.f32.mrf.mxu0  ;;  %v1445_v33 = vpop.f32.mrf.mxu1 }
 0x257   : > { %v1367_v53 = vpop.f32.mrf.mxu0  ;;  %v1447_v54 = vpop.f32.mrf.mxu1 }
 0x258   : > { %v1448_v60 = vadd.f32 %v1447_v54, %v5804_v18 }
 0x259   : > { %v1369_v7 = vpop.f32.mrf.mxu0  ;;  %v1449_v8 = vpop.f32.mrf.mxu1 }
 0x25a   : > { %v1450_v46 = vadd.f32 %v1449_v8, %v5806_v19  ;;  %v1476_v16 = vpack.c.bf16 %v1448_v60, %v1444_v47  ;;  %v1370_v55 = vadd.f32 %v1369_v7, %v5806_v19  ;;  %v1364_v47 = vadd.f32 %v1363_v14, %v5804_v18 }
 0x25b   : > { %v1373_v22 = vpop.f32.mrf.mxu0  ;;  %v1453_v39 = vpop.f32.mrf.mxu1  ;;  %v1430_v60 = vadd.f32 %v1429_v43, %v5806_v19  ;;  %v1420_v8 = vadd.f32 %v5912_v21, %v5806_v19  ;;  %v1358_v43 = vadd.f32 %v5932_v58, %v5804_v18  ;;  %v1424_v58 = vadd.f32 %v5918_v30, %v5804_v18 }
 0x25c   : > { %v1374_v26 = vadd.f32 %v1373_v22, %v5804_v18  ;;  %v1454_v25 = vadd.f32 %v1453_v39, %v5804_v18  ;;  %v1326_v30 = vadd.f32 %v5872_v61, %v5806_v19  ;;  %v1344_v14 = vadd.f32 %v5916_v23, %v5804_v18  ;;  %v8075_v23 = vld [vmem:[#allocation30_spill] sm:$0xff] }
 0x25d   : > { %v1375_v40 = vpop.f32.mrf.mxu0  ;;  %v1455_v59 = vpop.f32.mrf.mxu1  ;;  %v8071_v61 = vpack.c.bf16 %v5863_v38, %v5853_v49  ;;  %v8083_v38 = vld [vmem:[#allocation25_spill] sm:$0xff] }
 0x25e   : > { %v1376_v48 = vadd.f32 %v1375_v40, %v5806_v19  ;;  %v1456_v1 = vadd.f32 %v1455_v59, %v5806_v19  ;;  %v1440_v40 = vadd.f32 %v1439_v9, %v5806_v19  ;;  %v1418_v9 = vadd.f32 %v5902_v15, %v5804_v18 }
 0x25f   : > { %v1377_v12 = vpop.f32.mrf.mxu0  ;;  %v1457_v24 = vpop.f32.mrf.mxu1  ;;  %v8072_v15 = vpack.c.bf16 %v5834_v35, %v5824_v29  ;;  %v8086_v35 = vld [vmem:[#allocation24_spill] sm:$0xff] }
 0x260   : > { %v1378_v27 = vadd.f32 %v1377_v12, %v5804_v18  ;;  %v1458_v45 = vadd.f32 %v1457_v24, %v5804_v18  ;;  %v1446_v12 = vadd.f32 %v1445_v33, %v5806_v19  ;;  %v1438_v33 = vadd.f32 %v1437_v63, %v5804_v18 }
 0x261   : > { %v1379_v3 = vpop.f32.mrf.mxu0  ;;  %v1459_v54 = vpop.f32.mrf.mxu1 }
 0x262   : > { %v1469_v2 = vpack.c.bf16 %v1378_v27, %v1374_v26  ;;  %v1477_v4 = vpack.c.bf16 %v1458_v45, %v1454_v25  ;;  %v1380_v22 = vadd.f32 %v1379_v3, %v5806_v19  ;;  %v1460_v39 = vadd.f32 %v1459_v54, %v5806_v19 }
 0x263   : > { %v1492_v59 = vpack.c.bf16 %v1450_v46, %v1446_v12  ;;  %v1366_v25 = vadd.f32 %v1365_v32, %v5806_v19  ;;  %v1368_v26 = vadd.f32 %v1367_v53, %v5804_v18  ;;  %v1436_v27 = vadd.f32 %v1435_v57, %v5806_v19  ;;  %v8080_v12 = vld [vmem:[#allocation28_spill] sm:$0xff] }
 0x264   : > { %v1485_v24 = vpack.c.bf16 %v1380_v22, %v1376_v48  ;;  %v1493_v17 = vpack.c.bf16 %v1460_v39, %v1456_v1  ;;  %4560 = vmatprep.subr.bf16.mxu1 %v1477_v4  ;;  %v1360_v45 = vadd.f32 %v1359_v0, %v5806_v19  ;;  %v1434_v46 = vadd.f32 %v1433_v51, %v5804_v18 }
 0x265   : > { %4561 = vmatpush3.bf16.xpose.msra.mxu1 %v1469_v2  ;;  %v1484_v48 = vpack.c.bf16 %v1370_v55, %v1366_v25  ;;  %v1491_v1 = vpack.c.bf16 %v1440_v40, %v1436_v27  ;;  %v1356_v32 = vadd.f32 %v1355_v52, %v5806_v19  ;;  %v1468_v2 = vpack.c.bf16 %v1368_v26, %v1364_v47  ;;  %v8084_v55 = vld [vmem:[#allocation23_spill] sm:$0xff]  ;;  %v8087_v40 = vld [vmem:[#allocation22_spill] sm:$0xff]  ;;  %v8092_v26 = vld [vmem:[#allocation20_spill] sm:$0xff] }
 0x266   : > { %4562 = vmatprep.subr.bf16.mxu1 %v1476_v16  ;;  %4608 = vmatprep.subr.bf16.mxu0 %v1493_v17  ;;  %v1426_v53 = vadd.f32 %v5922_v36, %v5806_v19  ;;  %v1475_v3 = vpack.c.bf16 %v1438_v33, %v1434_v46  ;;  %v1350_v4 = vadd.f32 %v5928_v42, %v5806_v19  ;;  %v8093_v27 = vld [vmem:[#allocation18_spill] sm:$0xff]  ;;  %v8095_v47 = vld [vmem:[#allocation17_spill] sm:$0xff] }
 0x267   : > { %4609 = vmatpush3.bf16.msra.mxu0 %v1485_v24  ;;  %v1483_v7 = vpack.c.bf16 %v1360_v45, %v1356_v32  ;;  %v1346_v17 = vadd.f32 %v5920_v31, %v5806_v19  ;;  %v1416_v36 = vadd.f32 %v5900_v13, %v5806_v19  ;;  %v1428_v42 = vadd.f32 %v5926_v41, %v5804_v18  ;;  %v8081_v24 = vld [vmem:[#allocation26_spill] sm:$0xff]  ;;  %v4993_v46 = vld [vmem:[#allocation2 + $0x20] sm:$0xff]   ;;  %v4995_v32 = vld [vmem:[#allocation2 + $0x30] sm:$0xff]  }
 0x268   : > { %4610 = vmatprep.subr.bf16.mxu0 %v1492_v59  ;;  %v1490_v16 = vpack.c.bf16 %v1430_v60, %v1426_v53  ;;  %v1340_v51 = vadd.f32 %v5910_v20, %v5806_v19  ;;  %v1354_v52 = vadd.f32 %v5930_v44, %v5804_v18  ;;  %v1410_v31 = vadd.f32 %v5890_v6, %v5806_v19  ;;  %v8090_v59 = vld [vmem:[#allocation19_spill] sm:$0xff]  ;;  %v4990_v45 = vld [vmem:[#allocation2 + $0x8] sm:$0xff]   ;;  %v4992_v60 = vld [vmem:[#allocation2 + $0x18] sm:$0xff]  }
 0x269   : > { %v1482_v21 = vpack.c.bf16 %v1350_v4, %v1346_v17  ;;  %v1489_v57 = vpack.c.bf16 %v1420_v8, %v1416_v36  ;;  %v1336_v13 = vadd.f32 %v5898_v11, %v5806_v19  ;;  %v1406_v41 = vadd.f32 %v5874_v62, %v5806_v19  ;;  %v4997_v53 = vld [vmem:[#allocation2 + $0x40] sm:$0xff]   ;;  %v4999_v4 = vld [vmem:[#allocation2 + $0x50] sm:$0xff]  }
 0x26a   : > { %v1467_v63 = vpack.c.bf16 %v1358_v43, %v1354_v52  ;;  %v1474_v20 = vpack.c.bf16 %v1428_v42, %v1424_v58  ;;  %v1330_v44 = vadd.f32 %v5888_v5, %v5806_v19  ;;  %v1348_v11 = vadd.f32 %v5924_v37, %v5804_v18  ;;  %v5001_v8 = vld [vmem:[#allocation2 + $0x60] sm:$0xff]   ;;  %v5003_v17 = vld [vmem:[#allocation2 + $0x70] sm:$0xff]   ;;  %v5004_v43 = vld [vmem:[#allocation2 + $0x78] sm:$0xff]  }
 0x26b   : > { %4611 = vmatpush3.bf16.msra.mxu0 %v1484_v48  ;;  %v1481_v0 = vpack.c.bf16 %v1340_v51, %v1336_v13  ;;  %v1488_v6 = vpack.c.bf16 %v1410_v31, %v1406_v41  ;;  %v1414_v5 = vadd.f32 %v5896_v10, %v5804_v18  ;;  %v8070_v19 = vpack.c.bf16 %v5866_v56, %v5856_v50  ;;  %v8074_v10 = vld [vmem:[#allocation31_spill] sm:$0xff]  ;;  %v8077_v50 = vld [vmem:[#allocation29_spill] sm:$0xff]  ;;  %v1816_v42 = vld [vmem:[%s5622_s23 + $0x8] sm:$0xff] }
 0x26c   : > { %4612 = vmatprep.subr.bf16.mxu0 %v1491_v1  ;;  %v1480_v62 = vpack.c.bf16 %v1330_v44, %v1326_v30  ;;  %v1466_v54 = vpack.c.bf16 %v1348_v11, %v1344_v14  ;;  %v8073_v18 = vpack.c.bf16 %v5831_v34, %v5821_v28  ;;  %v8076_v37 = vpack.c.bf16 %v8074_v10, %v8075_v23  ;;  %v8078_v56 = vld [vmem:[#allocation27_spill] sm:$0xff]  ;;  %v8089_v34 = vld [vmem:[#allocation21_spill] sm:$0xff]  ;;  %v4994_v1 = vld [vmem:[#allocation2 + $0x28] sm:$0xff]  }
 0x26d   : > { %4563 = vmatpush3.bf16.xpose.msra.mxu1 %v1468_v2  ;;  %v1473_v22 = vpack.c.bf16 %v1418_v9, %v1414_v5  ;;  %v8079_v39 = vpack.c.bf16 %v8077_v50, %v8078_v56  ;;  %v8082_v49 = vpack.c.bf16 %v8080_v12, %v8081_v24  ;;  %v8085_v29 = vpack.c.bf16 %v8083_v38, %v8084_v55  ;;  %v4991_v48 = vld [vmem:[#allocation2 + $0x10] sm:$0xff]   ;;  %v4996_v2 = vld [vmem:[#allocation2 + $0x38] sm:$0xff]   ;;  %v1815_v36 = vld [vmem:[%s5622_s23] sm:$0xff] }
 0x26e   : > { %4564 = vmatprep.subr.bf16.mxu1 %v1475_v3  ;;  %v8088_v28 = vpack.c.bf16 %v8086_v35, %v8087_v40  ;;  %v8091_v25 = vpack.c.bf16 %v8089_v34, %v8090_v59  ;;  %v8094_v33 = vpack.c.bf16 %v8092_v26, %v8093_v27  ;;  %v4998_v3 = vld [vmem:[#allocation2 + $0x48] sm:$0xff]   ;;  %vm1831_vm3 = vnez %v1815_v36  ;;  %v1817_v41 = vld [vmem:[%s5622_s23 + $0x10] sm:$0xff]  ;;  %v1819_v24 = vld [vmem:[%s5622_s23 + $0x20] sm:$0xff] }
 0x26f   : > { %4613 = vmatpush3.bf16.msra.mxu0 %v1483_v7  ;;  %v5000_v7 = vld [vmem:[#allocation2 + $0x58] sm:$0xff]   ;;  %vm1832_vm4 = vnez %v1816_v42  ;;  %v8096_v51 = vmov 0   ;;  %vm1833_vm5 = vnez %v1817_v41  ;;  %vm1835_vm13 = vnez %v1819_v24 }
 0x270   : > { %4614 = vmatprep.subr.bf16.mxu0 %v1490_v16  ;;  %v5002_v16 = vld [vmem:[#allocation2 + $0x68] sm:$0xff]   ;;  %v1848_v52 = vsel %vm1832_vm4, 16843009, %v8096_v51  ;;  %v1849_v5 = vsel %vm1833_vm5, 16843009, %v8096_v51 }
 0x271   : > { %v1866_v13 = vunpack.c.1.s8 %v1848_v52  ;;  %v1868_v30 = vunpack.c.2.s8 %v1848_v52  ;;  %v1870_v9 = vunpack.c.3.s8 %v1848_v52  ;;  %v1873_v10 = vunpack.c.1.s8 %v1849_v5 }
 0x272   : > { %v1877_v27 = vunpack.c.3.s8 %v1849_v5 }
 0x273   : > { %4615 = vmatpush3.bf16.msra.mxu0 %v1482_v21  ;;  %v1847_v21 = vsel %vm1831_vm3, 16843009, %v8096_v51 }
 0x274   : > { %4616 = vmatprep.subr.bf16.mxu0 %v1489_v57  ;;  %v1863_v31 = vunpack.c.0.s8 %v1847_v21  ;;  %v1864_v57 = vunpack.c.0.s8 %v1848_v52  ;;  %v1865_v58 = vunpack.c.1.s8 %v1847_v21  ;;  %v1869_v11 = vunpack.c.3.s8 %v1847_v21 }
 0x275   : > { %4565 = vmatpush3.bf16.xpose.msra.mxu1 %v1467_v63 }
 0x276   : > { %4566 = vmatprep.subr.bf16.mxu1 %v1474_v20  ;;  %v1927_v63 = vpack.c.b16 %v1864_v57, %v1863_v31  ;;  %v1818_v20 = vld [vmem:[%s5622_s23 + $0x18] sm:$0xff]  ;;  %v1929_v44 = vpack.c.b16 %v1866_v13, %v1865_v58 }
 0x277   : > { %4617 = vmatpush3.bf16.msra.mxu0 %v1481_v0  ;;  %vm1834_vm6 = vnez %v1818_v20  ;;  %v8109_v20 = vmov 0 }
 0x278   : > { %4618 = vmatprep.subr.bf16.mxu0 %v1488_v6  ;;  %v1928_v0 = vpack.c.b8 %v1927_v63, %v1927_v63  ;;  %v1867_v6 = vunpack.c.2.s8 %v1847_v21  ;;  %v8107_v63 = vmov 0 }
 0x27a   : > { %vm1991_vm7 = vnez %v1928_v0  ;;  %v1931_v14 = vpack.c.b16 %v1868_v30, %v1867_v6 }
 0x27b   : > { %4619 = vmatpush3.bf16.msra.mxu0 %v1480_v62  ;;  %v1930_v62 = vpack.c.b8 %v1929_v44, %v1929_v44 }
 0x27c   : > { %4620 = vmatprep.subr.bf16.mxu0 %v8070_v19  ;;  %v2023_v19 = vsel %vm1991_vm7, 16843009, %v8096_v51 }
 0x27d   : > { %4567 = vmatpush3.bf16.xpose.msra.mxu1 %v1466_v54  ;;  %v1850_v54 = vsel %vm1834_vm6, 16843009, %v8096_v51  ;;  %vm1992_vm8 = vnez %v1930_v62  ;;  %v2056_v50 = vunpack.c.1.s8 %v2023_v19 }
 0x27e   : > { %4568 = vmatprep.subr.bf16.mxu1 %v1473_v22  ;;  %v1933_v22 = vpack.c.b16 %v1870_v9, %v1869_v11  ;;  %v1874_v23 = vunpack.c.1.s8 %v1850_v54  ;;  %v2024_v56 = vsel %vm1992_vm8, 16843009, %v8096_v51  ;;  %v1876_v26 = vunpack.c.2.s8 %v1850_v54 }
 0x27f   : > { %4621 = vmatpush3.bf16.msra.mxu0 %v8071_v61  ;;  %v1871_v61 = vunpack.c.0.s8 %v1849_v5  ;;  %v2057_v38 = vunpack.c.0.s8 %v2024_v56  ;;  %vm6045_vm11 = vcmp.ne.s32.totalorder %v2056_v50, 0  ;;  %v8111_v9 = vmov 0  ;;  %v1821_v50 = vld [vmem:[%s5622_s23 + $0x30] sm:$0xff] }
 0x280   : > { %4622 = vmatprep.subr.bf16.mxu0 %v8072_v15  ;;  %v1872_v15 = vunpack.c.0.s8 %v1850_v54  ;;  %v1937_v55 = vpack.c.b16 %v1874_v23, %v1873_v10 }
 0x281   : > { %vm6050_vm15 = vcmp.ne.s32.totalorder %v2057_v38, 0 }
 0x282   : > { %v1935_v12 = vpack.c.b16 %v1872_v15, %v1871_v61 }
 0x283   : > { %4623 = vmatpush3.bf16.msra.mxu0 %v8073_v18  ;;  %v1932_v18 = vpack.c.b8 %v1931_v14, %v1931_v14 }
 0x284   : > { %v1936_v59 = vpack.c.b8 %v1935_v12, %v1935_v12 }
 0x285   : > { %4569 = vmatpush3.bf16.xpose.msra.mxu1 %v8076_v37  ;;  %v2055_v37 = vunpack.c.0.s8 %v2023_v19  ;;  %vm1993_vm9 = vnez %v1932_v18  ;;  %v8113_v19 = vmov 0 }
 0x286   : > { %4570 = vmatprep.subr.bf16.mxu1 %v8079_v39  ;;  %v1934_v39 = vpack.c.b8 %v1933_v22, %v1933_v22  ;;  %v2025_v34 = vsel %vm1993_vm9, 16843009, %v8096_v51  ;;  %vm6075_vm1 = vnez %v1936_v59 }
 0x287   : > { %vm6041_vm10 = vcmp.ne.s32.totalorder %v2055_v37, 0  ;;  %v2027_v44 = vsel %vm6075_vm1, 16843009, %v8096_v51 }
 0x288   : > { %vm1994_vm12 = vnez %v1934_v39  ;;  %v2063_v61 = vunpack.c.0.s8 %v2027_v44  ;;  %v2064_v10 = vunpack.c.1.s8 %v2027_v44 }
 0x28a   : > { %vm6145_vm9 = vcmp.ne.s32.totalorder %v2063_v61, 0 }
 0x28d   : > { %4571 = vmatpush3.bf16.xpose.msra.mxu1 %v8082_v49  ;;  %v1820_v49 = vld [vmem:[%s5622_s23 + $0x28] sm:$0xff] }
 0x28e   : > { %4572 = vmatprep.subr.bf16.mxu1 %v8085_v29  ;;  %vm1836_vm14 = vnez %v1820_v49  ;;  %v1822_v49 = vld [vmem:[%s5622_s23 + $0x38] sm:$0xff] }
 0x28f   : > { %vm1838_vm1 = vnez %v1822_v49 }
 0x295   : > { %4573 = vmatpush3.bf16.xpose.msra.mxu1 %v8088_v28  ;;  %v2058_v28 = vunpack.c.1.s8 %v2024_v56 }
 0x296   : > { %4574 = vmatprep.subr.bf16.mxu1 %v8091_v25  ;;  %v1875_v25 = vunpack.c.2.s8 %v1849_v5 }
 0x297   : > { %vm6071_vm0 = vcmp.ne.s32.totalorder %v2058_v28, 0 }
 0x29d   : > { %4575 = vmatpush3.bf16.xpose.msra.mxu1 %v8094_v33  ;;  %v1878_v33 = vunpack.c.3.s8 %v1850_v54 }
 0x2a4   : > { %4577 = vmatmul.mubr.bf16.vlgmr.msra.gmra.mxu1 %v8095_v47 }
 0x2a5   : > { %4578 = vmatprep.mubr.bf16.mxu1 %v4990_v45 }
 0x2ac   : > { %4579 = vmatmul.mubr.bf16.gmra.mxu1 %v4990_v45 }
 0x2ad   : > { %4580 = vmatprep.mubr.bf16.mxu1 %v4991_v48 }
 0x2b4   : > { %4581 = vmatmul.mubr.bf16.gmra.mxu1 %v4991_v48  ;;  %v2026_v48 = vsel %vm1994_vm12, 16843009, %v8096_v51  ;;  %vm1837_vm12 = vnez %v1821_v50 }
 0x2b5   : > { %4582 = vmatprep.mubr.bf16.mxu1 %v4992_v60  ;;  %v2061_v42 = vunpack.c.0.s8 %v2026_v48  ;;  %v2062_v58 = vunpack.c.1.s8 %v2026_v48  ;;  %v8123_v48 = vmov 0 }
 0x2b7   : > { %vm6103_vm5 = vcmp.ne.s32.totalorder %v2061_v42, 0  ;;  %vm6117_vm6 = vcmp.ne.s32.totalorder %v2062_v58, 0 }
 0x2b8   : > { %v8112_v9 = vsel %vm6103_vm5, 4294967295, %v8111_v9  ;;  %v8114_v19 = vsel %vm6117_vm6, 4294967295, %v8113_v19 }
 0x2bc   : > { %4583 = vmatmul.mubr.bf16.gmra.mxu1 %v4992_v60  ;;  %v1938_v60 = vpack.c.b8 %v1937_v55, %v1937_v55 }
 0x2bd   : > { %4584 = vmatprep.mubr.bf16.mxu1 %v4993_v46 }
 0x2be   : > { %vm1996_vm2 = vnez %v1938_v60  ;;  %v8125_v60 = vmov 0 }
 0x2bf   : > { %v2028_v0 = vsel %vm1996_vm2, 16843009, %v8096_v51 }
 0x2c0   : > { %v2065_v23 = vunpack.c.0.s8 %v2028_v0  ;;  %v2066_v37 = vunpack.c.1.s8 %v2028_v0 }
 0x2c2   : > { %vm6159_vm2 = vcmp.ne.s32.totalorder %v2066_v37, 0  ;;  %v8136_v37 = vmov 0 }
 0x2c3   : > { %v8126_v60 = vsel %vm6159_vm2, 4294967295, %v8125_v60 }
 0x2c4   : > { %4585 = vmatmul.mubr.bf16.gmra.mxu1 %v4993_v46  ;;  %v6056_v46 = vsel %vm1835_vm13, 16843009, %v8096_v51  ;;  %vm6151_vm13 = vcmp.ne.s32.totalorder %v2064_v10, 0  ;;  %v8130_v10 = vmov 0 }
 0x2c5   : > { %4586 = vmatprep.mubr.bf16.mxu1 %v4994_v1  ;;  %v1879_v21 = vunpack.c.0.s8 %v6056_v46  ;;  %v1881_v14 = vunpack.c.1.s8 %v6056_v46  ;;  %v1883_v12 = vunpack.c.2.s8 %v6056_v46  ;;  %v1885_v28 = vunpack.c.3.s8 %v6056_v46 }
 0x2cc   : > { %4587 = vmatmul.mubr.bf16.gmra.mxu1 %v4994_v1 }
 0x2cd   : > { %4588 = vmatprep.mubr.bf16.mxu1 %v4995_v32 }
 0x2d4   : > { %4589 = vmatmul.mubr.bf16.gmra.mxu1 %v4995_v32 }
 0x2d5   : > { %4590 = vmatprep.mubr.bf16.mxu1 %v4996_v2 }
 0x2dc   : > { %4591 = vmatmul.mubr.bf16.gmra.mxu1 %v4996_v2  ;;  %v6067_v2 = vsel %vm1836_vm14, 16843009, %v8096_v51  ;;  %vm6155_vm14 = vcmp.ne.s32.totalorder %v2065_v23, 0  ;;  %v8133_v23 = vmov 0 }
 0x2dd   : > { %4592 = vmatprep.mubr.bf16.mxu1 %v4997_v53  ;;  %v1880_v52 = vunpack.c.0.s8 %v6067_v2  ;;  %v1882_v5 = vunpack.c.1.s8 %v6067_v2  ;;  %v1884_v24 = vunpack.c.2.s8 %v6067_v2  ;;  %v8124_v48 = vsel %vm6155_vm14, 4294967295, %v8123_v48 }
 0x2df   : > { %v1943_v62 = vpack.c.b16 %v1880_v52, %v1879_v21 }
 0x2e1   : > { %v1944_v55 = vpack.c.b8 %v1943_v62, %v1943_v62 }
 0x2e4   : > { %4593 = vmatmul.mubr.bf16.gmra.mxu1 %v4997_v53 }
 0x2e5   : > { %4594 = vmatprep.mubr.bf16.mxu1 %v4998_v3 }
 0x2ec   : > { %4595 = vmatmul.mubr.bf16.gmra.mxu1 %v4998_v3 }
 0x2ed   : > { %4596 = vmatprep.mubr.bf16.mxu1 %v4999_v4 }
 0x2f4   : > { %4597 = vmatmul.mubr.bf16.gmra.mxu1 %v4999_v4 }
 0x2f5   : > { %4598 = vmatprep.mubr.bf16.mxu1 %v5000_v7 }
 0x2fc   : > { %4599 = vmatmul.mubr.bf16.gmra.mxu1 %v5000_v7  ;;  %v2059_v7 = vunpack.c.0.s8 %v2025_v34 }
 0x2fd   : > { %4600 = vmatprep.mubr.bf16.mxu1 %v5001_v8 }
 0x2fe   : > { %vm6089_vm3 = vcmp.ne.s32.totalorder %v2059_v7, 0 }
 0x2ff   : > { %v8108_v63 = vsel %vm6089_vm3, 4294967295, %v8107_v63 }
 0x304   : > { %4601 = vmatmul.mubr.bf16.gmra.mxu1 %v5001_v8  ;;  %v2060_v8 = vunpack.c.1.s8 %v2025_v34  ;;  %v1886_v34 = vunpack.c.3.s8 %v6067_v2 }
 0x305   : > { %4602 = vmatprep.mubr.bf16.mxu1 %v5002_v16 }
 0x306   : > { %vm6095_vm4 = vcmp.ne.s32.totalorder %v2060_v8, 0  ;;  %v1949_v8 = vpack.c.b16 %v1886_v34, %v1885_v28 }
 0x307   : > { %v8110_v20 = vsel %vm6095_vm4, 4294967295, %v8109_v20 }
 0x30c   : > { %4603 = vmatmul.mubr.bf16.gmra.mxu1 %v5002_v16  ;;  %v6170_v16 = vsel %vm1837_vm12, 16843009, %v8096_v51 }
 0x30d   : > { %4604 = vmatprep.mubr.bf16.mxu1 %v5003_v17  ;;  %v1891_v34 = vunpack.c.2.s8 %v6170_v16 }
 0x314   : > { %4605 = vmatmul.mubr.bf16.gmra.mxu1 %v5003_v17  ;;  %v1939_v17 = vpack.c.b16 %v1876_v26, %v1875_v25  ;;  %v8119_v26 = vmov 0 }
 0x315   : > { %4606 = vmatprep.mubr.bf16.mxu1 %v5004_v43  ;;  %v8120_v26 = vsel %vm6145_vm9, 4294967295, %v8119_v26 }
 0x316   : > { %v1940_v6 = vpack.c.b8 %v1939_v17, %v1939_v17 }
 0x318   : > { %vm6124_vm7 = vnez %v1940_v6 }
 0x319   : > { %v2029_v46 = vsel %vm6124_vm7, 16843009, %v8096_v51 }
 0x31a   : > { %v2067_v52 = vunpack.c.0.s8 %v2029_v46  ;;  %v2068_v58 = vunpack.c.1.s8 %v2029_v46  ;;  %v1824_v46 = vld [vmem:[%s5622_s23 + $0x48] sm:$0xff] }
 0x31c   : > { %4607 = vmatmul.mubr.bf16.gmra.mxu1 %v5004_v43  ;;  %v1941_v43 = vpack.c.b16 %v1878_v33, %v1877_v27 }
 0x31e   : > { %v1942_v30 = vpack.c.b8 %v1941_v43, %v1941_v43 }
 0x320   : > { %vm6128_vm8 = vnez %v1942_v30  ;;  %v1950_v30 = vpack.c.b8 %v1949_v8, %v1949_v8 }
 0x321   : > { %v2030_v2 = vsel %vm6128_vm8, 16843009, %v8096_v51  ;;  %vm6196_vm8 = vcmp.ne.s32.totalorder %v2067_v52, 0 }
 0x364   : > { %v1656_v40 = vpop.f32.mrf.mxu1 }
 0x365   : > { %v6060_v1 = vsel %vm6041_vm10, %v1656_v40, -1e+30  ;;  %v1945_v40 = vpack.c.b16 %v1882_v5, %v1881_v14 }
 0x366   : > { %v1658_v45 = vpop.f32.mrf.mxu1 }
 0x367   : > { %v6064_v32 = vsel %vm6045_vm11, %v1658_v45, -1e+30  ;;  %v8121_v45 = vmov 0  ;;  %v1946_v7 = vpack.c.b8 %v1945_v40, %v1945_v40 }
 0x368   : > { %v1660_v53 = vpop.f32.mrf.mxu1  ;;  %v2279_v3 = vmax.f32 %v6060_v1, %v6064_v32  ;;  %v8122_v45 = vsel %vm6151_vm13, 4294967295, %v8121_v45 }
 0x369   : > { %v6083_v31 = vsel %vm6050_vm15, %v1660_v53, -1e+30  ;;  %v1947_v53 = vpack.c.b16 %v1884_v24, %v1883_v12  ;;  %vm2000_vm7 = vnez %v1946_v7 }
 0x36a   : > { %2280 = vmax.xlane.f32.xlu0 %v2279_v3  ;;  %v1662_v36 = vpop.f32.mrf.mxu1  ;;  %v2032_v56 = vsel %vm2000_vm7, 16843009, %v8096_v51 }
 0x36b   : > { %v6087_v57 = vsel %vm6071_vm0, %v1662_v36, -1e+30  ;;  %v6181_v36 = vsel %vm1838_vm1, 16843009, %v8096_v51  ;;  %v1948_v0 = vpack.c.b8 %v1947_v53, %v1947_v53  ;;  %v2073_v7 = vunpack.c.0.s8 %v2032_v56 }
 0x36c   : > { %v1666_v13 = vpop.f32.mrf.mxu1  ;;  %v2282_v41 = vmax.f32 %v6083_v31, %v6087_v57  ;;  %v1888_v62 = vunpack.c.0.s8 %v6181_v36  ;;  %v2074_v8 = vunpack.c.1.s8 %v2032_v56 }
 0x36d   : > { %v6111_v54 = vsel %vm6089_vm3, %v1666_v13, -1e+30  ;;  %v2069_v13 = vunpack.c.0.s8 %v2030_v2 }
 0x36e   : > { %2283 = vmax.xlane.f32.xlu0 %v2282_v41  ;;  %v1668_v11 = vpop.f32.mrf.mxu1  ;;  %v2070_v41 = vunpack.c.1.s8 %v2030_v2 }
 0x36f   : > { %v6115_v22 = vsel %vm6095_vm4, %v1668_v11, -1e+30  ;;  %v1887_v11 = vunpack.c.0.s8 %v6170_v16  ;;  %vm6206_vm12 = vcmp.ne.s32.totalorder %v2069_v13, 0 }
 0x370   : > { %v1670_v15 = vpop.f32.mrf.mxu1  ;;  %v2285_v18 = vmax.f32 %v6111_v54, %v6115_v22  ;;  %v8134_v23 = vsel %vm6206_vm12, 4294967295, %v8133_v23  ;;  %vm6210_vm1 = vcmp.ne.s32.totalorder %v2070_v41, 0 }
 0x371   : > { %v6139_v59 = vsel %vm6103_vm5, %v1670_v15, -1e+30  ;;  %vm1999_vm5 = vnez %v1944_v55  ;;  %v8127_v15 = vmov 0  ;;  %8135 = vst [vmem:[#allocation29_spill] sm:$0xff] %v8134_v23  ;;  %v8137_v37 = vsel %vm6210_vm1, 4294967295, %v8136_v37 }
 0x372   : > { %2286 = vmax.xlane.f32.xlu1 %v2285_v18  ;;  %v1672_v38 = vpop.f32.mrf.mxu1  ;;  %v2031_v44 = vsel %vm1999_vm5, 16843009, %v8096_v51  ;;  %v8128_v15 = vsel %vm6196_vm8, 4294967295, %v8127_v15  ;;  %vm6202_vm5 = vcmp.ne.s32.totalorder %v2068_v58, 0  ;;  %8138 = vst [vmem:[#allocation27_spill] sm:$0xff] %v8137_v37  ;;  %v1951_v49 = vpack.c.b16 %v1888_v62, %v1887_v11 }
 0x373   : > { %v6143_v25 = vsel %vm6117_vm6, %v1672_v38, -1e+30  ;;  %8129 = vst [vmem:[#allocation31_spill] sm:$0xff] %v8128_v15  ;;  %v8131_v10 = vsel %vm6202_vm5, 4294967295, %v8130_v10  ;;  %v2071_v50 = vunpack.c.0.s8 %v2031_v44  ;;  %v1889_v38 = vunpack.c.1.s8 %v6170_v16 }
 0x374   : > { %v1676_v27 = vpop.f32.mrf.mxu1  ;;  %v2288_v33 = vmax.f32 %v6139_v59, %v6143_v25  ;;  %8132 = vst [vmem:[#allocation30_spill] sm:$0xff] %v8131_v10  ;;  %v1890_v55 = vunpack.c.1.s8 %v6181_v36  ;;  %v8146_v62 = vmov 0 }
 0x375   : > { %v6174_v17 = vsel %vm6145_vm9, %v1676_v27, -1e+30  ;;  %vm6219_vm9 = vnez %v1950_v30  ;;  %v1892_v27 = vunpack.c.2.s8 %v6181_v36  ;;  %vm6239_vm7 = vcmp.ne.s32.totalorder %v2071_v50, 0 }
 0x376   : > { %2289 = vmax.xlane.f32.xlu1 %v2288_v33  ;;  %v1678_v3 = vpop.f32.mrf.mxu1  ;;  %v1823_v33 = vld [vmem:[%s5622_s23 + $0x40] sm:$0xff]  ;;  %v2034_v58 = vsel %vm6219_vm9, 16843009, %v8096_v51  ;;  %v1953_v13 = vpack.c.b16 %v1890_v55, %v1889_v38  ;;  %vm6263_vm9 = vcmp.ne.s32.totalorder %v2073_v7, 0  ;;  %v1893_v55 = vunpack.c.3.s8 %v6170_v16 }
 0x377   : > { %v6178_v43 = vsel %vm6151_vm13, %v1678_v3, -1e+30  ;;  %v2072_v3 = vunpack.c.1.s8 %v2031_v44 }
 0x378   : > { %v1680_v42 = vpop.f32.mrf.mxu1  ;;  %v2291_v21 = vmax.f32 %v6174_v17, %v6178_v43  ;;  %v1954_v38 = vpack.c.b8 %v1953_v13, %v1953_v13 }
 0x379   : > { %v6190_v14 = vsel %vm6155_vm14, %v1680_v42, -1e+30  ;;  %vm6215_vm14 = vnez %v1948_v0  ;;  %v8143_v42 = vmov 0  ;;  %v1952_v0 = vpack.c.b8 %v1951_v49, %v1951_v49 }
 0x37a   : > { %2292 = vmax.xlane.f32.xlu0 %v2291_v21  ;;  %v1682_v6 = vpop.f32.mrf.mxu1  ;;  %v8144_v42 = vsel %vm6239_vm7, 4294967295, %v8143_v42  ;;  %v2033_v21 = vsel %vm6215_vm14, 16843009, %v8096_v51  ;;  %vm6259_vm14 = vcmp.ne.s32.totalorder %v2072_v3, 0  ;;  %v2077_v49 = vunpack.c.0.s8 %v2034_v58 }
 0x37b   : > { %v6194_v5 = vsel %vm6159_vm2, %v1682_v6, -1e+30  ;;  %8145 = vst [vmem:[#allocation28_spill] sm:$0xff] %v8144_v42  ;;  %v1955_v6 = vpack.c.b16 %v1892_v27, %v1891_v34  ;;  %v8147_v62 = vsel %vm6259_vm14, 4294967295, %v8146_v62  ;;  %v2075_v50 = vunpack.c.0.s8 %v2033_v21 }
 0x37c   : > { %v1686_v61 = vpop.f32.mrf.mxu1  ;;  %v2294_v18 = vmax.f32 %v6190_v14, %v6194_v5  ;;  %8148 = vst [vmem:[#allocation26_spill] sm:$0xff] %v8147_v62  ;;  %v2076_v56 = vunpack.c.1.s8 %v2033_v21  ;;  %v1894_v34 = vunpack.c.3.s8 %v6181_v36  ;;  %v2078_v3 = vunpack.c.1.s8 %v2034_v58 }
 0x37d   : > { %v6227_v40 = vsel %vm6196_vm8, %v1686_v61, -1e+30  ;;  %vm1839_vm8 = vnez %v1823_v33  ;;  %v8149_v61 = vmov 0  ;;  %v8155_v36 = vmov 0 }
 0x37e   : > { %2295 = vmax.xlane.f32.xlu1 %v2294_v18  ;;  %v1688_v12 = vpop.f32.mrf.mxu1  ;;  %v8150_v61 = vsel %vm6263_vm9, 4294967295, %v8149_v61  ;;  %v8152_v18 = vmov 0  ;;  %v6272_v39 = vsel %vm1839_vm8, 16843009, %v8096_v51  ;;  %vm2003_vm8 = vnez %v1952_v0 }
 0x37f   : > { %v6231_v28 = vsel %vm6202_vm5, %v1688_v12, -1e+30  ;;  %vm1840_vm5 = vnez %v1824_v46  ;;  %8151 = vst [vmem:[#allocation25_spill] sm:$0xff] %v8150_v61  ;;  %v1956_v46 = vpack.c.b8 %v1955_v6, %v1955_v6  ;;  %v1895_v7 = vunpack.c.0.s8 %v6272_v39 }
 0x380   : > { %v1690_v2 = vpop.f32.mrf.mxu1  ;;  %v2297_v53 = vmax.f32 %v6227_v40, %v6231_v28  ;;  %v6275_v12 = vsel %vm1840_vm5, 16843009, %v8096_v51  ;;  %vm6291_vm5 = vcmp.ne.s32.totalorder %v2075_v50, 0  ;;  %v1957_v13 = vpack.c.b16 %v1894_v34, %v1893_v55  ;;  %v1825_v34 = vld [vmem:[%s5622_s23 + $0x50] sm:$0xff] }
 0x381   : > { %v6251_v41 = vsel %vm6206_vm12, %v1690_v2, -1e+30  ;;  %vm6267_vm12 = vcmp.ne.s32.totalorder %v2074_v8, 0  ;;  %v1896_v16 = vunpack.c.0.s8 %v6275_v12  ;;  %v8156_v36 = vsel %vm6291_vm5, 4294967295, %v8155_v36 }
 0x382   : > { %2298 = vmax.xlane.f32.xlu0 %v2297_v53  ;;  %v1692_v52 = vpop.f32.mrf.mxu1  ;;  %v8153_v18 = vsel %vm6267_vm12, 4294967295, %v8152_v18  ;;  %8157 = vst [vmem:[#allocation24_spill] sm:$0xff] %v8156_v36  ;;  %v8158_v8 = vmov 0  ;;  %v1897_v58 = vunpack.c.1.s8 %v6272_v39  ;;  %v1898_v0 = vunpack.c.1.s8 %v6275_v12 }
 0x383   : > { %v6255_v44 = vsel %vm6210_vm1, %v1692_v52, -1e+30  ;;  %8154 = vst [vmem:[#allocation23_spill] sm:$0xff] %v8153_v18  ;;  %v2035_v52 = vsel %vm2003_vm8, 16843009, %v8096_v51  ;;  %vm2005_vm1 = vnez %v1956_v46  ;;  %vm6312_vm8 = vcmp.ne.s32.totalorder %v2077_v49, 0 }
 0x384   : > { %v1696_v30 = vpop.f32.mrf.mxu1  ;;  %v2300_v11 = vmax.f32 %v6251_v41, %v6255_v44  ;;  %vm6316_vm2 = vcmp.ne.s32.totalorder %v2078_v3, 0  ;;  %v1959_v55 = vpack.c.b16 %v1896_v16, %v1895_v7  ;;  %v1900_v46 = vunpack.c.2.s8 %v6275_v12 }
 0x385   : > { %v6281_v27 = vsel %vm6239_vm7, %v1696_v30, -1e+30  ;;  %vm6295_vm7 = vcmp.ne.s32.totalorder %v2076_v56, 0  ;;  %v8161_v56 = vmov 0  ;;  %v2037_v42 = vsel %vm2005_vm1, 16843009, %v8096_v51 }
 0x386   : > { %2301 = vmax.xlane.f32.xlu1 %v2300_v11  ;;  %v1698_v24 = vpop.f32.mrf.mxu1  ;;  %v8159_v8 = vsel %vm6295_vm7, 4294967295, %v8158_v8  ;;  %v8162_v56 = vsel %vm6312_vm8, 4294967295, %v8161_v56  ;;  %v1958_v18 = vpack.c.b8 %v1957_v13, %v1957_v13  ;;  %v1961_v3 = vpack.c.b16 %v1898_v0, %v1897_v58 }
 0x387   : > { %v6285_v33 = vsel %vm6259_vm14, %v1698_v24, -1e+30  ;;  %8160 = vst [vmem:[#allocation22_spill] sm:$0xff] %v8159_v8  ;;  %vm2004_vm14 = vnez %v1954_v38  ;;  %8163 = vst [vmem:[#allocation21_spill] sm:$0xff] %v8162_v56  ;;  %v8164_v24 = vmov 0  ;;  %v1899_v38 = vunpack.c.2.s8 %v6272_v39 }
 0x388   : > { %v1700_v2 = vpop.f32.mrf.mxu1  ;;  %v2303_v53 = vmax.f32 %v6281_v27, %v6285_v33  ;;  %v8165_v24 = vsel %vm6316_vm2, 4294967295, %v8164_v24  ;;  %v2036_v49 = vsel %vm2004_vm14, 16843009, %v8096_v51  ;;  %v1901_v23 = vunpack.c.3.s8 %v6272_v39 }
 0x389   : > { %v6304_v6 = vsel %vm6263_vm9, %v1700_v2, -1e+30  ;;  %8166 = vst [vmem:[#allocation19_spill] sm:$0xff] %v8165_v24  ;;  %v1826_v2 = vld [vmem:[%s5622_s23 + $0x58] sm:$0xff]  ;;  %vm1841_vm9 = vnez %v1825_v34  ;;  %v1902_v13 = vunpack.c.3.s8 %v6275_v12  ;;  %v2081_v58 = vunpack.c.0.s8 %v2036_v49 }
 0x38a   : > { %2304 = vmax.xlane.f32.xlu0 %v2303_v53  ;;  %v1702_v21 = vpop.f32.mrf.mxu1  ;;  %v2079_v53 = vunpack.c.0.s8 %v2035_v52  ;;  %v2082_v0 = vunpack.c.1.s8 %v2036_v49  ;;  %v1963_v36 = vpack.c.b16 %v1900_v46, %v1899_v38  ;;  %v8168_v8 = vmov 0 }
 0x38b   : > { %v6308_v30 = vsel %vm6267_vm12, %v1702_v21, -1e+30  ;;  %v2080_v21 = vunpack.c.1.s8 %v2035_v52  ;;  %vm1842_vm12 = vnez %v1826_v2  ;;  %v6347_v34 = vsel %vm1841_vm9, 16843009, %v8096_v51 }
 0x38c   : > { %v1706_v11 = vpop.f32.mrf.mxu1  ;;  %v2306_v50 = vmax.f32 %v6304_v6, %v6308_v30  ;;  %vm6338_vm1 = vcmp.ne.s32.totalorder %v2079_v53, 0  ;;  %v6350_v39 = vsel %vm1842_vm12, 16843009, %v8096_v51  ;;  %v2083_v2 = vunpack.c.0.s8 %v2037_v42 }
 0x38d   : > { %v6328_v62 = vsel %vm6291_vm5, %v1706_v11, -1e+30  ;;  %v8169_v8 = vsel %vm6338_vm1, 4294967295, %v8168_v8  ;;  %vm6342_vm14 = vcmp.ne.s32.totalorder %v2080_v21, 0  ;;  %v1962_v53 = vpack.c.b8 %v1961_v3, %v1961_v3 }
 0x38e   : > { %2307 = vmax.xlane.f32.xlu1 %v2306_v50  ;;  %v1708_v61 = vpop.f32.mrf.mxu1  ;;  %v1960_v50 = vpack.c.b8 %v1959_v55, %v1959_v55  ;;  %8170 = vst [vmem:[#allocation18_spill] sm:$0xff] %v8169_v8  ;;  %vm2006_vm5 = vnez %v1958_v18  ;;  %v1965_v46 = vpack.c.b16 %v1902_v13, %v1901_v23  ;;  %v1904_v56 = vunpack.c.0.s8 %v6350_v39 }
 0x38f   : > { %v6332_v7 = vsel %vm6295_vm7, %v1708_v61, -1e+30  ;;  %v8171_v61 = vmov 0  ;;  %vm6368_vm12 = vcmp.ne.s32.totalorder %v2081_v58, 0  ;;  %v8177_v3 = vmov 0 }
 0x390   : > { %8167 = vst [vmem:[#allocation20_spill] sm:$0xff] %v6332_v7  ;;  %v1710_v16 = vpop.f32.mrf.mxu1  ;;  %v2309_v52 = vmax.f32 %v6328_v62, %v6332_v7  ;;  %v8172_v61 = vsel %vm6342_vm14, 4294967295, %v8171_v61  ;;  %vm2007_vm9 = vnez %v1960_v50  ;;  %v8178_v3 = vsel %vm6368_vm12, 4294967295, %v8177_v3 }
 0x391   : > { %8173 = vst [vmem:[#allocation17_spill] sm:$0xff] %v8172_v61  ;;  %v6354_v12 = vsel %vm6312_vm8, %v1710_v16, -1e+30  ;;  %v1903_v16 = vunpack.c.0.s8 %v6347_v34  ;;  %8179 = vst [vmem:[#allocation35_spill] sm:$0xff] %v8178_v3  ;;  %v2038_v23 = vsel %vm2006_vm5, 16843009, %v8096_v51 }
 0x392   : > { %2310 = vmax.xlane.f32.xlu0 %v2309_v52  ;;  %v1712_v11 = vpop.f32.mrf.mxu1  ;;  %8174 = vst [vmem:[#allocation32_spill] sm:$0xff] %v6354_v12  ;;  %v1964_v52 = vpack.c.b8 %v1963_v36, %v1963_v36  ;;  %v2039_v50 = vsel %vm2007_vm9, 16843009, %v8096_v51  ;;  %vm6378_vm8 = vcmp.ne.s32.totalorder %v2082_v0, 0  ;;  %v8181_v13 = vmov 0 }
 0x393   : > { %v6358_v55 = vsel %vm6316_vm2, %v1712_v11, -1e+30  ;;  %v8182_v13 = vsel %vm6378_vm8, 4294967295, %v8181_v13  ;;  %v2085_v0 = vunpack.c.0.s8 %v2038_v23  ;;  %v2086_v24 = vunpack.c.1.s8 %v2038_v23 }
 0x394   : > { %8175 = vst [vmem:[#allocation33_spill] sm:$0xff] %v6358_v55  ;;  %v1716_v21 = vpop.f32.mrf.mxu1  ;;  %v2312_v38 = vmax.f32 %v6354_v12, %v6358_v55  ;;  %8183 = vst [vmem:[#allocation37_spill] sm:$0xff] %v8182_v13  ;;  %vm2009_vm5 = vnez %v1964_v52  ;;  %v2087_v15 = vunpack.c.0.s8 %v2039_v50 }
 0x395   : > { %v6364_v49 = vsel %vm6338_vm1, %v1716_v21, -1e+30  ;;  %vm2008_vm1 = vnez %v1962_v53  ;;  %v2084_v21 = vunpack.c.1.s8 %v2037_v42  ;;  %v1967_v53 = vpack.c.b16 %v1904_v56, %v1903_v16 }
 0x396   : > { %8176 = vst [vmem:[#allocation34_spill] sm:$0xff] %v6364_v49  ;;  %2313 = vmax.xlane.f32.xlu1 %v2312_v38  ;;  %v1718_v11 = vpop.f32.mrf.mxu1  ;;  %v1966_v38 = vpack.c.b8 %v1965_v46, %v1965_v46  ;;  %v2040_v42 = vsel %vm2008_vm1, 16843009, %v8096_v51  ;;  %v2041_v56 = vsel %vm2009_vm5, 16843009, %v8096_v51  ;;  %v2088_v16 = vunpack.c.1.s8 %v2039_v50 }
 0x397   : > { %v6374_v18 = vsel %vm6342_vm14, %v1718_v11, -1e+30  ;;  %vm6388_vm14 = vcmp.ne.s32.totalorder %v2083_v2, 0  ;;  %v8185_v11 = vmov 0  ;;  %v1906_v2 = vunpack.c.1.s8 %v6350_v39 }
 0x398   : > { %8180 = vst [vmem:[#allocation36_spill] sm:$0xff] %v6374_v18  ;;  %v1720_v36 = vpop.f32.mrf.mxu1  ;;  %v2315_v58 = vmax.f32 %v6364_v49, %v6374_v18  ;;  %v8186_v11 = vsel %vm6388_vm14, 4294967295, %v8185_v11  ;;  %vm6399_vm9 = vcmp.ne.s32.totalorder %v2084_v21, 0  ;;  %v8189_v18 = vmov 0 }
 0x399   : > { %v6386_v8 = vsel %vm6368_vm12, %v1720_v36, -1e+30  ;;  %8187 = vst [vmem:[#allocation39_spill] sm:$0xff] %v8186_v11  ;;  %v1905_v36 = vunpack.c.1.s8 %v6347_v34  ;;  %v8190_v18 = vsel %vm6399_vm9, 4294967295, %v8189_v18  ;;  %vm2010_vm12 = vnez %v1966_v38 }
 0x39a   : > { %8184 = vst [vmem:[#allocation38_spill] sm:$0xff] %v6386_v8  ;;  %v1722_v61 = vpop.f32.mrf.mxu1  ;;  %2316 = vmax.xlane.f32.xlu0 %v2315_v58  ;;  %8191 = vst [vmem:[#allocation41_spill] sm:$0xff] %v8190_v18  ;;  %v2089_v23 = vunpack.c.0.s8 %v2040_v42  ;;  %v1968_v58 = vpack.c.b8 %v1967_v53, %v1967_v53  ;;  %vm6410_vm1 = vcmp.ne.s32.totalorder %v2085_v0, 0  ;;  %v8193_v21 = vmov 0 }
 0x39b   : > { %v6395_v46 = vsel %vm6378_vm8, %v1722_v61, -1e+30  ;;  %v8194_v21 = vsel %vm6410_vm1, 4294967295, %v8193_v21  ;;  %vm6414_vm8 = vcmp.ne.s32.totalorder %v2086_v24, 0  ;;  %v8196_v49 = vmov 0  ;;  %v1830_v24 = vld [vmem:[%s5622_s23 + $0x78] sm:$0xff] }
 0x39c   : > { %8188 = vst [vmem:[#allocation40_spill] sm:$0xff] %v6395_v46  ;;  %v1726_v3 = vpop.f32.mrf.mxu1  ;;  %v2318_v52 = vmax.f32 %v6386_v8, %v6395_v46  ;;  %8195 = vst [vmem:[#allocation43_spill] sm:$0xff] %v8194_v21  ;;  %v8197_v49 = vsel %vm6414_vm8, 4294967295, %v8196_v49  ;;  %vm6418_vm5 = vcmp.ne.s32.totalorder %v2087_v15, 0  ;;  %v8199_v38 = vmov 0  ;;  %v1829_v46 = vld [vmem:[%s5622_s23 + $0x70] sm:$0xff] }
 0x39d   : > { %v6408_v61 = vsel %vm6388_vm14, %v1726_v3, -1e+30  ;;  %8198 = vst [vmem:[#allocation44_spill] sm:$0xff] %v8197_v49  ;;  %v8200_v38 = vsel %vm6418_vm5, 4294967295, %v8199_v38  ;;  %v2090_v11 = vunpack.c.1.s8 %v2040_v42  ;;  %v2091_v50 = vunpack.c.0.s8 %v2041_v56  ;;  %v1828_v21 = vld [vmem:[%s5622_s23 + $0x68] sm:$0xff] }
 0x39e   : > { %8192 = vst [vmem:[#allocation42_spill] sm:$0xff] %v6408_v61  ;;  %v1728_v13 = vpop.f32.mrf.mxu1  ;;  %8201 = vst [vmem:[#allocation45_spill] sm:$0xff] %v8200_v38  ;;  %2319 = vmax.xlane.f32.xlu1 %v2318_v52  ;;  %v2042_v53 = vsel %vm2010_vm12, 16843009, %v8096_v51  ;;  %v1969_v0 = vpack.c.b16 %v1906_v2, %v1905_v36  ;;  %v2092_v37 = vunpack.c.1.s8 %v2041_v56  ;;  %v1907_v42 = vunpack.c.2.s8 %v6347_v34  ;;  %v1827_v2 = vld [vmem:[%s5622_s23 + $0x60] sm:$0xff] }
 0x39f   : > { %v6424_v3 = vsel %vm6399_vm9, %v1728_v13, -1e+30  ;;  %v1908_v52 = vunpack.c.2.s8 %v6350_v39  ;;  %vm6437_vm14 = vcmp.ne.s32.totalorder %v2088_v16, 0  ;;  %v8204_v18 = vmov 0 }
 0x3a0   : > { %8202 = vst [vmem:[#allocation46_spill] sm:$0xff] %v6424_v3  ;;  %v1730_v8 = vpop.f32.mrf.mxu1  ;;  %v2321_v15 = vmax.f32 %v6408_v61, %v6424_v3  ;;  %v8205_v18 = vsel %vm6437_vm14, 4294967295, %v8204_v18  ;;  %vm6441_vm12 = vcmp.ne.s32.totalorder %v2089_v23, 0  ;;  %v8207_v36 = vmov 0 }
 0x3a1   : > { %v6435_v13 = vsel %vm6410_vm1, %v1730_v8, -1e+30  ;;  %8206 = vst [vmem:[#allocation48_spill] sm:$0xff] %v8205_v18  ;;  %v8208_v36 = vsel %vm6441_vm12, 4294967295, %v8207_v36  ;;  %vm2011_vm9 = vnez %v1968_v58  ;;  %vm6446_vm2 = vcmp.ne.s32.totalorder %v2090_v11, 0 }
 0x3a2   : > { %8203 = vst [vmem:[#allocation47_spill] sm:$0xff] %v6435_v13  ;;  %8209 = vst [vmem:[#allocation49_spill] sm:$0xff] %v8208_v36  ;;  %v1732_v56 = vpop.f32.mrf.mxu1  ;;  %v8210_v3 = vmov 0  ;;  %v2093_v61 = vunpack.c.0.s8 %v2042_v53  ;;  %2322 = vmax.xlane.f32.xlu0 %v2321_v15  ;;  %vm1845_vm1 = vnez %v1829_v46  ;;  %vm1846_vm7 = vnez %v1830_v24 }
 0x3a3   : > { %v8211_v3 = vsel %vm6446_vm2, 4294967295, %v8210_v3  ;;  %v6453_v8 = vsel %vm6414_vm8, %v1732_v56, -1e+30  ;;  %vm6455_vm13 = vcmp.ne.s32.totalorder %v2091_v50, 0  ;;  %v8214_v16 = vmov 0 }
 0x3a4   : > { %8212 = vst [vmem:[#allocation50_spill] sm:$0xff] %v8211_v3  ;;  %8213 = vst [vmem:[#allocation51_spill] sm:$0xff] %v6453_v8  ;;  %v8215_v16 = vsel %vm6455_vm13, 4294967295, %v8214_v16  ;;  %v2094_v23 = vunpack.c.1.s8 %v2042_v53  ;;  %v1970_v58 = vpack.c.b8 %v1969_v0, %v1969_v0  ;;  %v1736_v10 = vpop.f32.mrf.mxu1  ;;  %vm6459_vm3 = vcmp.ne.s32.totalorder %v2092_v37, 0 }
 0x3a5   : > { %8216 = vst [vmem:[#allocation52_spill] sm:$0xff] %v8215_v16  ;;  %v8217_v11 = vmov 0  ;;  %v6464_v15 = vsel %vm2011_vm9, 16843009, %v8096_v51  ;;  %v2324_v46 = vmax.f32 %v6435_v13, %v6453_v8  ;;  %v1971_v24 = vpack.c.b16 %v1908_v52, %v1907_v42 }
 0x3a6   : > { %v8218_v11 = vsel %vm6459_vm3, 4294967295, %v8217_v11  ;;  %vm1843_vm8 = vnez %v1827_v2  ;;  %v6470_v50 = vsel %vm6418_vm5, %v1736_v10, -1e+30  ;;  %vm1844_vm6 = vnez %v1828_v21  ;;  %v1738_v0 = vpop.f32.mrf.mxu1 }
 0x3a7   : > { %8219 = vst [vmem:[#allocation53_spill] sm:$0xff] %v8218_v11  ;;  %8220 = vst [vmem:[#allocation54_spill] sm:$0xff] %v6470_v50  ;;  %v6473_v53 = vsel %vm1845_vm1, 16843009, %v8096_v51  ;;  %v6476_v37 = vsel %vm1846_vm7, 16843009, %v8096_v51  ;;  %2325 = vmax.xlane.f32.xlu1 %v2324_v46  ;;  %vm6490_vm7 = vnez %v1970_v58  ;;  %v1910_v46 = vunpack.c.3.s8 %v6350_v39 }
 0x3a8   : > { %vm6478_vm4 = vcmp.ne.s32.totalorder %v2093_v61, 0  ;;  %v8221_v56 = vmov 0  ;;  %v1923_v42 = vunpack.c.2.s8 %v6473_v53  ;;  %v1924_v52 = vunpack.c.2.s8 %v6476_v37  ;;  %v1740_v13 = vpop.f32.mrf.mxu1 }
 0x3a9   : > { %v8222_v56 = vsel %vm6478_vm4, 4294967295, %v8221_v56  ;;  %v1925_v10 = vunpack.c.3.s8 %v6473_v53  ;;  %v1926_v38 = vunpack.c.3.s8 %v6476_v37  ;;  %v6488_v49 = vsel %vm6437_vm14, %v1738_v0, -1e+30 }
 0x3aa   : > { %8223 = vst [vmem:[#allocation55_spill] sm:$0xff] %v8222_v56  ;;  %8224 = vst [vmem:[#allocation56_spill] sm:$0xff] %v6488_v49  ;;  %v1909_v61 = vunpack.c.3.s8 %v6347_v34  ;;  %v2327_v55 = vmax.f32 %v6470_v50, %v6488_v49  ;;  %v6500_v12 = vsel %vm1843_vm8, 16843009, %v8096_v51  ;;  %v1987_v7 = vpack.c.b16 %v1924_v52, %v1923_v42  ;;  %v1742_v50 = vpop.f32.mrf.mxu1 }
 0x3ab   : > { %v1989_v18 = vpack.c.b16 %v1926_v38, %v1925_v10  ;;  %v6504_v58 = vsel %vm6441_vm12, %v1740_v13, -1e+30  ;;  %vm6506_vm9 = vcmp.ne.s32.totalorder %v2094_v23, 0  ;;  %v8228_v0 = vmov 0 }
 0x3ac   : > { %8227 = vst [vmem:[#allocation57_spill] sm:$0xff] %v6504_v58  ;;  %v8229_v0 = vsel %vm6506_vm9, 4294967295, %v8228_v0  ;;  %v1972_v34 = vpack.c.b8 %v1971_v24, %v1971_v24  ;;  %v6512_v39 = vsel %vm1844_vm6, 16843009, %v8096_v51  ;;  %v2095_v2 = vunpack.c.0.s8 %v6464_v15  ;;  %2328 = vmax.xlane.f32.xlu0 %v2327_v55  ;;  %v1746_v52 = vpop.f32.mrf.mxu1 }
 0x3ad   : > { %8230 = vst [vmem:[#allocation58_spill] sm:$0xff] %v8229_v0  ;;  %v2096_v49 = vunpack.c.1.s8 %v6464_v15  ;;  %v1988_v38 = vpack.c.b8 %v1987_v7, %v1987_v7  ;;  %v1990_v42 = vpack.c.b8 %v1989_v18, %v1989_v18  ;;  %v6518_v13 = vsel %vm6446_vm2, %v1742_v50, -1e+30 }
 0x3ae   : > { %8231 = vst [vmem:[#allocation59_spill] sm:$0xff] %v6518_v13  ;;  %v2044_v23 = vsel %vm6490_vm7, 16843009, %v8096_v51  ;;  %v1973_v24 = vpack.c.b16 %v1910_v46, %v1909_v61  ;;  %v1911_v21 = vunpack.c.0.s8 %v6500_v12  ;;  %v2330_v10 = vmax.f32 %v6504_v58, %v6518_v13  ;;  %v1748_v50 = vpop.f32.mrf.mxu1 }
 0x3af   : > { %v1912_v15 = vunpack.c.0.s8 %v6512_v39  ;;  %vm2021_vm6 = vnez %v1988_v38  ;;  %vm2022_vm8 = vnez %v1990_v42  ;;  %v6529_v7 = vsel %vm6455_vm13, %v1746_v52, -1e+30 }
 0x3b0   : > { %8232 = vst [vmem:[#allocation60_spill] sm:$0xff] %v6529_v7  ;;  %vm6531_vm1 = vnez %v1972_v34  ;;  %v2053_v18 = vsel %vm2021_vm6, 16843009, %v8096_v51  ;;  %v2054_v8 = vsel %vm2022_vm8, 16843009, %v8096_v51  ;;  %2331 = vmax.xlane.f32.xlu1 %v2330_v10  ;;  %v1974_v42 = vpack.c.b8 %v1973_v24, %v1973_v24  ;;  %v1750_v16 = vpop.f32.mrf.mxu1 }
 0x3b1   : > { %v2115_v61 = vunpack.c.0.s8 %v2053_v18  ;;  %v2116_v46 = vunpack.c.1.s8 %v2053_v18  ;;  %v2117_v36 = vunpack.c.0.s8 %v2054_v8  ;;  %v2118_v3 = vunpack.c.1.s8 %v2054_v8 }
 0x3b2   : > { %v6539_v38 = vsel %vm6459_vm3, %v1748_v50, -1e+30  ;;  %v1913_v34 = vunpack.c.1.s8 %v6500_v12  ;;  %v1914_v52 = vunpack.c.1.s8 %v6512_v39  ;;  %v1975_v13 = vpack.c.b16 %v1912_v15, %v1911_v21 }
 0x3b3   : > { %8235 = vst [vmem:[#allocation61_spill] sm:$0xff] %v6539_v38  ;;  %v2333_v58 = vmax.f32 %v6529_v7, %v6539_v38  ;;  %vm6545_vm7 = vcmp.ne.s32.totalorder %v2115_v61, 0  ;;  %v8236_v10 = vmov 0  ;;  %vm6549_vm6 = vcmp.ne.s32.totalorder %v2117_v36, 0  ;;  %v1752_v36 = vpop.f32.mrf.mxu1 }
 0x3b4   : > { %v8237_v10 = vsel %vm6545_vm7, 4294967295, %v8236_v10  ;;  %v8239_v18 = vmov 0  ;;  %v6555_v24 = vsel %vm6478_vm4, %v1750_v16, -1e+30  ;;  %vm6557_vm8 = vcmp.ne.s32.totalorder %v2116_v46, 0 }
 0x3b5   : > { %8238 = vst [vmem:[#allocation62_spill] sm:$0xff] %v8237_v10  ;;  %v8240_v18 = vsel %vm6549_vm6, 4294967295, %v8239_v18  ;;  %8242 = vst [vmem:[#allocation64_spill] sm:$0xff] %v6555_v24  ;;  %v8243_v8 = vmov 0  ;;  %vm6565_vm3 = vcmp.ne.s32.totalorder %v2118_v3, 0  ;;  %v8246_v21 = vmov 0  ;;  %2334 = vmax.xlane.f32.xlu0 %v2333_v58 }
 0x3b6   : > { %8241 = vst [vmem:[#allocation63_spill] sm:$0xff] %v8240_v18  ;;  %v8244_v8 = vsel %vm6557_vm8, 4294967295, %v8243_v8  ;;  %v8247_v21 = vsel %vm6565_vm3, 4294967295, %v8246_v21  ;;  %vm6569_vm12 = vcmp.ne.s32.totalorder %v2095_v2, 0  ;;  %v8249_v15 = vmov 0  ;;  %v6948_v18 = vld [vmem:[#allocation3 + $0x88] sm:$0xff] }
 0x3b7   : > { %8245 = vst [vmem:[#allocation65_spill] sm:$0xff] %v8244_v8  ;;  %8248 = vst [vmem:[#allocation66_spill] sm:$0xff] %v8247_v21  ;;  %v8250_v15 = vsel %vm6569_vm12, 4294967295, %v8249_v15  ;;  %v2097_v16 = vunpack.c.0.s8 %v2044_v23  ;;  %v2098_v50 = vunpack.c.1.s8 %v2044_v23  ;;  %v2045_v61 = vsel %vm6531_vm1, 16843009, %v8096_v51  ;;  %v1756_v23 = vpop.f32.mrf.mxu1  ;;  %v6957_v21 = vld [vmem:[#allocation3 + $0x90] sm:$0xff] }
 0x3b8   : > { %8251 = vst [vmem:[#allocation67_spill] sm:$0xff] %v8250_v15  ;;  %v6582_v3 = vsel %vm6506_vm9, %v1752_v36, -1e+30  ;;  %vm2014_vm4 = vnez %v1974_v42  ;;  %v1915_v2 = vunpack.c.2.s8 %v6500_v12  ;;  %v1916_v46 = vunpack.c.2.s8 %v6512_v39  ;;  %8351 = vst [vmem:[#allocation129_spill] sm:$0xff] %v6948_v18 }
 0x3b9   : > { %8252 = vst [vmem:[#allocation68_spill] sm:$0xff] %v6582_v3  ;;  %vm6586_vm5 = vcmp.ne.s32.totalorder %v2096_v49, 0  ;;  %v8253_v56 = vmov 0  ;;  %v1976_v58 = vpack.c.b8 %v1975_v13, %v1975_v13  ;;  %v1977_v55 = vpack.c.b16 %v1914_v52, %v1913_v34  ;;  %v1758_v36 = vpop.f32.mrf.mxu1  ;;  %8352 = vst [vmem:[#allocation130_spill] sm:$0xff] %v6957_v21 }
 0x3ba   : > { %v8254_v56 = vsel %vm6586_vm5, 4294967295, %v8253_v56  ;;  %v2336_v11 = vmax.f32 %v6555_v24, %v6582_v3  ;;  %v6594_v0 = vsel %vm6569_vm12, %v1756_v23, -1e+30  ;;  %vm6596_vm1 = vcmp.ne.s32.totalorder %v2097_v16, 0 }
 0x3bb   : > { %8255 = vst [vmem:[#allocation69_spill] sm:$0xff] %v8254_v56  ;;  %8256 = vst [vmem:[#allocation70_spill] sm:$0xff] %v6594_v0  ;;  %v8257_v42 = vmov 0  ;;  %v2099_v7 = vunpack.c.0.s8 %v2045_v61  ;;  %v2100_v38 = vunpack.c.1.s8 %v2045_v61  ;;  %v2046_v49 = vsel %vm2014_vm4, 16843009, %v8096_v51  ;;  %v1760_v15 = vpop.f32.mrf.mxu1 }
 0x3bc   : > { %v8258_v42 = vsel %vm6596_vm1, 4294967295, %v8257_v42  ;;  %2337 = vmax.xlane.f32.xlu1 %v2336_v11  ;;  %v6603_v13 = vsel %vm6586_vm5, %v1758_v36, -1e+30  ;;  %v1979_v34 = vpack.c.b16 %v1916_v46, %v1915_v2  ;;  %v1917_v52 = vunpack.c.3.s8 %v6500_v12 }
 0x3bd   : > { %8259 = vst [vmem:[#allocation71_spill] sm:$0xff] %v8258_v42  ;;  %8260 = vst [vmem:[#allocation72_spill] sm:$0xff] %v6603_v13  ;;  %v1918_v23 = vunpack.c.3.s8 %v6512_v39  ;;  %vm6607_vm13 = vcmp.ne.s32.totalorder %v2098_v50, 0  ;;  %v8261_v16 = vmov 0  ;;  %vm2015_vm12 = vnez %v1976_v58  ;;  %v1762_v36 = vpop.f32.mrf.mxu1 }
 0x3be   : > { %v8262_v16 = vsel %vm6607_vm13, 4294967295, %v8261_v16  ;;  %v1978_v3 = vpack.c.b8 %v1977_v55, %v1977_v55  ;;  %v2339_v61 = vmax.f32 %v6594_v0, %v6603_v13  ;;  %v6615_v11 = vsel %vm6596_vm1, %v1760_v15, -1e+30 }
 0x3bf   : > { %8263 = vst [vmem:[#allocation73_spill] sm:$0xff] %v8262_v16  ;;  %8264 = vst [vmem:[#allocation74_spill] sm:$0xff] %v6615_v11  ;;  %vm6617_vm4 = vcmp.ne.s32.totalorder %v2099_v7, 0  ;;  %v8265_v2 = vmov 0  ;;  %vm6621_vm5 = vcmp.ne.s32.totalorder %v2100_v38, 0  ;;  %v8268_v12 = vmov 0  ;;  %v1766_v42 = vpop.f32.mrf.mxu1 }
 0x3c0   : > { %v8266_v2 = vsel %vm6617_vm4, 4294967295, %v8265_v2  ;;  %v8269_v12 = vsel %vm6621_vm5, 4294967295, %v8268_v12  ;;  %v2101_v39 = vunpack.c.0.s8 %v2046_v49  ;;  %v2102_v50 = vunpack.c.1.s8 %v2046_v49  ;;  %2340 = vmax.xlane.f32.xlu1 %v2339_v61 }
 0x3c1   : > { %8267 = vst [vmem:[#allocation75_spill] sm:$0xff] %v8266_v2  ;;  %8270 = vst [vmem:[#allocation76_spill] sm:$0xff] %v8269_v12  ;;  %v6627_v46 = vsel %vm6607_vm13, %v1762_v36, -1e+30  ;;  %v2047_v58 = vsel %vm2015_vm12, 16843009, %v8096_v51  ;;  %v1980_v15 = vpack.c.b8 %v1979_v34, %v1979_v34  ;;  %v1981_v55 = vpack.c.b16 %v1918_v23, %v1917_v52  ;;  %v1768_v61 = vpop.f32.mrf.mxu1 }
 0x3c2   : > { %8271 = vst [vmem:[#allocation77_spill] sm:$0xff] %v6627_v46  ;;  %vm2016_vm1 = vnez %v1978_v3  ;;  %v2342_v7 = vmax.f32 %v6615_v11, %v6627_v46  ;;  %v1919_v38 = vunpack.c.0.s8 %v6473_v53  ;;  %v1920_v56 = vunpack.c.0.s8 %v6476_v37  ;;  %v6882_v46 = vld [vmem:[#allocation3 + $0x58] sm:$0xff] }
 0x3c3   : > { %v6636_v49 = vsel %vm6617_vm4, %v1766_v42, -1e+30  ;;  %vm6638_vm13 = vcmp.ne.s32.totalorder %v2101_v39, 0  ;;  %v8273_v36 = vmov 0  ;;  %vm6642_vm12 = vcmp.ne.s32.totalorder %v2102_v50, 0  ;;  %v1770_v16 = vpop.f32.mrf.mxu1  ;;  %8341 = vst [vmem:[#allocation119_spill] sm:$0xff] %v6882_v46 }
 0x3c4   : > { %8272 = vst [vmem:[#allocation78_spill] sm:$0xff] %v6636_v49  ;;  %v8274_v36 = vsel %vm6638_vm13, 4294967295, %v8273_v36  ;;  %v8276_v34 = vmov 0  ;;  %v2103_v3 = vunpack.c.0.s8 %v2047_v58  ;;  %v2104_v52 = vunpack.c.1.s8 %v2047_v58  ;;  %2343 = vmax.xlane.f32.xlu0 %v2342_v7 }
 0x3c5   : > { %8275 = vst [vmem:[#allocation79_spill] sm:$0xff] %v8274_v36  ;;  %v8277_v34 = vsel %vm6642_vm12, 4294967295, %v8276_v34  ;;  %v6648_v23 = vsel %vm6621_vm5, %v1768_v61, -1e+30  ;;  %v2048_v2 = vsel %vm2016_vm1, 16843009, %v8096_v51  ;;  %vm2017_vm4 = vnez %v1980_v15  ;;  %v1772_v7 = vpop.f32.mrf.mxu1 }
 0x3c6   : > { %8278 = vst [vmem:[#allocation80_spill] sm:$0xff] %v8277_v34  ;;  %8279 = vst [vmem:[#allocation81_spill] sm:$0xff] %v6648_v23  ;;  %v1982_v42 = vpack.c.b8 %v1981_v55, %v1981_v55  ;;  %v2345_v39 = vmax.f32 %v6636_v49, %v6648_v23  ;;  %v1983_v11 = vpack.c.b16 %v1920_v56, %v1919_v38  ;;  %v1921_v50 = vunpack.c.1.s8 %v6473_v53  ;;  %v6862_v49 = vld [vmem:[#allocation3 + $0x48] sm:$0xff]  ;;  %v6872_v23 = vld [vmem:[#allocation3 + $0x50] sm:$0xff] }
 0x3c7   : > { %v1922_v0 = vunpack.c.1.s8 %v6476_v37  ;;  %v6657_v58 = vsel %vm6638_vm13, %v1770_v16, -1e+30  ;;  %vm6659_vm5 = vcmp.ne.s32.totalorder %v2103_v3, 0  ;;  %v8281_v61 = vmov 0  ;;  %v1776_v16 = vpop.f32.mrf.mxu1  ;;  %8339 = vst [vmem:[#allocation117_spill] sm:$0xff] %v6872_v23 }
 0x3c8   : > { %8280 = vst [vmem:[#allocation82_spill] sm:$0xff] %v6657_v58  ;;  %v8282_v61 = vsel %vm6659_vm5, 4294967295, %v8281_v61  ;;  %v2105_v15 = vunpack.c.0.s8 %v2048_v2  ;;  %2346 = vmax.xlane.f32.xlu1 %v2345_v39  ;;  %v6665_v55 = vsel %vm6642_vm12, %v1772_v7, -1e+30  ;;  %vm6667_vm1 = vcmp.ne.s32.totalorder %v2104_v52, 0 }
 0x3c9   : > { %8283 = vst [vmem:[#allocation83_spill] sm:$0xff] %v8282_v61  ;;  %8284 = vst [vmem:[#allocation84_spill] sm:$0xff] %v6665_v55  ;;  %v8285_v56 = vmov 0  ;;  %v2106_v53 = vunpack.c.1.s8 %v2048_v2  ;;  %v2049_v37 = vsel %vm2017_vm4, 16843009, %v8096_v51  ;;  %vm2018_vm13 = vnez %v1982_v42  ;;  %v1778_v7 = vpop.f32.mrf.mxu1 }
 0x3ca   : > { %v8286_v56 = vsel %vm6667_vm1, 4294967295, %v8285_v56  ;;  %v2348_v38 = vmax.f32 %v6657_v58, %v6665_v55  ;;  %v1984_v3 = vpack.c.b8 %v1983_v11, %v1983_v11  ;;  %v1985_v36 = vpack.c.b16 %v1922_v0, %v1921_v50  ;;  %v6852_v58 = vld [vmem:[#allocation3 + $0x40] sm:$0xff] }
 0x3cb   : > { %8287 = vst [vmem:[#allocation85_spill] sm:$0xff] %v8286_v56  ;;  %v6676_v39 = vsel %vm6659_vm5, %v1776_v16, -1e+30  ;;  %vm6678_vm12 = vcmp.ne.s32.totalorder %v2105_v15, 0  ;;  %v8289_v52 = vmov 0  ;;  %v2107_v34 = vunpack.c.0.s8 %v2049_v37  ;;  %v1780_v11 = vpop.f32.mrf.mxu1  ;;  %8336 = vst [vmem:[#allocation114_spill] sm:$0xff] %v6852_v58 }
 0x3cc   : > { %8288 = vst [vmem:[#allocation86_spill] sm:$0xff] %v6676_v39  ;;  %v8290_v52 = vsel %vm6678_vm12, 4294967295, %v8289_v52  ;;  %2349 = vmax.xlane.f32.xlu0 %v2348_v38  ;;  %v6684_v2 = vsel %vm6667_vm1, %v1778_v7, -1e+30  ;;  %vm6686_vm4 = vcmp.ne.s32.totalorder %v2106_v53, 0  ;;  %v8293_v42 = vmov 0 }
 0x3cd   : > { %8291 = vst [vmem:[#allocation87_spill] sm:$0xff] %v8290_v52  ;;  %8292 = vst [vmem:[#allocation88_spill] sm:$0xff] %v6684_v2  ;;  %v8294_v42 = vsel %vm6686_vm4, 4294967295, %v8293_v42  ;;  %v2050_v0 = vsel %vm2018_vm13, 16843009, %v8096_v51  ;;  %v2108_v50 = vunpack.c.1.s8 %v2049_v37  ;;  %vm2019_vm5 = vnez %v1984_v3  ;;  %v1782_v61 = vpop.f32.mrf.mxu1 }
 0x3ce   : > { %8295 = vst [vmem:[#allocation89_spill] sm:$0xff] %v8294_v42  ;;  %v2351_v15 = vmax.f32 %v6676_v39, %v6684_v2  ;;  %v1986_v16 = vpack.c.b8 %v1985_v36, %v1985_v36  ;;  %v6695_v38 = vsel %vm6678_vm12, %v1780_v11, -1e+30  ;;  %vm6697_vm1 = vcmp.ne.s32.totalorder %v2107_v34, 0  ;;  %v6842_v39 = vld [vmem:[#allocation3 + $0x38] sm:$0xff] }
 0x3cf   : > { %8296 = vst [vmem:[#allocation90_spill] sm:$0xff] %v6695_v38  ;;  %v8297_v7 = vmov 0  ;;  %v2109_v53 = vunpack.c.0.s8 %v2050_v0  ;;  %v6703_v56 = vsel %vm6686_vm4, %v1782_v61, -1e+30  ;;  %v2051_v37 = vsel %vm2019_vm5, 16843009, %v8096_v51  ;;  %v1786_v3 = vpop.f32.mrf.mxu1 }
 0x3d0   : > { %v8298_v7 = vsel %vm6697_vm1, 4294967295, %v8297_v7  ;;  %2352 = vmax.xlane.f32.xlu0 %v2351_v15  ;;  %8300 = vst [vmem:[#allocation92_spill] sm:$0xff] %v6703_v56  ;;  %vm6706_vm13 = vcmp.ne.s32.totalorder %v2108_v50, 0  ;;  %v8301_v36 = vmov 0  ;;  %v2110_v11 = vunpack.c.1.s8 %v2050_v0 }
 0x3d1   : > { %8299 = vst [vmem:[#allocation91_spill] sm:$0xff] %v8298_v7  ;;  %v8302_v36 = vsel %vm6706_vm13, 4294967295, %v8301_v36  ;;  %v2354_v34 = vmax.f32 %v6695_v38, %v6703_v56  ;;  %vm2020_vm12 = vnez %v1986_v16  ;;  %v6714_v52 = vsel %vm6697_vm1, %v1786_v3, -1e+30  ;;  %v1788_v15 = vpop.f32.mrf.mxu1  ;;  %v6832_v38 = vld [vmem:[#allocation3 + $0x30] sm:$0xff] }
 0x3d2   : > { %8303 = vst [vmem:[#allocation93_spill] sm:$0xff] %v8302_v36  ;;  %8304 = vst [vmem:[#allocation94_spill] sm:$0xff] %v6714_v52  ;;  %vm6716_vm9 = vcmp.ne.s32.totalorder %v2109_v53, 0  ;;  %v8305_v61 = vmov 0  ;;  %v2111_v42 = vunpack.c.0.s8 %v2051_v37  ;;  %v6722_v50 = vsel %vm6706_vm13, %v1788_v15, -1e+30 }
 0x3d3   : > { %v8306_v61 = vsel %vm6716_vm9, 4294967295, %v8305_v61  ;;  %2355 = vmax.xlane.f32.xlu1 %v2354_v34  ;;  %8308 = vst [vmem:[#allocation96_spill] sm:$0xff] %v6722_v50  ;;  %v2052_v0 = vsel %vm2020_vm12, 16843009, %v8096_v51  ;;  %v1790_v12 = vpop.f32.mrf.mxu1  ;;  %vm6725_vm5 = vcmp.ne.s32.totalorder %v2110_v11, 0  ;;  %v8309_v16 = vmov 0 }
 0x3d4   : > { %8307 = vst [vmem:[#allocation95_spill] sm:$0xff] %v8306_v61  ;;  %v8310_v16 = vsel %vm6725_vm5, 4294967295, %v8309_v16  ;;  %v2112_v3 = vunpack.c.1.s8 %v2051_v37  ;;  %v2357_v53 = vmax.f32 %v6714_v52, %v6722_v50  ;;  %v6733_v7 = vsel %vm6716_vm9, %v1790_v12, -1e+30  ;;  %8334 = vst [vmem:[#allocation112_spill] sm:$0xff] %v6832_v38 }
 0x3d5   : > { %8311 = vst [vmem:[#allocation97_spill] sm:$0xff] %v8310_v16  ;;  %8312 = vst [vmem:[#allocation98_spill] sm:$0xff] %v6733_v7  ;;  %v1792_v34 = vpop.f32.mrf.mxu1  ;;  %vm6735_vm1 = vcmp.ne.s32.totalorder %v2111_v42, 0  ;;  %v8313_v36 = vmov 0  ;;  %v2113_v15 = vunpack.c.0.s8 %v2052_v0  ;;  %v8317_v37 = vmov 0 }
 0x3d6   : > { %v8314_v36 = vsel %vm6735_vm1, 4294967295, %v8313_v36  ;;  %v6741_v51 = vsel %vm6725_vm5, %v1792_v34, -1e+30  ;;  %vm6743_vm12 = vcmp.ne.s32.totalorder %v2112_v3, 0  ;;  %v2114_v61 = vunpack.c.1.s8 %v2052_v0 }
 0x3d7   : > { %8315 = vst [vmem:[#allocation99_spill] sm:$0xff] %v8314_v36  ;;  %2358 = vmax.xlane.f32.xlu1 %v2357_v53  ;;  %8316 = vst [vmem:[#allocation100_spill] sm:$0xff] %v6741_v51  ;;  %v1796_v11 = vpop.f32.mrf.mxu1  ;;  %v8318_v37 = vsel %vm6743_vm12, 4294967295, %v8317_v37  ;;  %v2360_v12 = vmax.f32 %v6733_v7, %v6741_v51  ;;  %vm6753_vm9 = vcmp.ne.s32.totalorder %v2113_v15, 0  ;;  %v8321_v53 = vmov 0 }
 0x3d8   : > { %8319 = vst [vmem:[#allocation101_spill] sm:$0xff] %v8318_v37  ;;  %v6751_v42 = vsel %vm6735_vm1, %v1796_v11, -1e+30  ;;  %v8322_v53 = vsel %vm6753_vm9, 4294967295, %v8321_v53  ;;  %vm6761_vm5 = vcmp.ne.s32.totalorder %v2114_v61, 0  ;;  %v8325_v16 = vmov 0 }
 0x3d9   : > { %8320 = vst [vmem:[#allocation102_spill] sm:$0xff] %v6751_v42  ;;  %v1798_v52 = vpop.f32.mrf.mxu1  ;;  %8323 = vst [vmem:[#allocation103_spill] sm:$0xff] %v8322_v53  ;;  %2361 = vmax.xlane.f32.xlu0 %v2360_v12  ;;  %v8326_v16 = vsel %vm6761_vm5, 4294967295, %v8325_v16  ;;  %v6777_v61 = vld [vmem:[#allocation3] sm:$0xff]  ;;  %vm8033_vm1 = vcmask 7168   ;;  %v6782_v53 = vld [vmem:[#allocation3 + $0x8] sm:$0xff] }
 0x3da   : > { %v6759_v3 = vsel %vm6743_vm12, %v1798_v52, -1e+30  ;;  %8327 = vst [vmem:[#allocation105_spill] sm:$0xff] %v8326_v16 }
 0x3db   : > { %8324 = vst [vmem:[#allocation104_spill] sm:$0xff] %v6759_v3  ;;  %v1800_v34 = vpop.f32.mrf.mxu1  ;;  %v2363_v0 = vmax.f32 %v6751_v42, %v6759_v3  ;;  %v6822_v3 = vld [vmem:[#allocation3 + $0x28] sm:$0xff] }
 0x3dc   : > { %v6769_v11 = vsel %vm6753_vm9, %v1800_v34, -1e+30 }
 0x3dd   : > { %8328 = vst [vmem:[#allocation106_spill] sm:$0xff] %v6769_v11  ;;  %v1802_v15 = vpop.f32.mrf.mxu1  ;;  %2364 = vmax.xlane.f32.xlu0 %v2363_v0 }
 0x3de   : > { %v6773_v12 = vsel %vm6761_vm5, %v1802_v15, -1e+30 }
 0x3df   : > { %8329 = vst [vmem:[#allocation107_spill] sm:$0xff] %v6773_v12  ;;  %v2366_v52 = vmax.f32 %v6769_v11, %v6773_v12  ;;  %v6802_v11 = vld [vmem:[#allocation3 + $0x18] sm:$0xff]  ;;  %v6812_v12 = vld [vmem:[#allocation3 + $0x20] sm:$0xff] }
 0x3e0   : > { %8332 = vst [vmem:[#allocation110_spill] sm:$0xff] %v6812_v12 }
 0x3e1   : > { %2367 = vmax.xlane.f32.xlu1 %v2366_v52  ;;  %v6792_v52 = vld [vmem:[#allocation3 + $0x10] sm:$0xff] }
 0x3e2   : > { %8330 = vst [vmem:[#allocation108_spill] sm:$0xff] %v6792_v52 }
 0x3f3   : > { %v2281_v36 = vpop.xlane.xlu0 %2280 }
 0x3f4   : > { %v6780_v37 = vmax.f32 %v6777_v61, %v2281_v36 }
 0x3f6   : > { %3401 = vst.msk [vmem:[#allocation3] sm:$0xff] %vm8033_vm1, %v6780_v37  ;;  %2505 = vperm.xlu0 %4965, %v6780_v37  }
 0x3f7   : > { %v2284_v0 = vpop.xlane.xlu0 %2283 }
 0x3f8   : > { %v6790_v15 = vmax.f32 %v6782_v53, %v2284_v0 }
 0x3fa   : > { %3402 = vst.msk [vmem:[#allocation3 + $0x8] sm:$0xff] %vm8033_vm1, %v6790_v15  ;;  %2510 = vperm.xlu1 %4966, %v6790_v15  }
 0x3fb   : > { %v2287_v34 = vpop.xlane.xlu1 %2286 }
 0x3fc   : > { %v6800_v16 = vmax.f32 %v6792_v52, %v2287_v34 }
 0x3fe   : > { %8331 = vst [vmem:[#allocation109_spill] sm:$0xff] %v6800_v16  ;;  %3403 = vst.msk [vmem:[#allocation3 + $0x10] sm:$0xff] %vm8033_vm1, %v6800_v16  ;;  %2515 = vperm.xlu1 %4966, %v6800_v16  }
 0x3ff   : > { %v2290_v36 = vpop.xlane.xlu1 %2289 }
 0x400   : > { %v6810_v42 = vmax.f32 %v6802_v11, %v2290_v36 }
 0x402   : > { %3404 = vst.msk [vmem:[#allocation3 + $0x18] sm:$0xff] %vm8033_vm1, %v6810_v42  ;;  %2520 = vperm.xlu1 %4966, %v6810_v42  }
 0x403   : > { %v2293_v0 = vpop.xlane.xlu0 %2292 }
 0x404   : > { %v6820_v7 = vmax.f32 %v6812_v12, %v2293_v0 }
 0x406   : > { %8333 = vst [vmem:[#allocation111_spill] sm:$0xff] %v6820_v7  ;;  %3405 = vst.msk [vmem:[#allocation3 + $0x20] sm:$0xff] %vm8033_vm1, %v6820_v7  ;;  %2525 = vperm.xlu0 %4965, %v6820_v7  }
 0x407   : > { %v2296_v34 = vpop.xlane.xlu1 %2295 }
 0x408   : > { %v6830_v51 = vmax.f32 %v6822_v3, %v2296_v34 }
 0x40a   : > { %3406 = vst.msk [vmem:[#allocation3 + $0x28] sm:$0xff] %vm8033_vm1, %v6830_v51  ;;  %2530 = vperm.xlu0 %4965, %v6830_v51  }
 0x40b   : > { %v2299_v36 = vpop.xlane.xlu0 %2298 }
 0x40c   : > { %v6840_v50 = vmax.f32 %v6832_v38, %v2299_v36  ;;  %v6911_v38 = vld [vmem:[#allocation3 + $0x70] sm:$0xff] }
 0x40d   : > { %8346 = vst [vmem:[#allocation124_spill] sm:$0xff] %v6911_v38 }
 0x40e   : > { %8335 = vst [vmem:[#allocation113_spill] sm:$0xff] %v6840_v50  ;;  %3407 = vst.msk [vmem:[#allocation3 + $0x30] sm:$0xff] %vm8033_vm1, %v6840_v50  ;;  %2535 = vperm.xlu1 %4966, %v6840_v50  }
 0x40f   : > { %v2302_v0 = vpop.xlane.xlu1 %2301 }
 0x410   : > { %v6850_v56 = vmax.f32 %v6842_v39, %v2302_v0 }
 0x412   : > { %3408 = vst.msk [vmem:[#allocation3 + $0x38] sm:$0xff] %vm8033_vm1, %v6850_v56  ;;  %2540 = vperm.xlu1 %4966, %v6850_v56  }
 0x413   : > { %v2305_v34 = vpop.xlane.xlu0 %2304 }
 0x414   : > { %v6860_v2 = vmax.f32 %v6852_v58, %v2305_v34 }
 0x416   : > { %8337 = vst [vmem:[#allocation115_spill] sm:$0xff] %v6860_v2  ;;  %3409 = vst.msk [vmem:[#allocation3 + $0x40] sm:$0xff] %vm8033_vm1, %v6860_v2  ;;  %2545 = vperm.xlu0 %4965, %v6860_v2   ;;  %v6892_v2 = vld [vmem:[#allocation3 + $0x60] sm:$0xff] }
 0x417   : > { %v2308_v36 = vpop.xlane.xlu1 %2307  ;;  %8343 = vst [vmem:[#allocation121_spill] sm:$0xff] %v6892_v2 }
 0x418   : > { %v6870_v55 = vmax.f32 %v6862_v49, %v2308_v36  ;;  %v1806_v36 = vpop.f32.mrf.mxu1 }
 0x41a   : > { %8338 = vst [vmem:[#allocation116_spill] sm:$0xff] %v6870_v55  ;;  %3410 = vst.msk [vmem:[#allocation3 + $0x48] sm:$0xff] %vm8033_vm1, %v6870_v55  ;;  %2550 = vperm.xlu0 %4965, %v6870_v55   ;;  %v1808_v50 = vpop.f32.mrf.mxu1 }
 0x41b   : > { %v2311_v0 = vpop.xlane.xlu0 %2310 }
 0x41c   : > { %v6880_v13 = vmax.f32 %v6872_v23, %v2311_v0 }
 0x41e   : > { %8340 = vst [vmem:[#allocation118_spill] sm:$0xff] %v6880_v13  ;;  %3411 = vst.msk [vmem:[#allocation3 + $0x50] sm:$0xff] %vm8033_vm1, %v6880_v13  ;;  %2555 = vperm.xlu1 %4966, %v6880_v13   ;;  %v6902_v13 = vld [vmem:[#allocation3 + $0x68] sm:$0xff] }
 0x41f   : > { %v2314_v34 = vpop.xlane.xlu1 %2313  ;;  %8345 = vst [vmem:[#allocation123_spill] sm:$0xff] %v6902_v13 }
 0x420   : > { %v6890_v24 = vmax.f32 %v6882_v46, %v2314_v34 }
 0x422   : > { %8342 = vst [vmem:[#allocation120_spill] sm:$0xff] %v6890_v24  ;;  %3412 = vst.msk [vmem:[#allocation3 + $0x58] sm:$0xff] %vm8033_vm1, %v6890_v24  ;;  %2560 = vperm.xlu1 %4966, %v6890_v24  }
 0x423   : > { %v2317_v23 = vpop.xlane.xlu0 %2316 }
 0x424   : > { %v6900_v58 = vmax.f32 %v6892_v2, %v2317_v23  ;;  %v1810_v23 = vpop.f32.mrf.mxu1  ;;  %v6920_v2 = vld [vmem:[#allocation3 + $0x78] sm:$0xff] }
 0x425   : > { %v6933_v52 = vsel %vm6549_vm6, %v1810_v23, -1e+30  ;;  %v6966_v23 = vld [vmem:[#allocation3 + $0x98] sm:$0xff] }
 0x426   : > { %8344 = vst [vmem:[#allocation122_spill] sm:$0xff] %v6900_v58  ;;  %3413 = vst.msk [vmem:[#allocation3 + $0x60] sm:$0xff] %vm8033_vm1, %v6900_v58 }
 0x427   : > { %v2320_v0 = vpop.xlane.xlu1 %2319  ;;  %8348 = vst [vmem:[#allocation126_spill] sm:$0xff] %v6933_v52  ;;  %8354 = vst [vmem:[#allocation132_spill] sm:$0xff] %v6966_v23 }
 0x428   : > { %v6909_v46 = vmax.f32 %v6902_v13, %v2320_v0  ;;  %v1812_v0 = vpop.f32.mrf.mxu1  ;;  %v6929_v13 = vld [vmem:[#allocation3 + $0x80] sm:$0xff] }
 0x429   : > { %8347 = vst [vmem:[#allocation125_spill] sm:$0xff] %v6929_v13 }
 0x42a   : > { %3414 = vst.msk [vmem:[#allocation3 + $0x68] sm:$0xff] %vm8033_vm1, %v6909_v46 }
 0x42b   : > { %v2323_v7 = vpop.xlane.xlu0 %2322 }
 0x42c   : > { %v6918_v34 = vmax.f32 %v6911_v38, %v2323_v7  ;;  %v6937_v7 = vsel %vm6565_vm3, %v1812_v0, -1e+30 }
 0x42d   : > { %8349 = vst [vmem:[#allocation127_spill] sm:$0xff] %v6937_v7  ;;  %v2372_v55 = vmax.f32 %v6933_v52, %v6937_v7 }
 0x42e   : > { %3415 = vst.msk [vmem:[#allocation3 + $0x70] sm:$0xff] %vm8033_vm1, %v6918_v34 }
 0x430   : > { %v2326_v16 = vpop.xlane.xlu1 %2325 }
 0x431   : > { %v6927_v24 = vmax.f32 %v6920_v2, %v2326_v16 }
 0x433   : > { %3416 = vst.msk [vmem:[#allocation3 + $0x78] sm:$0xff] %vm8033_vm1, %v6927_v24 }
 0x435   : > { %v2329_v38 = vpop.xlane.xlu0 %2328 }
 0x436   : > { %v6944_v16 = vmax.f32 %v6929_v13, %v2329_v38  ;;  %v6977_v38 = vsel %vm6545_vm7, %v1806_v36, -1e+30  ;;  %v6994_v36 = vld [vmem:[#allocation3 + $0xa8] sm:$0xff]  ;;  %vm4304_vm7 = vmpackc.low %vm6050_vm15, %vm6041_vm10  ;;  %vm8374_vm10 = vnez %v8110_v20 }
 0x437   : > { %8355 = vst [vmem:[#allocation133_spill] sm:$0xff] %v6977_v38  ;;  %8359 = vst [vmem:[#allocation137_spill] sm:$0xff] %v6994_v36 }
 0x438   : > { %8350 = vst [vmem:[#allocation128_spill] sm:$0xff] %v6944_v16  ;;  %3417 = vst.msk [vmem:[#allocation3 + $0x80] sm:$0xff] %vm8033_vm1, %v6944_v16 }
 0x439   : > { %v2332_v0 = vpop.xlane.xlu1 %2331  ;;  %2373 = vmax.xlane.f32.xlu0 %v2372_v55 }
 0x43a   : > { %v6955_v12 = vmax.f32 %v6948_v18, %v2332_v0  ;;  %v6983_v18 = vld [vmem:[#allocation3 + $0xa0] sm:$0xff] }
 0x43b   : > { %8357 = vst [vmem:[#allocation135_spill] sm:$0xff] %v6983_v18 }
 0x43c   : > { %3418 = vst.msk [vmem:[#allocation3 + $0x88] sm:$0xff] %vm8033_vm1, %v6955_v12 }
 0x43e   : > { %v2335_v7 = vpop.xlane.xlu0 %2334 }
 0x43f   : > { %v6964_v52 = vmax.f32 %v6957_v21, %v2335_v7  ;;  %v6981_v7 = vsel %vm6557_vm8, %v1808_v50, -1e+30  ;;  %v7012_v50 = vld [vmem:[#allocation3 + $0xb8] sm:$0xff] }
 0x440   : > { %8356 = vst [vmem:[#allocation134_spill] sm:$0xff] %v6981_v7  ;;  %8363 = vst [vmem:[#allocation141_spill] sm:$0xff] %v7012_v50 }
 0x441   : > { %8353 = vst [vmem:[#allocation131_spill] sm:$0xff] %v6964_v52  ;;  %3419 = vst.msk [vmem:[#allocation3 + $0x90] sm:$0xff] %vm8033_vm1, %v6964_v52 }
 0x445   : > { %v2338_v55 = vpop.xlane.xlu1 %2337 }
 0x446   : > { %v6973_v0 = vmax.f32 %v6966_v23, %v2338_v55  ;;  %v2369_v55 = vmax.f32 %v6977_v38, %v6981_v7  ;;  %v7003_v23 = vld [vmem:[#allocation3 + $0xb0] sm:$0xff] }
 0x447   : > { %8361 = vst [vmem:[#allocation139_spill] sm:$0xff] %v7003_v23 }
 0x448   : > { %3420 = vst.msk [vmem:[#allocation3 + $0x98] sm:$0xff] %vm8033_vm1, %v6973_v0  ;;  %2370 = vmax.xlane.f32.xlu1 %v2369_v55 }
 0x449   : > { %v2341_v21 = vpop.xlane.xlu1 %2340 }
 0x44a   : > { %v6992_v10 = vmax.f32 %v6983_v18, %v2341_v21  ;;  %v7022_v18 = vld [vmem:[#allocation3 + $0xc0] sm:$0xff] }
 0x44b   : > { %8365 = vst [vmem:[#allocation143_spill] sm:$0xff] %v7022_v18 }
 0x44c   : > { %8358 = vst [vmem:[#allocation136_spill] sm:$0xff] %v6992_v10  ;;  %3421 = vst.msk [vmem:[#allocation3 + $0xa0] sm:$0xff] %vm8033_vm1, %v6992_v10 }
 0x44d   : > { %v2344_v13 = vpop.xlane.xlu0 %2343 }
 0x44e   : > { %v7001_v8 = vmax.f32 %v6994_v36, %v2344_v13  ;;  %v7032_v36 = vld [vmem:[#allocation3 + $0xc8] sm:$0xff] }
 0x44f   : > { %2565 = vperm.xlu0 %4965, %v6900_v58   ;;  %8366 = vst [vmem:[#allocation144_spill] sm:$0xff] %v7032_v36  ;;  %v7043_v58 = vld [vmem:[#allocation3 + $0xd0] sm:$0xff] }
 0x450   : > { %8360 = vst [vmem:[#allocation138_spill] sm:$0xff] %v7001_v8  ;;  %3422 = vst.msk [vmem:[#allocation3 + $0xa8] sm:$0xff] %vm8033_vm1, %v7001_v8 }
 0x451   : > { %v2347_v21 = vpop.xlane.xlu1 %2346  ;;  %8368 = vst [vmem:[#allocation146_spill] sm:$0xff] %v7043_v58 }
 0x452   : > { %v7010_v55 = vmax.f32 %v7003_v23, %v2347_v21 }
 0x453   : > { %2570 = vperm.xlu0 %4965, %v6909_v46  }
 0x454   : > { %8362 = vst [vmem:[#allocation140_spill] sm:$0xff] %v7010_v55  ;;  %3423 = vst.msk [vmem:[#allocation3 + $0xb0] sm:$0xff] %vm8033_vm1, %v7010_v55 }
 0x455   : > { %v2350_v13 = vpop.xlane.xlu0 %2349 }
 0x456   : > { %v7020_v7 = vmax.f32 %v7012_v50, %v2350_v13 }
 0x457   : > { %2575 = vperm.xlu0 %4965, %v6918_v34  }
 0x458   : > { %8364 = vst [vmem:[#allocation142_spill] sm:$0xff] %v7020_v7  ;;  %3424 = vst.msk [vmem:[#allocation3 + $0xb8] sm:$0xff] %vm8033_vm1, %v7020_v7 }
 0x459   : > { %v2353_v38 = vpop.xlane.xlu0 %2352  ;;  %2585 = vperm.xlu1 %4966, %v6944_v16   ;;  %v7054_v16 = vld [vmem:[#allocation3 + $0xd8] sm:$0xff] }
 0x45a   : > { %v7030_v23 = vmax.f32 %v7022_v18, %v2353_v38  ;;  %8369 = vst [vmem:[#allocation147_spill] sm:$0xff] %v7054_v16 }
 0x45b   : > { %2580 = vperm.xlu0 %4965, %v6927_v24  }
 0x45c   : > { %3425 = vst.msk [vmem:[#allocation3 + $0xc0] sm:$0xff] %vm8033_vm1, %v7030_v23  ;;  %v2356_v21 = vpop.xlane.xlu1 %2355 }
 0x45d   : > { %v7041_v50 = vmax.f32 %v7032_v36, %v2356_v21  ;;  %2610 = vperm.xlu1 %4966, %v7001_v8   ;;  %v7065_v8 = vld [vmem:[#allocation3 + $0xe0] sm:$0xff] }
 0x45e   : > { %8371 = vst [vmem:[#allocation149_spill] sm:$0xff] %v7065_v8 }
 0x45f   : > { %8367 = vst [vmem:[#allocation145_spill] sm:$0xff] %v7041_v50  ;;  %3426 = vst.msk [vmem:[#allocation3 + $0xc8] sm:$0xff] %vm8033_vm1, %v7041_v50  ;;  %2590 = vperm.xlu0 %4965, %v6955_v12  }
 0x460   : > { %v2359_v13 = vpop.xlane.xlu1 %2358 }
 0x461   : > { %v7052_v18 = vmax.f32 %v7043_v58, %v2359_v13  ;;  %2620 = vperm.xlu1 %4966, %v7020_v7   ;;  %v7076_v7 = vld [vmem:[#allocation3 + $0xe8] sm:$0xff] }
 0x462   : > { %v2362_v38 = vpop.xlane.xlu0 %2361  ;;  %8372 = vst [vmem:[#allocation150_spill] sm:$0xff] %v7076_v7 }
 0x463   : > { %3427 = vst.msk [vmem:[#allocation3 + $0xd0] sm:$0xff] %vm8033_vm1, %v7052_v18  ;;  %v7063_v36 = vmax.f32 %v7054_v16, %v2362_v38  ;;  %2595 = vperm.xlu0 %4965, %v6964_v52  }
 0x465   : > { %8370 = vst [vmem:[#allocation148_spill] sm:$0xff] %v7063_v36  ;;  %3428 = vst.msk [vmem:[#allocation3 + $0xd8] sm:$0xff] %vm8033_vm1, %v7063_v36  ;;  %2630 = vperm.xlu1 %4966, %v7041_v50  }
 0x466   : > { %v2365_v21 = vpop.xlane.xlu0 %2364 }
 0x467   : > { %v7074_v58 = vmax.f32 %v7065_v8, %v2365_v21  ;;  %2600 = vperm.xlu0 %4965, %v6973_v0  }
 0x469   : > { %3429 = vst.msk [vmem:[#allocation3 + $0xe0] sm:$0xff] %vm8033_vm1, %v7074_v58  ;;  %2640 = vperm.xlu1 %4966, %v7063_v36  }
 0x46a   : > { %v2368_v13 = vpop.xlane.xlu1 %2367 }
 0x46b   : > { %v7085_v16 = vmax.f32 %v7076_v7, %v2368_v13  ;;  %2605 = vperm.xlu0 %4965, %v6992_v10  }
 0x46d   : > { %8373 = vst [vmem:[#allocation151_spill] sm:$0xff] %v7085_v16  ;;  %3430 = vst.msk [vmem:[#allocation3 + $0xe8] sm:$0xff] %vm8033_vm1, %v7085_v16  ;;  %2650 = vperm.xlu1 %4966, %v7085_v16  }
 0x46e   : > { %vm4301_vm1 = vmpackc.low %vm6071_vm0, %vm6045_vm11  ;;  %vm8375_vm11 = vnez %v8114_v19  ;;  %vm8376_vm0 = vnez %v8108_v63 }
 0x46f   : > { %2615 = vperm.xlu0 %4965, %v7010_v55   ;;  %vm4307_vm15 = vmpackc.low %vm8375_vm11, %vm8374_vm10  ;;  %vm8378_vm10 = vnez %v8122_v45  ;;  %vm8379_vm11 = vnez %v8126_v60 }
 0x471   : > { %v2506_v38 = vpop.permute.xlu0 %2505 }
 0x472   : > { %v2663_v8 = vsub.f32 %v6060_v1, %v2506_v38  ;;  %v2664_v36 = vsub.f32 %v6064_v32, %v2506_v38 }
 0x473   : > { %2625 = vperm.xlu0 %4965, %v7030_v23  }
 0x474   : > { %v2727_v13 = vmul.f32 1.442695, %v2663_v8  ;;  %v2729_v50 = vmul.f32 1.442695, %v2664_v36 }
 0x475   : > { %v2511_v52 = vpop.permute.xlu1 %2510 }
 0x476   : > { %v2665_v21 = vsub.f32 %v6083_v31, %v2511_v52  ;;  %v2666_v7 = vsub.f32 %v6087_v57, %v2511_v52  ;;  %5005 = vpow2.f32 %v2727_v13 }
 0x477   : > { %2635 = vperm.xlu0 %4965, %v7052_v18   ;;  %5007 = vpow2.f32 %v2729_v50 }
 0x478   : > { %v2731_v16 = vmul.f32 1.442695, %v2665_v21  ;;  %v2733_v10 = vmul.f32 1.442695, %v2666_v7 }
 0x479   : > { %v2516_v55 = vpop.permute.xlu1 %2515 }
 0x47a   : > { %5009 = vpow2.f32 %v2731_v16  ;;  %v2667_v1 = vsub.f32 %v6111_v54, %v2516_v55  ;;  %v2668_v32 = vsub.f32 %v6115_v22, %v2516_v55 }
 0x47b   : > { %5011 = vpow2.f32 %v2733_v10  ;;  %2645 = vperm.xlu0 %4965, %v7074_v58  }
 0x47c   : > { %v2735_v8 = vmul.f32 1.442695, %v2667_v1  ;;  %v2737_v36 = vmul.f32 1.442695, %v2668_v32 }
 0x47d   : > { %v2521_v31 = vpop.permute.xlu1 %2520 }
 0x47e   : > { %v2669_v57 = vsub.f32 %v6139_v59, %v2521_v31  ;;  %v2670_v52 = vsub.f32 %v6143_v25, %v2521_v31  ;;  %5013 = vpow2.f32 %v2735_v8 }
 0x47f   : > { %5015 = vpow2.f32 %v2737_v36 }
 0x480   : > { %v2739_v38 = vmul.f32 1.442695, %v2669_v57  ;;  %v2741_v7 = vmul.f32 1.442695, %v2670_v52 }
 0x481   : > { %v2526_v50 = vpop.permute.xlu0 %2525 }
 0x482   : > { %5017 = vpow2.f32 %v2739_v38  ;;  %v2671_v54 = vsub.f32 %v6174_v17, %v2526_v50  ;;  %v2672_v22 = vsub.f32 %v6178_v43, %v2526_v50 }
 0x483   : > { %5019 = vpow2.f32 %v2741_v7  ;;  %v5006_v16 = vpop.eup %5005 }
 0x484   : > { %v2743_v10 = vmul.f32 1.442695, %v2671_v54  ;;  %v2745_v55 = vmul.f32 1.442695, %v2672_v22  ;;  %v5008_v13 = vpop.eup %5007 }
 0x485   : > { %v2531_v21 = vpop.permute.xlu0 %2530 }
 0x486   : > { %v2673_v59 = vsub.f32 %v6190_v14, %v2531_v21  ;;  %v2674_v25 = vsub.f32 %v6194_v5, %v2531_v21  ;;  %5021 = vpow2.f32 %v2743_v10 }
 0x487   : > { %v5010_v1 = vpop.eup %5009  ;;  %5023 = vpow2.f32 %v2745_v55 }
 0x488   : > { %v5012_v32 = vpop.eup %5011  ;;  %v4305_v17 = vpack.c.bf16 %v5010_v1, %v5006_v16  ;;  %v2747_v43 = vmul.f32 1.442695, %v2673_v59  ;;  %v2749_v8 = vmul.f32 1.442695, %v2674_v25 }
 0x489   : > { %v2536_v14 = vpop.permute.xlu1 %2535  ;;  %v4302_v36 = vpack.c.bf16 %v5012_v32, %v5008_v13  ;;  %v8382_v32 = vld [vmem:[#allocation20_spill] sm:$0xff] }
 0x48a   : > { %5025 = vpow2.f32 %v2747_v43  ;;  %v2675_v5 = vsub.f32 %v6227_v40, %v2536_v14  ;;  %v2676_v35 = vsub.f32 %v6231_v28, %v2536_v14 }
 0x48b   : > { %5027 = vpow2.f32 %v2749_v8  ;;  %4303 = vmatprep.mubr.msk.bf16.mxu0 %vm4301_vm1, %v4302_v36  ;;  %v5014_v31 = vpop.eup %5013 }
 0x48c   : > { %v2751_v4 = vmul.f32 1.442695, %v2675_v5  ;;  %4306 = vmatmul.mubr.msk.bf16.vlgmr.msra.gmra.mxu0 %vm4304_vm7, %v4305_v17  ;;  %v2753_v57 = vmul.f32 1.442695, %v2676_v35  ;;  %v5016_v38 = vpop.eup %5015  ;;  %vm8377_vm7 = vnez %v8112_v9 }
 0x48d   : > { %v2541_v52 = vpop.permute.xlu1 %2540  ;;  %vm4310_vm1 = vmpackc.low %vm8377_vm7, %vm8376_vm0  ;;  %vm8381_vm7 = vnez %v8124_v48  ;;  %v8384_v48 = vld [vmem:[#allocation33_spill] sm:$0xff] }
 0x48e   : > { %v2677_v29 = vsub.f32 %v6251_v41, %v2541_v52  ;;  %v2678_v47 = vsub.f32 %v6255_v44, %v2541_v52  ;;  %5029 = vpow2.f32 %v2751_v4  ;;  %vm4313_vm0 = vmpackc.low %vm8379_vm11, %vm8378_vm10 }
 0x48f   : > { %v5018_v7 = vpop.eup %5017  ;;  %5031 = vpow2.f32 %v2753_v57  ;;  %v8387_v57 = vld [vmem:[#allocation27_spill] sm:$0xff] }
 0x490   : > { %v5020_v50 = vpop.eup %5019  ;;  %v2755_v40 = vmul.f32 1.442695, %v2677_v29  ;;  %v2757_v28 = vmul.f32 1.442695, %v2678_v47  ;;  %v4311_v54 = vpack.c.bf16 %v5018_v7, %v5014_v31  ;;  %v8385_v31 = vld [vmem:[#allocation30_spill] sm:$0xff]  ;;  %vm8388_vm11 = vnez %v8387_v57  ;;  %v8389_v29 = vld [vmem:[#allocation31_spill] sm:$0xff] }
 0x491   : > { %v2546_v41 = vpop.permute.xlu0 %2545  ;;  %v4308_v22 = vpack.c.bf16 %v5020_v50, %v5016_v38  ;;  %vm8386_vm10 = vnez %v8385_v31  ;;  %v8391_v47 = vld [vmem:[#allocation29_spill] sm:$0xff] }
 0x492   : > { %5033 = vpow2.f32 %v2755_v40  ;;  %v2679_v44 = vsub.f32 %v6281_v27, %v2546_v41  ;;  %v2680_v20 = vsub.f32 %v6285_v33, %v2546_v41  ;;  %v8393_v41 = vld [vmem:[#allocation26_spill] sm:$0xff]  ;;  %v8424_v31 = vld [vmem:[#allocation113_spill] sm:$0xff] }
 0x493   : > { %5035 = vpow2.f32 %v2757_v28  ;;  %4309 = vmatprep.mubr.msk.bf16.mxu0 %vm4307_vm15, %v4308_v22  ;;  %v5022_v10 = vpop.eup %5021  ;;  %vm8380_vm15 = vnez %v8120_v26  ;;  %v8383_v26 = vld [vmem:[#allocation32_spill] sm:$0xff]  ;;  %v8395_v22 = vld [vmem:[#allocation23_spill] sm:$0xff] }
 0x494   : > { %v2759_v19 = vmul.f32 1.442695, %v2679_v44  ;;  %4312 = vmatmul.mubr.msk.bf16.gmra.mxu0 %vm4310_vm1, %v4311_v54  ;;  %v2761_v16 = vmul.f32 1.442695, %v2680_v20  ;;  %v5024_v21 = vpop.eup %5023  ;;  %vm4316_vm1 = vmpackc.low %vm8381_vm7, %vm8380_vm15  ;;  %vm8392_vm7 = vnez %v8391_v47  ;;  %v8397_v20 = vld [vmem:[#allocation28_spill] sm:$0xff] }
 0x495   : > { %v2551_v55 = vpop.permute.xlu0 %2550  ;;  %vm4319_vm15 = vmpackc.low %vm8388_vm11, %vm8386_vm10  ;;  %vm8394_vm10 = vnez %v8393_v41  ;;  %vm8396_vm11 = vnez %v8395_v22  ;;  %vm8398_vm8 = vnez %v8397_v20  ;;  %v8431_v41 = vld [vmem:[#allocation123_spill] sm:$0xff] }
 0x496   : > { %v2681_v63 = vsub.f32 %v6304_v6, %v2551_v55  ;;  %v2682_v9 = vsub.f32 %v6308_v30, %v2551_v55  ;;  %5037 = vpow2.f32 %v2759_v19  ;;  %vm4325_vm6 = vmpackc.low %vm8396_vm11, %vm8394_vm10  ;;  %v8399_v19 = vld [vmem:[#allocation25_spill] sm:$0xff]  ;;  %v8432_v22 = vsub.f32 %v8431_v41, %v6909_v46  ;;  %v8435_v46 = vld [vmem:[#allocation114_spill] sm:$0xff] }
 0x497   : > { %v5026_v13 = vpop.eup %5025  ;;  %5039 = vpow2.f32 %v2761_v16 }
 0x498   : > { %v5028_v59 = vpop.eup %5027  ;;  %v2763_v27 = vmul.f32 1.442695, %v2681_v63  ;;  %v2765_v33 = vmul.f32 1.442695, %v2682_v9  ;;  %v4317_v25 = vpack.c.bf16 %v5026_v13, %v5022_v10  ;;  %v8401_v9 = vld [vmem:[#allocation22_spill] sm:$0xff]  ;;  %v8403_v13 = vld [vmem:[#allocation19_spill] sm:$0xff] }
 0x499   : > { %v2556_v6 = vpop.permute.xlu1 %2555  ;;  %v4314_v1 = vpack.c.bf16 %v5028_v59, %v5024_v21 }
 0x49a   : > { %5041 = vpow2.f32 %v2763_v27  ;;  %v2683_v30 = vsub.f32 %v6328_v62, %v2556_v6  ;;  %v2684_v45 = vsub.f32 %v8382_v32, %v2556_v6  ;;  %v8405_v27 = vld [vmem:[#allocation24_spill] sm:$0xff]  ;;  %v8409_v6 = vsub.f32 %v6782_v53, %v6790_v15 }
 0x49b   : > { %5043 = vpow2.f32 %v2765_v33  ;;  %4315 = vmatprep.mubr.msk.bf16.mxu0 %vm4313_vm0, %v4314_v1  ;;  %v5030_v17 = vpop.eup %5029  ;;  %vm8390_vm0 = vnez %v8389_v29  ;;  %vm8406_vm10 = vnez %v8405_v27  ;;  %v8407_v33 = vld [vmem:[#allocation21_spill] sm:$0xff] }
 0x49c   : > { %v2767_v60 = vmul.f32 1.442695, %v2683_v30  ;;  %4318 = vmatmul.mubr.msk.bf16.gmra.mxu0 %vm4316_vm1, %v4317_v25  ;;  %v2769_v43 = vmul.f32 1.442695, %v2684_v45  ;;  %v5032_v14 = vpop.eup %5031  ;;  %vm4322_vm1 = vmpackc.low %vm8392_vm7, %vm8390_vm0  ;;  %vm8400_vm0 = vnez %v8399_v19  ;;  %vm8408_vm11 = vnez %v8407_v33  ;;  %v7212_v19 = vld [vmem:[#allocation3 + $0xf0] sm:$0xff] }
 0x49d   : > { %v2561_v8 = vpop.permute.xlu1 %2560  ;;  %vm4328_vm7 = vmpackc.low %vm8400_vm0, %vm8398_vm8  ;;  %v2441_v1 = vmul.f32 1.442695, %v8409_v6  ;;  %v8410_v30 = vsub.f32 %v6802_v11, %v6810_v42  ;;  %v8411_v45 = vsub.f32 %v6822_v3, %v6830_v51  ;;  %v8413_v42 = vsub.f32 %v6777_v61, %v6780_v37  ;;  %v8415_v51 = vld [vmem:[#allocation116_spill] sm:$0xff]  ;;  %v8436_v33 = vld [vmem:[#allocation115_spill] sm:$0xff] }
 0x49e   : > { %v2685_v36 = vsub.f32 %v8383_v26, %v2561_v8  ;;  %v2686_v5 = vsub.f32 %v8384_v48, %v2561_v8  ;;  %5045 = vpow2.f32 %v2767_v60  ;;  %vm4334_vm9 = vmpackc.low %vm8408_vm11, %vm8406_vm10  ;;  %v8412_v8 = vsub.f32 %v6842_v39, %v6850_v56  ;;  %v8417_v56 = vld [vmem:[#allocation108_spill] sm:$0xff]  ;;  %v8418_v39 = vld [vmem:[#allocation109_spill] sm:$0xff] }
 0x49f   : > { %v5034_v35 = vpop.eup %5033  ;;  %5047 = vpow2.f32 %v2769_v43  ;;  %v2445_v32 = vmul.f32 1.442695, %v8410_v30  ;;  %v2449_v60 = vmul.f32 1.442695, %v8411_v45  ;;  %v2439_v11 = vmul.f32 1.442695, %v8413_v42 }
 0x4a0   : > { %v5036_v4 = vpop.eup %5035  ;;  %v2771_v62 = vmul.f32 1.442695, %v2685_v36  ;;  %v2773_v52 = vmul.f32 1.442695, %v2686_v5  ;;  %v4323_v38 = vpack.c.bf16 %v5034_v35, %v5030_v17  ;;  %v7178_v17 = vld [vmem:[#allocation3 + $0xf8] sm:$0xff]  ;;  %v8416_v3 = vsub.f32 %v6862_v49, %v8415_v51  ;;  %v8420_v5 = vld [vmem:[#allocation110_spill] sm:$0xff] }
 0x4a1   : > { %v4320_v7 = vpack.c.bf16 %v5036_v4, %v5032_v14  ;;  %v2453_v14 = vmul.f32 1.442695, %v8412_v8  ;;  %v8419_v36 = vsub.f32 %v8417_v56, %v8418_v39  ;;  %v8421_v35 = vld [vmem:[#allocation111_spill] sm:$0xff]  ;;  %v8423_v4 = vld [vmem:[#allocation112_spill] sm:$0xff]  ;;  %v8439_v45 = vld [vmem:[#allocation118_spill] sm:$0xff] }
 0x4a2   : > { %5049 = vpow2.f32 %v2771_v62  ;;  %v2457_v15 = vmul.f32 1.442695, %v8416_v3  ;;  %v8422_v37 = vsub.f32 %v8420_v5, %v8421_v35  ;;  %v8425_v57 = vsub.f32 %v8423_v4, %v8424_v31  ;;  %v8427_v49 = vld [vmem:[#allocation120_spill] sm:$0xff]  ;;  %v8444_v3 = vld [vmem:[#allocation46_spill] sm:$0xff]  ;;  %v8445_v56 = vld [vmem:[#allocation129_spill] sm:$0xff] }
 0x4a3   : > { %5051 = vpow2.f32 %v2773_v52  ;;  %4321 = vmatprep.mubr.msk.bf16.mxu0 %vm4319_vm15, %v4320_v7  ;;  %v5038_v50 = vpop.eup %5037  ;;  %vm8402_vm15 = vnez %v8401_v9  ;;  %v2443_v48 = vmul.f32 1.442695, %v8419_v36  ;;  %v8429_v7 = vld [vmem:[#allocation34_spill] sm:$0xff]  ;;  %v8446_v39 = vsub.f32 %v8445_v56, %v6955_v12  ;;  %v8448_v4 = vld [vmem:[#allocation47_spill] sm:$0xff]  ;;  %v8467_v56 = vld [vmem:[#allocation17_spill] sm:$0xff] }
 0x4a4   : > { %4324 = vmatmul.mubr.msk.bf16.gmra.mxu0 %vm4322_vm1, %v4323_v38  ;;  %v5040_v40 = vpop.eup %5039  ;;  %vm8404_vm1 = vnez %v8403_v13  ;;  %5053 = vpow2.f32 %v2441_v1  ;;  %v2447_v61 = vmul.f32 1.442695, %v8422_v37  ;;  %v2451_v62 = vmul.f32 1.442695, %v8425_v57  ;;  %v8426_v38 = vld [vmem:[#allocation119_spill] sm:$0xff] }
 0x4a5   : > { %vm4331_vm3 = vmpackc.low %vm8404_vm1, %vm8402_vm15  ;;  %5055 = vpow2.f32 %v2445_v32  ;;  %v8428_v29 = vsub.f32 %v8426_v38, %v8427_v49  ;;  %v8438_v32 = vld [vmem:[#allocation117_spill] sm:$0xff]  ;;  %v2473_v36 = vmul.f32 1.442695, %v8446_v39  ;;  %v8449_v57 = vld [vmem:[#allocation51_spill] sm:$0xff] }
 0x4a6   : > { %5057 = vpow2.f32 %v2449_v60  ;;  %v8440_v60 = vsub.f32 %v8438_v32, %v8439_v45  ;;  %v8450_v38 = vld [vmem:[#allocation121_spill] sm:$0xff]  ;;  %v8451_v49 = vld [vmem:[#allocation122_spill] sm:$0xff] }
 0x4a7   : > { %v5042_v28 = vpop.eup %5041  ;;  %5059 = vpow2.f32 %v2453_v14  ;;  %v2461_v47 = vmul.f32 1.442695, %v8428_v29  ;;  %v8442_v14 = vsub.f32 %v6920_v2, %v6927_v24  ;;  %v8447_v2 = vld [vmem:[#allocation56_spill] sm:$0xff]  ;;  %v8452_v29 = vsub.f32 %v8450_v38, %v8451_v49  ;;  %v8469_v39 = vld [vmem:[#allocation37_spill] sm:$0xff] }
 0x4a8   : > { %v5044_v54 = vpop.eup %5043  ;;  %v4329_v44 = vpack.c.bf16 %v5042_v28, %v5038_v50  ;;  %5061 = vpow2.f32 %v2439_v11  ;;  %v8443_v11 = vld [vmem:[#allocation42_spill] sm:$0xff]  ;;  %vm8470_vm8 = vnez %v8469_v39  ;;  %v8478_v38 = vld [vmem:[#allocation64_spill] sm:$0xff] }
 0x4a9   : > { %v4326_v10 = vpack.c.bf16 %v5044_v54, %v5040_v40  ;;  %5063 = vpow2.f32 %v2457_v15  ;;  %v8430_v40 = vld [vmem:[#allocation36_spill] sm:$0xff]  ;;  %v2469_v42 = vmul.f32 1.442695, %v8442_v14  ;;  %v8463_v14 = vld [vmem:[#allocation61_spill] sm:$0xff] }
 0x4aa   : > { %5065 = vpow2.f32 %v2443_v48 }
 0x4ab   : > { %4327 = vmatprep.mubr.msk.bf16.mxu0 %vm4325_vm6, %v4326_v10  ;;  %v5046_v16 = vpop.eup %5045  ;;  %5067 = vpow2.f32 %v2447_v61  ;;  %vm8468_vm6 = vnez %v8467_v56 }
 0x4ac   : > { %4330 = vmatmul.mubr.msk.bf16.gmra.mxu0 %vm4328_vm7, %v4329_v44  ;;  %v5048_v55 = vpop.eup %5047  ;;  %v2465_v44 = vmul.f32 1.442695, %v8432_v22  ;;  %5069 = vpow2.f32 %v2451_v62  ;;  %vm4337_vm0 = vmpackc.low %vm8470_vm8, %vm8468_vm6 }
 0x4ad   : > { %5071 = vpow2.f32 %v2461_v47  ;;  %v2463_v47 = vmul.f32 1.442695, %v8452_v29  ;;  %v8479_v29 = vld [vmem:[#allocation68_spill] sm:$0xff] }
 0x4ae   : > { %5073 = vpow2.f32 %v2465_v44 }
 0x4af   : > { %v5050_v21 = vpop.eup %5049 }
 0x4b0   : > { %v5052_v63 = vpop.eup %5051  ;;  %v4335_v59 = vpack.c.bf16 %v5050_v21, %v5046_v16 }
 0x4b1   : > { %v4332_v25 = vpack.c.bf16 %v5052_v63, %v5048_v55  ;;  %v5054_v26 = vpop.eup %5053  ;;  %v8433_v55 = vld [vmem:[#allocation38_spill] sm:$0xff]  ;;  %v8434_v63 = vld [vmem:[#allocation40_spill] sm:$0xff] }
 0x4b2   : > { %v5056_v54 = vpop.eup %5055 }
 0x4b3   : > { %4333 = vmatprep.mubr.msk.bf16.mxu0 %vm4331_vm3, %v4332_v25  ;;  %vm8414_vm3 = vcmask 7168   ;;  %v8437_v25 = vsub.f32 %v8435_v46, %v8436_v33 }
 0x4b4   : > { %4336 = vmatmul.mubr.msk.bf16.gmra.mxu0 %vm4334_vm9, %v4335_v59  ;;  %v5058_v59 = vpop.eup %5057  ;;  %vm8441_vm9 = vmmov %vm8414_vm3 }
 0x4b5   : > { %v2455_v6 = vmul.f32 1.442695, %v8437_v25 }
 0x4c2   : > { %v2374_v43 = vpop.xlane.xlu0 %2373 }
 0x4c3   : > { %v7184_v53 = vmax.f32 %v7178_v17, %v2374_v43  ;;  %v2459_v43 = vmul.f32 1.442695, %v8440_v60 }
 0x4c5   : > { %3432 = vst.msk [vmem:[#allocation3 + $0xf8] sm:$0xff] %vm8414_vm3, %v7184_v53  ;;  %2660 = vperm.xlu1 %4966, %v7184_v53  }
 0x4c9   : > { %2990 = vperm.xlu1 %4966, %v5054_v26   ;;  %v5060_v26 = vpop.eup %5059 }
 0x4ca   : > { %v2566_v52 = vpop.permute.xlu0 %2565  ;;  %v5062_v5 = vpop.eup %5061 }
 0x4cb   : > { %v2687_v50 = vsub.f32 %v8429_v7, %v2566_v52  ;;  %v2688_v28 = vsub.f32 %v8430_v40, %v2566_v52  ;;  %v5064_v52 = vpop.eup %5063 }
 0x4cc   : > { %v5066_v12 = vpop.eup %5065 }
 0x4cd   : > { %v2775_v20 = vmul.f32 1.442695, %v2687_v50  ;;  %3000 = vperm.xlu1 %4966, %v5056_v54   ;;  %v2777_v10 = vmul.f32 1.442695, %v2688_v28  ;;  %v5068_v40 = vpop.eup %5067  ;;  %v8453_v28 = vld [vmem:[#allocation132_spill] sm:$0xff] }
 0x4ce   : > { %v2571_v16 = vpop.permute.xlu0 %2570  ;;  %v8454_v54 = vsub.f32 %v8453_v28, %v6973_v0  ;;  %v5070_v44 = vpop.eup %5069  ;;  %v8459_v0 = vld [vmem:[#allocation54_spill] sm:$0xff]  ;;  %v8481_v28 = vld [vmem:[#allocation131_spill] sm:$0xff] }
 0x4cf   : > { %v2689_v21 = vsub.f32 %v8433_v55, %v2571_v16  ;;  %v2690_v9 = vsub.f32 %v8434_v63, %v2571_v16  ;;  %5075 = vpow2.f32 %v2775_v20  ;;  %v8456_v55 = vld [vmem:[#allocation59_spill] sm:$0xff]  ;;  %v5072_v63 = vpop.eup %5071 }
 0x4d0   : > { %5077 = vpow2.f32 %v2777_v10  ;;  %v2477_v41 = vmul.f32 1.442695, %v8454_v54  ;;  %v8455_v10 = vld [vmem:[#allocation57_spill] sm:$0xff] }
 0x4d1   : > { %v2371_v13 = vpop.xlane.xlu1 %2370  ;;  %v2779_v1 = vmul.f32 1.442695, %v2689_v21  ;;  %v2781_v30 = vmul.f32 1.442695, %v2690_v9  ;;  %3010 = vperm.xlu1 %4966, %v5058_v59   ;;  %v5074_v9 = vpop.eup %5073 }
 0x4d2   : > { %v7217_v27 = vmax.f32 %v7212_v19, %v2371_v13  ;;  %v2576_v8 = vpop.permute.xlu0 %2575  ;;  %v8457_v13 = vld [vmem:[#allocation124_spill] sm:$0xff] }
 0x4d3   : > { %5079 = vpow2.f32 %v2779_v1  ;;  %v2691_v51 = vsub.f32 %v8443_v11, %v2576_v8  ;;  %v2692_v15 = vsub.f32 %v8444_v3, %v2576_v8  ;;  %v8458_v59 = vsub.f32 %v8457_v13, %v6918_v34  ;;  %v8460_v1 = vld [vmem:[#allocation137_spill] sm:$0xff] }
 0x4d4   : > { %3431 = vst.msk [vmem:[#allocation3 + $0xf0] sm:$0xff] %vm8441_vm9, %v7217_v27  ;;  %2655 = vperm.xlu0 %4965, %v7217_v27   ;;  %5081 = vpow2.f32 %v2781_v30  ;;  %v8461_v30 = vld [vmem:[#allocation138_spill] sm:$0xff]  ;;  %v8464_v34 = vld [vmem:[#allocation125_spill] sm:$0xff] }
 0x4d5   : > { %v2586_v48 = vpop.permute.xlu1 %2585  ;;  %5083 = vpow2.f32 %v2455_v6  ;;  %v2783_v35 = vmul.f32 1.442695, %v2691_v51  ;;  %3020 = vperm.xlu1 %4966, %v5060_v26   ;;  %v2785_v37 = vmul.f32 1.442695, %v2692_v15  ;;  %v2467_v46 = vmul.f32 1.442695, %v8458_v59 }
 0x4d6   : > { %5085 = vpow2.f32 %v2459_v43  ;;  %v2581_v24 = vpop.permute.xlu0 %2580  ;;  %v2696_v61 = vsub.f32 %v8447_v2, %v2586_v48  ;;  %v2695_v33 = vsub.f32 %v8459_v0, %v2586_v48  ;;  %v8462_v32 = vsub.f32 %v8460_v1, %v8461_v30  ;;  %v8465_v51 = vld [vmem:[#allocation128_spill] sm:$0xff]  ;;  %v8476_v2 = vld [vmem:[#allocation142_spill] sm:$0xff]  ;;  %v8489_v30 = vld [vmem:[#allocation41_spill] sm:$0xff] }
 0x4d7   : > { %5087 = vpow2.f32 %v2469_v42  ;;  %v2693_v31 = vsub.f32 %v8448_v4, %v2581_v24  ;;  %v2694_v62 = vsub.f32 %v8449_v57, %v2581_v24  ;;  %v8466_v3 = vsub.f32 %v8464_v34, %v8465_v51  ;;  %v8475_v24 = vld [vmem:[#allocation141_spill] sm:$0xff] }
 0x4d8   : > { %2985 = vperm.xlu0 %4965, %v5062_v5   ;;  %5089 = vpow2.f32 %v2473_v36  ;;  %v2793_v20 = vmul.f32 1.442695, %v2696_v61  ;;  %v2481_v45 = vmul.f32 1.442695, %v8462_v32  ;;  %v2791_v36 = vmul.f32 1.442695, %v2695_v33 }
 0x4d9   : > { %5091 = vpow2.f32 %v2783_v35  ;;  %v2787_v7 = vmul.f32 1.442695, %v2693_v31  ;;  %v2789_v50 = vmul.f32 1.442695, %v2694_v62  ;;  %3030 = vperm.xlu1 %4966, %v5064_v52   ;;  %v2471_v15 = vmul.f32 1.442695, %v8466_v3  ;;  %v7269_v52 = vpop.permute.xlu1 %2610 }
 0x4da   : > { %5093 = vpow2.f32 %v2785_v37  ;;  %v2591_v22 = vpop.permute.xlu0 %2590  ;;  %v8471_v35 = vld [vmem:[#allocation18_spill] sm:$0xff]  ;;  %v8473_v37 = vld [vmem:[#allocation35_spill] sm:$0xff]  ;;  %v8477_v61 = vsub.f32 %v8475_v24, %v8476_v2  ;;  %v8488_v33 = vld [vmem:[#allocation72_spill] sm:$0xff]  ;;  %vm8490_vm10 = vnez %v8489_v30 }
 0x4db   : > { %5095 = vpow2.f32 %v2787_v7  ;;  %v2697_v16 = vsub.f32 %v8455_v10, %v2591_v22  ;;  %v2698_v21 = vsub.f32 %v8456_v55, %v2591_v22  ;;  %vm8472_vm7 = vnez %v8471_v35  ;;  %v8483_v22 = vld [vmem:[#allocation60_spill] sm:$0xff]  ;;  %v8485_v55 = vld [vmem:[#allocation145_spill] sm:$0xff] }
 0x4dc   : > { %2995 = vperm.xlu0 %4965, %v5066_v12   ;;  %5097 = vpow2.f32 %v2789_v50  ;;  %v5076_v6 = vpop.eup %5075  ;;  %vm8474_vm15 = vnez %v8473_v37  ;;  %v2485_v4 = vmul.f32 1.442695, %v8477_v61  ;;  %v8491_v32 = vld [vmem:[#allocation44_spill] sm:$0xff]  ;;  %v8501_v37 = vld [vmem:[#allocation135_spill] sm:$0xff] }
 0x4dd   : > { %5099 = vpow2.f32 %v2463_v47  ;;  %v2797_v25 = vmul.f32 1.442695, %v2698_v21  ;;  %3040 = vperm.xlu1 %4966, %v5072_v63   ;;  %v5078_v43 = vpop.eup %5077  ;;  %v2795_v8 = vmul.f32 1.442695, %v2697_v16  ;;  %vm4340_vm1 = vmpackc.low %vm8474_vm15, %vm8472_vm7  ;;  %v8484_v16 = vld [vmem:[#allocation144_spill] sm:$0xff]  ;;  %vm8492_vm11 = vnez %v8491_v32 }
 0x4de   : > { %5101 = vpow2.f32 %v2477_v41  ;;  %v2596_v60 = vpop.permute.xlu0 %2595  ;;  %v8486_v21 = vsub.f32 %v8484_v16, %v8485_v55  ;;  %vm4343_vm3 = vmpackc.low %vm8492_vm11, %vm8490_vm10  ;;  %v8502_v24 = vld [vmem:[#allocation136_spill] sm:$0xff]  ;;  %v2438_v16 = vsub.f32 %v7178_v17, %v7184_v53  ;;  %v8517_v17 = vld [vmem:[#allocation49_spill] sm:$0xff] }
 0x4df   : > { %5103 = vpow2.f32 %v2793_v20  ;;  %v2700_v42 = vsub.f32 %v8463_v14, %v2596_v60  ;;  %v8493_v14 = vld [vmem:[#allocation39_spill] sm:$0xff]  ;;  %v8503_v2 = vsub.f32 %v8501_v37, %v8502_v24  ;;  %vm8518_vm15 = vnez %v8517_v17 }
 0x4e0   : > { %3005 = vperm.xlu0 %4965, %v5068_v40   ;;  %v5080_v11 = vpop.eup %5079  ;;  %5105 = vpow2.f32 %v2797_v25  ;;  %v8480_v40 = vld [vmem:[#allocation130_spill] sm:$0xff]  ;;  %v2489_v63 = vmul.f32 1.442695, %v8486_v21  ;;  %vm8494_vm9 = vnez %v8493_v14  ;;  %v8522_v14 = vld [vmem:[#allocation88_spill] sm:$0xff] }
 0x4e1   : > { %v5082_v26 = vpop.eup %5081  ;;  %5107 = vpow2.f32 %v2467_v46  ;;  %3050 = vperm.xlu1 %4966, %v5074_v9   ;;  %v4341_v48 = vpack.c.bf16 %v5080_v11, %v5076_v6  ;;  %v2801_v12 = vmul.f32 1.442695, %v2700_v42  ;;  %v8482_v54 = vsub.f32 %v8480_v40, %v8481_v28  ;;  %v8487_v9 = vld [vmem:[#allocation77_spill] sm:$0xff]  ;;  %v8495_v42 = vld [vmem:[#allocation43_spill] sm:$0xff]  ;;  %v8511_v28 = vld [vmem:[#allocation150_spill] sm:$0xff] }
 0x4e2   : > { %v5084_v5 = vpop.eup %5083  ;;  %5109 = vpow2.f32 %v2481_v45  ;;  %v2601_v31 = vpop.permute.xlu0 %2600  ;;  %v4338_v57 = vpack.c.bf16 %v5082_v26, %v5078_v43  ;;  %v2706_v13 = vsub.f32 %v8487_v9, %v7269_v52  ;;  %vm8496_vm6 = vnez %v8495_v42  ;;  %v8498_v26 = vld [vmem:[#allocation148_spill] sm:$0xff] }
 0x4e3   : > { %v5086_v62 = vpop.eup %5085  ;;  %5111 = vpow2.f32 %v2795_v8  ;;  %v2701_v49 = vsub.f32 %v8478_v38, %v2601_v31  ;;  %v2702_v47 = vsub.f32 %v8479_v29, %v2601_v31  ;;  %v2475_v41 = vmul.f32 1.442695, %v8482_v54  ;;  %vm4346_vm8 = vmpackc.low %vm8496_vm6, %vm8494_vm9  ;;  %v8507_v38 = vld [vmem:[#allocation139_spill] sm:$0xff] }
 0x4e4   : > { %3015 = vperm.xlu0 %4965, %v5070_v44   ;;  %v5088_v7 = vpop.eup %5087  ;;  %5113 = vpow2.f32 %v2471_v15  ;;  %4339 = vmatprep.mubr.msk.bf16.mxu0 %vm4337_vm0, %v4338_v57  ;;  %v2699_v44 = vsub.f32 %v8483_v22, %v2596_v60  ;;  %v2813_v11 = vmul.f32 1.442695, %v2706_v13  ;;  %v8497_v15 = vld [vmem:[#allocation147_spill] sm:$0xff]  ;;  %v2479_v61 = vmul.f32 1.442695, %v8503_v2  ;;  %vm4349_vm0 = vmpackc.low %vm6446_vm2, %vm6437_vm14 }
 0x4e5   : > { %v5090_v50 = vpop.eup %5089  ;;  %5115 = vpow2.f32 %v2791_v36  ;;  %v2805_v20 = vmul.f32 1.442695, %v2702_v47  ;;  %4342 = vmatmul.mubr.msk.bf16.gmra.mxu0 %vm4340_vm1, %v4341_v48  ;;  %3060 = vperm.xlu1 %4966, %v5088_v7   ;;  %v2803_v0 = vmul.f32 1.442695, %v2701_v49  ;;  %v8499_v56 = vsub.f32 %v8497_v15, %v8498_v26  ;;  %v7306_v36 = vpop.permute.xlu1 %2620  ;;  %v8500_v48 = vld [vmem:[#allocation70_spill] sm:$0xff]  ;;  %v8508_v49 = vld [vmem:[#allocation140_spill] sm:$0xff] }
 0x4e6   : > { %v5092_v10 = vpop.eup %5091  ;;  %5117 = vpow2.f32 %v2485_v4  ;;  %v2606_v59 = vpop.permute.xlu0 %2605  ;;  %v2799_v45 = vmul.f32 1.442695, %v2699_v44  ;;  %v8504_v4 = vld [vmem:[#allocation81_spill] sm:$0xff]  ;;  %v8509_v29 = vsub.f32 %v8507_v38, %v8508_v49  ;;  %v8510_v7 = vld [vmem:[#allocation74_spill] sm:$0xff]  ;;  %v8512_v54 = vld [vmem:[#allocation151_spill] sm:$0xff] }
 0x4e7   : > { %v5094_v46 = vpop.eup %5093  ;;  %5119 = vpow2.f32 %v2801_v12  ;;  %v2704_v25 = vsub.f32 %v8488_v33, %v2606_v59  ;;  %v2493_v39 = vmul.f32 1.442695, %v8499_v56  ;;  %v8514_v44 = vld [vmem:[#allocation84_spill] sm:$0xff]  ;;  %v8527_v15 = vld [vmem:[#allocation82_spill] sm:$0xff]  ;;  %v2437_v12 = vsub.f32 %v7212_v19, %v7217_v27 }
 0x4e8   : > { %3025 = vperm.xlu0 %4965, %v5084_v5   ;;  %v5096_v6 = vpop.eup %5095  ;;  %5121 = vpow2.f32 %v2805_v20  ;;  %v2703_v5 = vsub.f32 %v8500_v48, %v2606_v59  ;;  %v2483_v47 = vmul.f32 1.442695, %v8509_v29  ;;  %v2710_v20 = vsub.f32 %v8514_v44, %v7306_v36  ;;  %v8528_v26 = vld [vmem:[#allocation146_spill] sm:$0xff]  ;;  %v8530_v48 = vld [vmem:[#allocation92_spill] sm:$0xff]  ;;  %v8535_v29 = vld [vmem:[#allocation69_spill] sm:$0xff] }
 0x4e9   : > { %v5098_v1 = vpop.eup %5097  ;;  %5123 = vpow2.f32 %v2475_v41  ;;  %v2809_v60 = vmul.f32 1.442695, %v2704_v25  ;;  %3070 = vperm.xlu1 %4966, %v5090_v50   ;;  %v4347_v43 = vpack.c.bf16 %v5096_v6, %v5092_v10  ;;  %v2705_v50 = vsub.f32 %v8510_v7, %v7269_v52  ;;  %v7351_v6 = vpop.permute.xlu1 %2630  ;;  %v8542_v19 = vld [vmem:[#allocation96_spill] sm:$0xff] }
 0x4ea   : > { %v5100_v8 = vpop.eup %5099  ;;  %5125 = vpow2.f32 %v2489_v63  ;;  %v7301_v34 = vpop.permute.xlu0 %2615  ;;  %v4344_v51 = vpack.c.bf16 %v5098_v1, %v5094_v46  ;;  %v8513_v41 = vsub.f32 %v8511_v28, %v8512_v54  ;;  %v2807_v55 = vmul.f32 1.442695, %v2703_v5  ;;  %v8519_v1 = vld [vmem:[#allocation78_spill] sm:$0xff] }
 0x4eb   : > { %v5102_v3 = vpop.eup %5101  ;;  %5127 = vpow2.f32 %v2803_v0  ;;  %v2708_v31 = vsub.f32 %v8504_v4, %v7301_v34  ;;  %v2811_v13 = vmul.f32 1.442695, %v2705_v50  ;;  %v8515_v0 = vld [vmem:[#allocation45_spill] sm:$0xff]  ;;  %v2821_v53 = vmul.f32 1.442695, %v2710_v20  ;;  %v8539_v50 = vld [vmem:[#allocation86_spill] sm:$0xff] }
 0x4ec   : > { %3035 = vperm.xlu0 %4965, %v5086_v62   ;;  %v5104_v35 = vpop.eup %5103  ;;  %5129 = vpow2.f32 %v2809_v60  ;;  %4345 = vmatprep.mubr.msk.bf16.mxu0 %vm4343_vm3, %v4344_v51  ;;  %v2497_v22 = vmul.f32 1.442695, %v8513_v41  ;;  %vm8516_vm7 = vnez %v8515_v0  ;;  %v2501_v25 = vmul.f32 1.442695, %v2438_v16  ;;  %v8520_v60 = vld [vmem:[#allocation143_spill] sm:$0xff]  ;;  %v8523_v51 = vld [vmem:[#allocation53_spill] sm:$0xff] }
 0x4ed   : > { %v5106_v57 = vpop.eup %5105  ;;  %5131 = vpow2.f32 %v2799_v45  ;;  %4348 = vmatmul.mubr.msk.bf16.gmra.mxu0 %vm4346_vm8, %v4347_v43  ;;  %3080 = vperm.xlu1 %4966, %v5102_v3   ;;  %v2817_v63 = vmul.f32 1.442695, %v2708_v31  ;;  %vm4352_vm1 = vmpackc.low %vm8518_vm15, %vm8516_vm7  ;;  %v2707_v30 = vsub.f32 %v8519_v1, %v7301_v34  ;;  %v8521_v43 = vsub.f32 %v8520_v60, %v7030_v23  ;;  %v8525_v3 = vld [vmem:[#allocation58_spill] sm:$0xff]  ;;  %v8533_v62 = vld [vmem:[#allocation55_spill] sm:$0xff]  ;;  %v2641_v7 = vpop.permute.xlu1 %2640 }
 0x4ee   : > { %v5108_v40 = vpop.eup %5107  ;;  %5133 = vpow2.f32 %v2813_v11  ;;  %v4350_v10 = vpack.c.bf16 %v5106_v57, %v5104_v35  ;;  %v7345_v59 = vpop.permute.xlu0 %2625  ;;  %vm8524_vm2 = vnez %v8523_v51  ;;  %vm8526_vm14 = vnez %v8525_v3  ;;  %v8531_v57 = vld [vmem:[#allocation52_spill] sm:$0xff]  ;;  %v8540_v41 = vld [vmem:[#allocation149_spill] sm:$0xff] }
 0x4ef   : > { %v5110_v52 = vpop.eup %5109  ;;  %5135 = vpow2.f32 %v2493_v39  ;;  %v2712_v42 = vsub.f32 %v8522_v14, %v7345_v59  ;;  %vm4355_vm10 = vmpackc.low %vm8526_vm14, %vm8524_vm2  ;;  %v2709_v34 = vsub.f32 %v8527_v15, %v7306_v36  ;;  %v8529_v56 = vsub.f32 %v8528_v26, %v7052_v18  ;;  %v8556_v26 = vld [vmem:[#allocation107_spill] sm:$0xff] }
 0x4f0   : > { %3045 = vperm.xlu0 %4965, %v5100_v8   ;;  %v5112_v21 = vpop.eup %5111  ;;  %5137 = vpow2.f32 %v2479_v61  ;;  %4351 = vmatprep.mubr.msk.bf16.mxu0 %vm4349_vm0, %v4350_v10  ;;  %v2487_v8 = vmul.f32 1.442695, %v8521_v43  ;;  %v2714_v5 = vsub.f32 %v8530_v48, %v7351_v6  ;;  %v2815_v36 = vmul.f32 1.442695, %v2707_v30  ;;  %v8553_v43 = vld [vmem:[#allocation94_spill] sm:$0xff] }
 0x4f1   : > { %v5114_v9 = vpop.eup %5113  ;;  %5139 = vpow2.f32 %v2483_v47  ;;  %3090 = vperm.xlu1 %4966, %v5110_v52   ;;  %v2491_v39 = vmul.f32 1.442695, %v8529_v56  ;;  %v2825_v2 = vmul.f32 1.442695, %v2712_v42  ;;  %v2819_v61 = vmul.f32 1.442695, %v2709_v34  ;;  %v2651_v60 = vpop.permute.xlu1 %2650 }
 0x4f2   : > { %v5116_v46 = vpop.eup %5115  ;;  %5141 = vpow2.f32 %v2497_v22  ;;  %v7381_v4 = vpop.permute.xlu0 %2635  ;;  %vm8532_vm11 = vnez %v8531_v57  ;;  %vm8534_vm3 = vnez %v8533_v62  ;;  %v2829_v38 = vmul.f32 1.442695, %v2714_v5  ;;  %v8537_v47 = vld [vmem:[#allocation73_spill] sm:$0xff]  ;;  %v8543_v52 = vld [vmem:[#allocation90_spill] sm:$0xff] }
 0x4f3   : > { %v5118_v33 = vpop.eup %5117  ;;  %5143 = vpow2.f32 %v2807_v55  ;;  %v4353_v32 = vpack.c.bf16 %v5112_v21, %v5116_v46  ;;  %vm4358_vm9 = vmpackc.low %vm8534_vm3, %vm8532_vm11  ;;  %vm8536_vm6 = vnez %v8535_v29  ;;  %vm8538_vm8 = vnez %v8537_v47  ;;  %v8544_v21 = vld [vmem:[#allocation100_spill] sm:$0xff]  ;;  %v8555_v34 = vld [vmem:[#allocation98_spill] sm:$0xff] }
 0x4f4   : > { %3055 = vperm.xlu0 %4965, %v5108_v40   ;;  %v5120_v45 = vpop.eup %5119  ;;  %5145 = vpow2.f32 %v2817_v63  ;;  %vm4361_vm0 = vmpackc.low %vm8538_vm8, %vm8536_vm6  ;;  %v2711_v40 = vsub.f32 %v8539_v50, %v7345_v59  ;;  %v8541_v22 = vsub.f32 %v8540_v41, %v7074_v58  ;;  %v2716_v27 = vsub.f32 %v8542_v19, %v7381_v4  ;;  %v8564_v62 = vld [vmem:[#allocation102_spill] sm:$0xff]  ;;  %v8568_v19 = vld [vmem:[#allocation87_spill] sm:$0xff] }
 0x4f5   : > { %v5122_v11 = vpop.eup %5121  ;;  %5147 = vpow2.f32 %v2811_v13  ;;  %4354 = vmatmul.mubr.msk.bf16.gmra.mxu0 %vm4352_vm1, %v4353_v32  ;;  %3100 = vperm.xlu1 %4966, %v5118_v33   ;;  %v2713_v16 = vsub.f32 %v8543_v52, %v7351_v6  ;;  %v2499_v58 = vmul.f32 1.442695, %v2437_v12  ;;  %v2718_v63 = vsub.f32 %v8544_v21, %v2641_v7  ;;  %v8547_v6 = vld [vmem:[#allocation71_spill] sm:$0xff]  ;;  %v8549_v32 = vld [vmem:[#allocation76_spill] sm:$0xff]  ;;  %v8565_v47 = vld [vmem:[#allocation106_spill] sm:$0xff] }
 0x4f6   : > { %v5124_v23 = vpop.eup %5123  ;;  %5149 = vpow2.f32 %v2821_v53  ;;  %v4356_v35 = vpack.c.bf16 %v5122_v11, %v5120_v45  ;;  %v2495_v44 = vmul.f32 1.442695, %v8541_v22  ;;  %v2823_v13 = vmul.f32 1.442695, %v2711_v40  ;;  %v2646_v53 = vpop.permute.xlu0 %2645  ;;  %v8551_v45 = vld [vmem:[#allocation80_spill] sm:$0xff] }
 0x4f7   : > { %v5126_v37 = vpop.eup %5125  ;;  %5151 = vpow2.f32 %v2501_v25  ;;  %v2833_v46 = vmul.f32 1.442695, %v2716_v27  ;;  %v2827_v17 = vmul.f32 1.442695, %v2713_v16  ;;  %v8545_v25 = vld [vmem:[#allocation67_spill] sm:$0xff]  ;;  %vm8548_vm15 = vnez %v8547_v6  ;;  %v8554_v11 = vld [vmem:[#allocation104_spill] sm:$0xff] }
 0x4f8   : > { %3065 = vperm.xlu0 %4965, %v5114_v9   ;;  %v5128_v24 = vpop.eup %5127  ;;  %5153 = vpow2.f32 %v2487_v8  ;;  %4357 = vmatprep.mubr.msk.bf16.mxu0 %vm4355_vm10, %v4356_v35  ;;  %vm8546_vm7 = vnez %v8545_v25  ;;  %v2837_v1 = vmul.f32 1.442695, %v2718_v63  ;;  %vm8550_vm2 = vnez %v8549_v32  ;;  %v8573_v63 = vld [vmem:[#allocation91_spill] sm:$0xff]  ;;  %v8583_v32 = vld [vmem:[#allocation126_spill] sm:$0xff] }
 0x4f9   : > { %v5130_v18 = vpop.eup %5129  ;;  %3110 = vperm.xlu1 %4966, %v5126_v37   ;;  %5155 = vpow2.f32 %v2491_v39  ;;  %vm4364_vm1 = vmpackc.low %vm8548_vm15, %vm8546_vm7  ;;  %vm8552_vm14 = vnez %v8551_v45  ;;  %v2715_v8 = vsub.f32 %v8553_v43, %v7381_v4  ;;  %v2720_v51 = vsub.f32 %v8554_v11, %v2646_v53  ;;  %v8579_v25 = vld [vmem:[#allocation99_spill] sm:$0xff] }
 0x4fa   : > { %v5132_v31 = vpop.eup %5131  ;;  %5157 = vpow2.f32 %v2815_v36  ;;  %vm4367_vm10 = vmpackc.low %vm8552_vm14, %vm8550_vm2  ;;  %v2722_v56 = vsub.f32 %v8556_v26, %v2651_v60  ;;  %v2719_v12 = vsub.f32 %v8564_v62, %v2646_v53  ;;  %vm8574_vm2 = vnez %v8573_v63  ;;  %v8581_v6 = vld [vmem:[#allocation103_spill] sm:$0xff]  ;;  %v2956_v63 = vld [vmem:[#allocation4 + $0x68] sm:$0xff] }
 0x4fb   : > { %v5134_v49 = vpop.eup %5133  ;;  %v4359_v28 = vpack.c.bf16 %v5128_v24, %v5132_v31  ;;  %5159 = vpow2.f32 %v2825_v2  ;;  %v2831_v48 = vmul.f32 1.442695, %v2715_v8  ;;  %v2841_v35 = vmul.f32 1.442695, %v2720_v51  ;;  %v8557_v2 = vld [vmem:[#allocation75_spill] sm:$0xff]  ;;  %v8561_v31 = vld [vmem:[#allocation85_spill] sm:$0xff] }
 0x4fc   : > { %3075 = vperm.xlu0 %4965, %v5124_v23   ;;  %v5136_v54 = vpop.eup %5135  ;;  %v4362_v20 = vpack.c.bf16 %v5134_v49, %v5130_v18  ;;  %5161 = vpow2.f32 %v2819_v61  ;;  %v2717_v23 = vsub.f32 %v8555_v34, %v2641_v7  ;;  %vm8558_vm11 = vnez %v8557_v2  ;;  %v8559_v18 = vld [vmem:[#allocation79_spill] sm:$0xff]  ;;  %v8586_v34 = vld [vmem:[#allocation134_spill] sm:$0xff] }
 0x4fd   : > { %v5138_v10 = vpop.eup %5137  ;;  %4360 = vmatmul.mubr.msk.bf16.gmra.mxu0 %vm4358_vm9, %v4359_v28  ;;  %3120 = vperm.xlu1 %4966, %v5136_v54   ;;  %5163 = vpow2.f32 %v2829_v38  ;;  %vm8560_vm3 = vnez %v8559_v18  ;;  %v2845_v61 = vmul.f32 1.442695, %v2722_v56  ;;  %vm8562_vm6 = vnez %v8561_v31  ;;  %v2951_v26 = vld [vmem:[#allocation4 + $0xb0] sm:$0xff]  ;;  %v2952_v56 = vld [vmem:[#allocation4] sm:$0xff] }
 0x4fe   : > { %v5140_v55 = vpop.eup %5139  ;;  %4363 = vmatprep.mubr.msk.bf16.mxu0 %vm4361_vm0, %v4362_v20  ;;  %5165 = vpow2.f32 %v2495_v44  ;;  %v2835_v36 = vmul.f32 1.442695, %v2717_v23  ;;  %vm4370_vm9 = vmpackc.low %vm8560_vm3, %vm8558_vm11  ;;  %v2721_v7 = vsub.f32 %v8565_v47, %v2651_v60  ;;  %v2839_v40 = vmul.f32 1.442695, %v2719_v12  ;;  %v8566_v44 = vld [vmem:[#allocation83_spill] sm:$0xff]  ;;  %v2954_v47 = vld [vmem:[#allocation4 + $0x18] sm:$0xff] }
 0x4ff   : > { %v5142_v9 = vpop.eup %5141  ;;  %5167 = vpow2.f32 %v2499_v58  ;;  %vm4373_vm8 = vmpackc.low %vm6686_vm4, %vm8562_vm6  ;;  %vm8567_vm4 = vnez %v8566_v44  ;;  %vm8569_vm0 = vnez %v8568_v19  ;;  %vm8580_vm11 = vnez %v8579_v25  ;;  %v8584_v60 = vld [vmem:[#allocation127_spill] sm:$0xff]  ;;  %v8587_v25 = vld [vmem:[#allocation66_spill] sm:$0xff] }
 0x500   : > { %3085 = vperm.xlu0 %4965, %v5138_v10   ;;  %v5144_v59 = vpop.eup %5143  ;;  %5169 = vpow2.f32 %v2823_v13  ;;  %v2843_v41 = vmul.f32 1.442695, %v2721_v7  ;;  %vm4376_vm7 = vmpackc.low %vm8569_vm0, %vm8567_vm4  ;;  %v8571_v10 = vld [vmem:[#allocation97_spill] sm:$0xff]  ;;  %vm8582_vm3 = vnez %v8581_v6 }
 0x501   : > { %v5146_v0 = vpop.eup %5145  ;;  %3130 = vperm.xlu1 %4966, %v5142_v9   ;;  %5171 = vpow2.f32 %v2833_v46  ;;  %vm8572_vm15 = vnez %v8571_v10  ;;  %v8575_v9 = vld [vmem:[#allocation95_spill] sm:$0xff]  ;;  %v8589_v6 = vld [vmem:[#allocation65_spill] sm:$0xff] }
 0x502   : > { %v5148_v33 = vpop.eup %5147  ;;  %5173 = vpow2.f32 %v2827_v17  ;;  %vm8576_vm14 = vnez %v8575_v9 }
 0x503   : > { %v5150_v30 = vpop.eup %5149  ;;  %v4365_v14 = vpack.c.bf16 %v5148_v33, %v5144_v59  ;;  %5175 = vpow2.f32 %v2837_v1 }
 0x504   : > { %3095 = vperm.xlu0 %4965, %v5140_v55   ;;  %v5152_v42 = vpop.eup %5151  ;;  %v4368_v3 = vpack.c.bf16 %v5150_v30, %v5146_v0  ;;  %5177 = vpow2.f32 %v2831_v48 }
 0x505   : > { %v5154_v15 = vpop.eup %5153  ;;  %4366 = vmatmul.mubr.msk.bf16.gmra.mxu0 %vm4364_vm1, %v4365_v14  ;;  %3140 = vperm.xlu1 %4966, %v5152_v42   ;;  %5179 = vpow2.f32 %v2841_v35  ;;  %vm4379_vm1 = vmpackc.low %vm8572_vm15, %vm6706_vm13 }
 0x506   : > { %4369 = vmatprep.mubr.msk.bf16.mxu0 %vm4367_vm10, %v4368_v3  ;;  %v5156_v39 = vpop.eup %5155  ;;  %5181 = vpow2.f32 %v2835_v36  ;;  %vm4382_vm10 = vmpackc.low %vm8576_vm14, %vm8574_vm2  ;;  %v8585_v3 = vld [vmem:[#allocation133_spill] sm:$0xff] }
 0x507   : > { %v5158_v5 = vpop.eup %5157  ;;  %5183 = vpow2.f32 %v2845_v61  ;;  %vm4385_vm13 = vmpackc.low %vm6761_vm5, %vm6743_vm12  ;;  %vm8588_vm5 = vnez %v8587_v25  ;;  %vm8590_vm12 = vnez %v8589_v6 }
 0x508   : > { %3105 = vperm.xlu0 %4965, %v5154_v15   ;;  %v5160_v37 = vpop.eup %5159  ;;  %5185 = vpow2.f32 %v2839_v40  ;;  %vm8591_vm6 = vmpackc.low %vm8588_vm5, %vm8590_vm12 }
 0x509   : > { %v5162_v24 = vpop.eup %5161  ;;  %5187 = vpow2.f32 %v2843_v41 }
 0x50a   : > { %v5164_v4 = vpop.eup %5163  ;;  %v4371_v38 = vpack.c.bf16 %v5162_v24, %v5158_v5 }
 0x50b   : > { %v4374_v49 = vpack.c.bf16 %v5164_v4, %v5160_v37  ;;  %v5166_v29 = vpop.eup %5165  ;;  %v2953_v4 = vld [vmem:[#allocation4 + $0xd8] sm:$0xff] }
 0x50c   : > { %3115 = vperm.xlu0 %4965, %v5156_v39   ;;  %v5168_v50 = vpop.eup %5167 }
 0x50d   : > { %4372 = vmatmul.mubr.msk.bf16.gmra.mxu0 %vm4370_vm9, %v4371_v38  ;;  %v5170_v28 = vpop.eup %5169  ;;  %vm4388_vm9 = vmpackc.low %vm8582_vm3, %vm8580_vm11 }
 0x50e   : > { %4375 = vmatprep.mubr.msk.bf16.mxu0 %vm4373_vm8, %v4374_v49  ;;  %v5172_v54 = vpop.eup %5171 }
 0x50f   : > { %v5174_v22 = vpop.eup %5173 }
 0x510   : > { %3125 = vperm.xlu0 %4965, %v5166_v29   ;;  %v5176_v27 = vpop.eup %5175  ;;  %v4377_v52 = vpack.c.bf16 %v5174_v22, %v5170_v28  ;;  %v2955_v22 = vld [vmem:[#allocation4 + $0x50] sm:$0xff] }
 0x511   : > { %v4380_v16 = vpack.c.bf16 %v5176_v27, %v5172_v54  ;;  %v5178_v55 = vpop.eup %5177 }
 0x512   : > { %v5180_v58 = vpop.eup %5179 }
 0x513   : > { %v5182_v21 = vpop.eup %5181 }
 0x514   : > { %3135 = vperm.xlu0 %4965, %v5168_v50   ;;  %v5184_v13 = vpop.eup %5183  ;;  %v4383_v0 = vpack.c.bf16 %v5182_v21, %v5178_v55 }
 0x515   : > { %4378 = vmatmul.mubr.msk.bf16.gmra.mxu0 %vm4376_vm7, %v4377_v52  ;;  %v4386_v17 = vpack.c.bf16 %v5184_v13, %v5180_v58  ;;  %v5186_v53 = vpop.eup %5185 }
 0x516   : > { %4381 = vmatprep.mubr.msk.bf16.mxu0 %vm4379_vm1, %v4380_v16  ;;  %v5188_v33 = vpop.eup %5187 }
 0x517   : > { %v4389_v1 = vpack.c.bf16 %v5188_v33, %v5186_v53 }
 0x51d   : > { %4384 = vmatmul.mubr.msk.bf16.gmra.mxu0 %vm4382_vm10, %v4383_v0 }
 0x51e   : > { %4387 = vmatprep.mubr.msk.bf16.mxu0 %vm4385_vm13, %v4386_v17 }
 0x525   : > { %4390 = vmatmul.mubr.msk.bf16.gmra.mxu0 %vm4388_vm9, %v4389_v1  ;;  %v2957_v1 = vld [vmem:[#allocation4 + $0x30] sm:$0xff] }
 0x540   : > { %v2661_v30 = vpop.permute.xlu1 %2660 }
 0x541   : > { %v2725_v45 = vsub.f32 %v8583_v32, %v2661_v30  ;;  %v2726_v43 = vsub.f32 %v8584_v60, %v2661_v30  ;;  %v8594_v60 = vld [vmem:[#allocation62_spill] sm:$0xff] }
 0x542   : > { %vm8595_vm4 = vnez %v8594_v60 }
 0x543   : > { %v2851_v8 = vmul.f32 1.442695, %v2725_v45  ;;  %v2853_v42 = vmul.f32 1.442695, %v2726_v43  ;;  %v8592_v45 = vld [vmem:[#allocation63_spill] sm:$0xff] }
 0x544   : > { %v2991_v39 = vpop.permute.xlu1 %2990  ;;  %vm8593_vm8 = vnez %v8592_v45 }
 0x545   : > { %5189 = vpow2.f32 %v2851_v8  ;;  %v3144_v18 = vmul.f32 %v2991_v39, %v2952_v56  ;;  %vm8596_vm0 = vmpackc.low %vm8593_vm8, %vm8595_vm4  ;;  %v2959_v56 = vld [vmem:[#allocation4 + $0x80] sm:$0xff] }
 0x546   : > { %5191 = vpow2.f32 %v2853_v42 }
 0x548   : > { %v3001_v7 = vpop.permute.xlu1 %3000 }
 0x549   : > { %v3146_v54 = vmul.f32 %v3001_v7, %v2954_v47 }
 0x54c   : > { %v4624_v14 = vpop.f32.mrf.mxu0  ;;  %v3011_v9 = vpop.permute.xlu1 %3010 }
 0x54d   : > { %v3148_v53 = vmul.f32 %v3011_v9, %v2956_v63 }
 0x54e   : > { %v4625_v51 = vpop.f32.mrf.mxu0 }
 0x54f   : > { %v2656_v11 = vpop.permute.xlu0 %2655  ;;  %v4626_v36 = vadd.f32 %v4625_v51, %v4624_v14 }
 0x550   : > { %v2723_v15 = vsub.f32 %v8585_v3, %v2656_v11  ;;  %v2724_v23 = vsub.f32 %v8586_v34, %v2656_v11  ;;  %v4627_v35 = vpop.f32.mrf.mxu0  ;;  %v2958_v11 = vld [vmem:[#allocation4 + $0x48] sm:$0xff]  ;;  %v3021_v51 = vpop.permute.xlu1 %3020 }
 0x552   : > { %v2847_v48 = vmul.f32 1.442695, %v2723_v15  ;;  %v2849_v5 = vmul.f32 1.442695, %v2724_v23  ;;  %v4628_v24 = vpop.f32.mrf.mxu0  ;;  %v5190_v27 = vpop.eup %5189  ;;  %v3150_v23 = vmul.f32 %v3021_v51, %v2958_v11 }
 0x553   : > { %v2986_v37 = vpop.permute.xlu0 %2985  ;;  %v4629_v61 = vadd.f32 %v4628_v24, %v4627_v35  ;;  %v5192_v10 = vpop.eup %5191  ;;  %v2960_v24 = vld [vmem:[#allocation4 + $0x88] sm:$0xff] }
 0x554   : > { %5193 = vpow2.f32 %v2847_v48  ;;  %v3143_v2 = vmul.f32 %v2986_v37, %v2951_v26  ;;  %v4630_v57 = vpop.f32.mrf.mxu0 }
 0x555   : > { %5195 = vpow2.f32 %v2849_v5  ;;  %v3337_v62 = vadd.f32 %v4629_v61, %v3144_v18 }
 0x556   : > { %v3336_v31 = vadd.f32 %v4626_v36, %v3143_v2  ;;  %v4631_v38 = vpop.f32.mrf.mxu0  ;;  %v3031_v2 = vpop.permute.xlu1 %3030 }
 0x557   : > { %v2996_v12 = vpop.permute.xlu0 %2995  ;;  %3369 = vst [vmem:[#allocation4] sm:$0xff] %v3337_v62  ;;  %v4632_v29 = vadd.f32 %v4631_v38, %v4630_v57  ;;  %v2961_v62 = vld [vmem:[#allocation4 + $0xe8] sm:$0xff] }
 0x558   : > { %3368 = vst [vmem:[#allocation4 + $0xb0] sm:$0xff] %v3336_v31  ;;  %v3145_v49 = vmul.f32 %v2996_v12, %v2953_v4  ;;  %v4633_v50 = vpop.f32.mrf.mxu0  ;;  %v3152_v31 = vmul.f32 %v3031_v2, %v2960_v24 }
 0x55a   : > { %v3338_v40 = vadd.f32 %v4632_v29, %v3145_v49  ;;  %v4634_v28 = vpop.f32.mrf.mxu0 }
 0x55b   : > { %v4635_v41 = vadd.f32 %v4634_v28, %v4633_v50  ;;  %v3006_v44 = vpop.permute.xlu0 %3005  ;;  %v2962_v50 = vld [vmem:[#allocation4 + $0xb8] sm:$0xff] }
 0x55c   : > { %3370 = vst [vmem:[#allocation4 + $0xd8] sm:$0xff] %v3338_v40  ;;  %v4636_v19 = vpop.f32.mrf.mxu0  ;;  %v3147_v55 = vmul.f32 %v3006_v44, %v2955_v22  ;;  %v3041_v40 = vpop.permute.xlu1 %3040 }
 0x55d   : > { %v3339_v20 = vadd.f32 %v4635_v41, %v3146_v54  ;;  %v3154_v22 = vmul.f32 %v3041_v40, %v2962_v50 }
 0x55e   : > { %v4637_v52 = vpop.f32.mrf.mxu0 }
 0x55f   : > { %3371 = vst [vmem:[#allocation4 + $0x18] sm:$0xff] %v3339_v20  ;;  %v4638_v58 = vadd.f32 %v4637_v52, %v4636_v19  ;;  %v3016_v30 = vpop.permute.xlu0 %3015 }
 0x560   : > { %v4639_v13 = vpop.f32.mrf.mxu0  ;;  %v3149_v14 = vmul.f32 %v3016_v30, %v2957_v1  ;;  %v2966_v30 = vld [vmem:[#allocation4 + $0x78] sm:$0xff] }
 0x561   : > { %v5194_v16 = vpop.eup %5193  ;;  %v3340_v46 = vadd.f32 %v4638_v58, %v3147_v55  ;;  %v2964_v58 = vld [vmem:[#allocation4 + $0xf0] sm:$0xff] }
 0x562   : > { %v5196_v21 = vpop.eup %5195  ;;  %v4395_v59 = vpack.c.bf16 %v5190_v27, %v5194_v16  ;;  %v4640_v17 = vpop.f32.mrf.mxu0  ;;  %v2963_v27 = vld [vmem:[#allocation4 + $0x60] sm:$0xff] }
 0x563   : > { %v4392_v0 = vpack.c.bf16 %v5192_v10, %v5196_v21  ;;  %3372 = vst [vmem:[#allocation4 + $0x50] sm:$0xff] %v3340_v46  ;;  %v4641_v33 = vadd.f32 %v4640_v17, %v4639_v13  ;;  %v3026_v39 = vpop.permute.xlu0 %3025  ;;  %v3051_v21 = vpop.permute.xlu1 %3050 }
 0x564   : > { %v4642_v32 = vpop.f32.mrf.mxu0  ;;  %v3151_v37 = vmul.f32 %v3026_v39, %v2959_v56 }
 0x565   : > { %4393 = vmatprep.mubr.msk.bf16.mxu0 %vm8591_vm6, %v4392_v0  ;;  %v3341_v43 = vadd.f32 %v4641_v33, %v3148_v53  ;;  %v2965_v0 = vld [vmem:[#allocation4 + $0x8] sm:$0xff] }
 0x566   : > { %4396 = vmatmul.mubr.msk.bf16.gmra.mxu0 %vm8596_vm0, %v4395_v59  ;;  %v4643_v8 = vpop.f32.mrf.mxu0  ;;  %v3156_v59 = vmul.f32 %v3051_v21, %v2964_v58 }
 0x567   : > { %3373 = vst [vmem:[#allocation4 + $0x68] sm:$0xff] %v3341_v43  ;;  %v4644_v42 = vadd.f32 %v4643_v8, %v4642_v32  ;;  %v3036_v12 = vpop.permute.xlu0 %3035  ;;  %v3061_v32 = vpop.permute.xlu1 %3060 }
 0x568   : > { %v4645_v3 = vpop.f32.mrf.mxu0  ;;  %v3153_v47 = vmul.f32 %v3036_v12, %v2961_v62  ;;  %v3158_v8 = vmul.f32 %v3061_v32, %v2966_v30 }
 0x569   : > { %v3342_v15 = vadd.f32 %v4644_v42, %v3149_v14  ;;  %v2967_v42 = vld [vmem:[#allocation4 + $0x38] sm:$0xff] }
 0x56a   : > { %v4646_v34 = vpop.f32.mrf.mxu0 }
 0x56b   : > { %3374 = vst [vmem:[#allocation4 + $0x30] sm:$0xff] %v3342_v15  ;;  %v4647_v26 = vadd.f32 %v4646_v34, %v4645_v3  ;;  %v3046_v20 = vpop.permute.xlu0 %3045  ;;  %v3071_v56 = vpop.permute.xlu1 %3070 }
 0x56c   : > { %v4648_v48 = vpop.f32.mrf.mxu0  ;;  %v3155_v16 = vmul.f32 %v3046_v20, %v2963_v27 }
 0x56d   : > { %v3343_v5 = vadd.f32 %v4647_v26, %v3150_v23  ;;  %v2968_v26 = vld [vmem:[#allocation4 + $0x58] sm:$0xff] }
 0x56e   : > { %v4649_v35 = vpop.f32.mrf.mxu0 }
 0x56f   : > { %3375 = vst [vmem:[#allocation4 + $0x48] sm:$0xff] %v3343_v5  ;;  %v4650_v36 = vadd.f32 %v4649_v35, %v4648_v48  ;;  %v3056_v17 = vpop.permute.xlu0 %3055  ;;  %v3160_v35 = vmul.f32 %v3071_v56, %v2968_v26  ;;  %v3081_v62 = vpop.permute.xlu1 %3080 }
 0x570   : > { %v4651_v18 = vpop.f32.mrf.mxu0  ;;  %v3157_v6 = vmul.f32 %v3056_v17, %v2965_v0 }
 0x571   : > { %v3344_v61 = vadd.f32 %v4650_v36, %v3151_v37  ;;  %v2969_v36 = vld [vmem:[#allocation4 + $0x40] sm:$0xff] }
 0x572   : > { %v4652_v4 = vpop.f32.mrf.mxu0 }
 0x573   : > { %3376 = vst [vmem:[#allocation4 + $0x80] sm:$0xff] %v3344_v61  ;;  %v4653_v57 = vadd.f32 %v4652_v4, %v4651_v18  ;;  %v3066_v11 = vpop.permute.xlu0 %3065 }
 0x574   : > { %v4654_v38 = vpop.f32.mrf.mxu0  ;;  %v3159_v34 = vmul.f32 %v3066_v11, %v2967_v42 }
 0x575   : > { %v3345_v49 = vadd.f32 %v4653_v57, %v3152_v31  ;;  %v2970_v57 = vld [vmem:[#allocation4 + $0xc8] sm:$0xff] }
 0x576   : > { %v4655_v29 = vpop.f32.mrf.mxu0 }
 0x577   : > { %3377 = vst [vmem:[#allocation4 + $0x88] sm:$0xff] %v3345_v49  ;;  %v4656_v7 = vadd.f32 %v4655_v29, %v4654_v38  ;;  %v3076_v24 = vpop.permute.xlu0 %3075  ;;  %v3162_v29 = vmul.f32 %v3081_v62, %v2970_v57 }
 0x578   : > { %v4657_v28 = vpop.f32.mrf.mxu0  ;;  %v3161_v4 = vmul.f32 %v3076_v24, %v2969_v36 }
 0x579   : > { %v3346_v54 = vadd.f32 %v4656_v7, %v3153_v47  ;;  %v2971_v7 = vld [vmem:[#allocation4 + $0xe0] sm:$0xff] }
 0x57a   : > { %v4658_v41 = vpop.f32.mrf.mxu0 }
 0x57b   : > { %3378 = vst [vmem:[#allocation4 + $0xe8] sm:$0xff] %v3346_v54  ;;  %v4659_v44 = vadd.f32 %v4658_v41, %v4657_v28  ;;  %v3086_v50 = vpop.permute.xlu0 %3085 }
 0x57c   : > { %v3163_v41 = vmul.f32 %v3086_v50, %v2971_v7 }
 0x57d   : > { %v3347_v19 = vadd.f32 %v4659_v44, %v3154_v22  ;;  %v2972_v44 = vld [vmem:[#allocation4 + $0x90] sm:$0xff] }
 0x57f   : > { %3379 = vst [vmem:[#allocation4 + $0xb8] sm:$0xff] %v3347_v19  ;;  %v3091_v19 = vpop.permute.xlu1 %3090  ;;  %v3096_v58 = vpop.permute.xlu0 %3095 }
 0x583   : > { %v3101_v0 = vpop.permute.xlu1 %3100  ;;  %v3106_v30 = vpop.permute.xlu0 %3105 }
 0x587   : > { %v3111_v42 = vpop.permute.xlu1 %3110  ;;  %v3116_v26 = vpop.permute.xlu0 %3115 }
 0x58b   : > { %v3121_v36 = vpop.permute.xlu1 %3120  ;;  %v3126_v57 = vpop.permute.xlu0 %3125 }
 0x58f   : > { %v3131_v7 = vpop.permute.xlu1 %3130 }
 0x5a5   : > { %v4660_v10 = vpop.f32.mrf.mxu0 }
 0x5a7   : > { %v4661_v52 = vpop.f32.mrf.mxu0 }
 0x5a8   : > { %v4662_v55 = vadd.f32 %v4661_v52, %v4660_v10  ;;  %v3164_v52 = vmul.f32 %v3091_v19, %v2972_v44  ;;  %v2981_v44 = vld [vmem:[#allocation4 + $0x20] sm:$0xff]  ;;  %v3136_v19 = vpop.permute.xlu0 %3135 }
 0x5a9   : > { %v4663_v63 = vpop.f32.mrf.mxu0 }
 0x5aa   : > { %v3348_v9 = vadd.f32 %v4662_v55, %v3155_v16  ;;  %v2973_v55 = vld [vmem:[#allocation4 + $0x70] sm:$0xff] }
 0x5ab   : > { %v4664_v13 = vpop.f32.mrf.mxu0 }
 0x5ac   : > { %3380 = vst [vmem:[#allocation4 + $0x60] sm:$0xff] %v3348_v9  ;;  %v4665_v46 = vadd.f32 %v4664_v13, %v4663_v63  ;;  %v3165_v13 = vmul.f32 %v3096_v58, %v2973_v55  ;;  %v3141_v55 = vpop.permute.xlu1 %3140 }
 0x5ad   : > { %v4666_v53 = vpop.f32.mrf.mxu0 }
 0x5ae   : > { %v3349_v33 = vadd.f32 %v4665_v46, %v3156_v59  ;;  %v2974_v46 = vld [vmem:[#allocation4 + $0xc0] sm:$0xff] }
 0x5af   : > { %v4667_v25 = vpop.f32.mrf.mxu0 }
 0x5b0   : > { %3381 = vst [vmem:[#allocation4 + $0xf0] sm:$0xff] %v3349_v33  ;;  %v4668_v1 = vadd.f32 %v4667_v25, %v4666_v53  ;;  %v3166_v25 = vmul.f32 %v3101_v0, %v2974_v46 }
 0x5b1   : > { %v4669_v45 = vpop.f32.mrf.mxu0 }
 0x5b2   : > { %v3350_v60 = vadd.f32 %v4668_v1, %v3157_v6  ;;  %v2975_v1 = vld [vmem:[#allocation4 + $0xa8] sm:$0xff] }
 0x5b3   : > { %v4670_v43 = vpop.f32.mrf.mxu0 }
 0x5b4   : > { %3382 = vst [vmem:[#allocation4 + $0x8] sm:$0xff] %v3350_v60  ;;  %v4671_v14 = vadd.f32 %v4670_v43, %v4669_v45  ;;  %v3167_v43 = vmul.f32 %v3106_v30, %v2975_v1 }
 0x5b5   : > { %v4672_v51 = vpop.f32.mrf.mxu0 }
 0x5b6   : > { %v3351_v3 = vadd.f32 %v4671_v14, %v3158_v8  ;;  %v2976_v14 = vld [vmem:[#allocation4 + $0xd0] sm:$0xff] }
 0x5b7   : > { %v4673_v15 = vpop.f32.mrf.mxu0 }
 0x5b8   : > { %3383 = vst [vmem:[#allocation4 + $0x78] sm:$0xff] %v3351_v3  ;;  %v4674_v23 = vadd.f32 %v4673_v15, %v4672_v51  ;;  %v3168_v15 = vmul.f32 %v3111_v42, %v2976_v14 }
 0x5b9   : > { %v4675_v39 = vpop.f32.mrf.mxu0 }
 0x5ba   : > { %v3352_v48 = vadd.f32 %v4674_v23, %v3159_v34  ;;  %v2977_v23 = vld [vmem:[#allocation4 + $0x10] sm:$0xff] }
 0x5bb   : > { %v4676_v5 = vpop.f32.mrf.mxu0 }
 0x5bc   : > { %3384 = vst [vmem:[#allocation4 + $0x38] sm:$0xff] %v3352_v48  ;;  %v4677_v37 = vadd.f32 %v4676_v5, %v4675_v39  ;;  %v3169_v5 = vmul.f32 %v3116_v26, %v2977_v23 }
 0x5bd   : > { %v4678_v2 = vpop.f32.mrf.mxu0 }
 0x5be   : > { %v3353_v18 = vadd.f32 %v4677_v37, %v3160_v35  ;;  %v2978_v37 = vld [vmem:[#allocation4 + $0x28] sm:$0xff] }
 0x5bf   : > { %v4679_v61 = vpop.f32.mrf.mxu0 }
 0x5c0   : > { %3385 = vst [vmem:[#allocation4 + $0x58] sm:$0xff] %v3353_v18  ;;  %v4680_v31 = vadd.f32 %v4679_v61, %v4678_v2  ;;  %v3170_v61 = vmul.f32 %v3121_v36, %v2978_v37 }
 0x5c1   : > { %v4681_v12 = vpop.f32.mrf.mxu0 }
 0x5c2   : > { %v3354_v38 = vadd.f32 %v4680_v31, %v3161_v4  ;;  %v2979_v31 = vld [vmem:[#allocation4 + $0xa0] sm:$0xff] }
 0x5c3   : > { %v4682_v49 = vpop.f32.mrf.mxu0 }
 0x5c4   : > { %3386 = vst [vmem:[#allocation4 + $0x40] sm:$0xff] %v3354_v38  ;;  %v4683_v47 = vadd.f32 %v4682_v49, %v4681_v12  ;;  %v3171_v49 = vmul.f32 %v3126_v57, %v2979_v31 }
 0x5c5   : > { %v4684_v40 = vpop.f32.mrf.mxu0 }
 0x5c6   : > { %v3355_v28 = vadd.f32 %v4683_v47, %v3162_v29  ;;  %v2980_v47 = vld [vmem:[#allocation4 + $0xf8] sm:$0xff] }
 0x5c7   : > { %v4685_v54 = vpop.f32.mrf.mxu0 }
 0x5c8   : > { %3387 = vst [vmem:[#allocation4 + $0xc8] sm:$0xff] %v3355_v28  ;;  %v4686_v22 = vadd.f32 %v4685_v54, %v4684_v40  ;;  %v3172_v54 = vmul.f32 %v3131_v7, %v2980_v47 }
 0x5c9   : > { %v4687_v27 = vpop.f32.mrf.mxu0 }
 0x5ca   : > { %v3356_v20 = vadd.f32 %v4686_v22, %v3163_v41 }
 0x5cb   : > { %v4688_v10 = vpop.f32.mrf.mxu0 }
 0x5cc   : > { %3388 = vst [vmem:[#allocation4 + $0xe0] sm:$0xff] %v3356_v20  ;;  %v4689_v16 = vadd.f32 %v4688_v10, %v4687_v27  ;;  %v3173_v10 = vmul.f32 %v3136_v19, %v2981_v44 }
 0x5cd   : > { %v4690_v21 = vpop.f32.mrf.mxu0 }
 0x5ce   : > { %v3357_v63 = vadd.f32 %v4689_v16, %v3164_v52  ;;  %v2982_v16 = vld [vmem:[#allocation4 + $0x98] sm:$0xff] }
 0x5cf   : > { %v4691_v9 = vpop.f32.mrf.mxu0 }
 0x5d0   : > { %3389 = vst [vmem:[#allocation4 + $0x90] sm:$0xff] %v3357_v63  ;;  %v4692_v59 = vadd.f32 %v4691_v9, %v4690_v21  ;;  %v3174_v9 = vmul.f32 %v3141_v55, %v2982_v16 }
 0x5d1   : > { %v4693_v17 = vpop.f32.mrf.mxu0 }
 0x5d2   : > { %v3358_v53 = vadd.f32 %v4692_v59, %v3165_v13 }
 0x5d3   : > { %v4694_v33 = vpop.f32.mrf.mxu0 }
 0x5d4   : > { %3390 = vst [vmem:[#allocation4 + $0x70] sm:$0xff] %v3358_v53  ;;  %v4695_v6 = vadd.f32 %v4694_v33, %v4693_v17 }
 0x5d5   : > { %v4696_v32 = vpop.f32.mrf.mxu0 }
 0x5d6   : > { %v3359_v45 = vadd.f32 %v4695_v6, %v3166_v25 }
 0x5d7   : > { %v4697_v60 = vpop.f32.mrf.mxu0 }
 0x5d8   : > { %3391 = vst [vmem:[#allocation4 + $0xc0] sm:$0xff] %v3359_v45  ;;  %v4698_v8 = vadd.f32 %v4697_v60, %v4696_v32 }
 0x5d9   : > { %v4699_v11 = vpop.f32.mrf.mxu0 }
 0x5da   : > { %v3360_v51 = vadd.f32 %v4698_v8, %v3167_v43 }
 0x5db   : > { %v4700_v3 = vpop.f32.mrf.mxu0 }
 0x5dc   : > { %3392 = vst [vmem:[#allocation4 + $0xa8] sm:$0xff] %v3360_v51  ;;  %v4701_v34 = vadd.f32 %v4700_v3, %v4699_v11 }
 0x5dd   : > { %v4702_v56 = vpop.f32.mrf.mxu0 }
 0x5de   : > { %v3361_v39 = vadd.f32 %v4701_v34, %v3168_v15 }
 0x5df   : > { %v4703_v48 = vpop.f32.mrf.mxu0 }
 0x5e0   : > { %3393 = vst [vmem:[#allocation4 + $0xd0] sm:$0xff] %v3361_v39  ;;  %v4704_v35 = vadd.f32 %v4703_v48, %v4702_v56 }
 0x5e1   : > { %v4705_v24 = vpop.f32.mrf.mxu0 }
 0x5e2   : > { %v3362_v2 = vadd.f32 %v4704_v35, %v3169_v5 }
 0x5e3   : > { %v4706_v18 = vpop.f32.mrf.mxu0 }
 0x5e4   : > { %3394 = vst [vmem:[#allocation4 + $0x10] sm:$0xff] %v3362_v2  ;;  %v4707_v4 = vadd.f32 %v4706_v18, %v4705_v24 }
 0x5e5   : > { %v4708_v62 = vpop.f32.mrf.mxu0 }
 0x5e6   : > { %v3363_v12 = vadd.f32 %v4707_v4, %v3170_v61 }
 0x5e7   : > { %v4709_v38 = vpop.f32.mrf.mxu0 }
 0x5e8   : > { %3395 = vst [vmem:[#allocation4 + $0x28] sm:$0xff] %v3363_v12  ;;  %v4710_v29 = vadd.f32 %v4709_v38, %v4708_v62 }
 0x5e9   : > { %v4711_v50 = vpop.f32.mrf.mxu0 }
 0x5ea   : > { %v3364_v40 = vadd.f32 %v4710_v29, %v3171_v49 }
 0x5eb   : > { %v4712_v28 = vpop.f32.mrf.mxu0 }
 0x5ec   : > { %3396 = vst [vmem:[#allocation4 + $0xa0] sm:$0xff] %v3364_v40  ;;  %v4713_v41 = vadd.f32 %v4712_v28, %v4711_v50 }
 0x5ee   : > { %v3365_v22 = vadd.f32 %v4713_v41, %v3172_v54 }
 0x5f0   : > { %3397 = vst [vmem:[#allocation4 + $0xf8] sm:$0xff] %v3365_v22 }
 0x626   : > { %v4714_v27 = vpop.f32.mrf.mxu0 }
 0x628   : > { %v4715_v20 = vpop.f32.mrf.mxu0 }
 0x629   : > { %v4716_v52 = vadd.f32 %v4715_v20, %v4714_v27 }
 0x62a   : > { %v4717_v58 = vpop.f32.mrf.mxu0 }
 0x62b   : > { %v3366_v21 = vadd.f32 %v4716_v52, %v3173_v10 }
 0x62c   : > { %v4718_v63 = vpop.f32.mrf.mxu0 }
 0x62d   : > { %3398 = vst [vmem:[#allocation4 + $0x20] sm:$0xff] %v3366_v21  ;;  %v4719_v13 = vadd.f32 %v4718_v63, %v4717_v58 }
 0x62f   : > { %v3367_v59 = vadd.f32 %v4719_v13, %v3174_v9 }
 0x631   : > { %3399 = vst [vmem:[#allocation4 + $0x98] sm:$0xff] %v3367_v59 }
 0x632 PF: > { %s4397_s4 = sadd.s32 4294967295, %s5610_s19 }
 0x633   : > { %p4398_p3 = scmp.ne.s32.totalorder %s5389_s30, %s4397_s4 }
 0x634   : > { %s8597_s23 = sld [smem:[#allocation155_spill]] (!%p4398_p3) }
 0x635   : > { %3437 = sbr.rel (%p4398_p3) target bundleno = 2004 (0x7d4), region = 91  ;;  %s8598_s21 = sld [smem:[#allocation156_spill]] (!%p4398_p3) }
 0x63a   : > { %v7482_v46 = vld [vmem:[#allocation4 + $0x38] sm:$0xff]  ;;  %v7484_v0 = vld [vmem:[#allocation4 + $0xb0] sm:$0xff]  ;;  %v5412_v53 = vmov 32   ;;  %v7491_v1 = vld [vmem:[#allocation4] sm:$0xff] }
 0x63b   : > { %v7486_v17 = vld [vmem:[#allocation4 + $0x58] sm:$0xff]  ;;  %5198 = vset.pattern.permute.xlu1 %v5412_v53  ;;  %5197 = vset.pattern.permute.xlu0 %v5412_v53  ;;  %v3486_v33 = vmax.f32 %v7482_v46, 1e-30  ;;  %v3470_v25 = vmax.f32 %v7484_v0, 1e-30  ;;  %v7500_v8 = vld [vmem:[#allocation4 + $0xc8] sm:$0xff] }
 0x63c   : > { %v3487_v6 = vmax.f32 %v7486_v17, 1e-30  ;;  %v7493_v30 = vld [vmem:[#allocation4 + $0x18] sm:$0xff]  ;;  %v3471_v32 = vmax.f32 %v7491_v1, 1e-30  ;;  %v7502_v14 = vld [vmem:[#allocation4 + $0x40] sm:$0xff] }
 0x63d   : > { %5207 = vrcp.f32 %v3486_v33  ;;  %v7496_v45 = vld [vmem:[#allocation4 + $0xd8] sm:$0xff]  ;;  %v3473_v60 = vmax.f32 %v7493_v30, 1e-30  ;;  %v3489_v42 = vmax.f32 %v7500_v8, 1e-30  ;;  %v7506_v51 = vld [vmem:[#allocation4 + $0x68] sm:$0xff] }
 0x63e   : > { %5209 = vrcp.f32 %v3470_v25  ;;  %v3472_v43 = vmax.f32 %v7496_v45, 1e-30  ;;  %v3488_v11 = vmax.f32 %v7502_v14, 1e-30  ;;  %v7508_v3 = vld [vmem:[#allocation4 + $0x50] sm:$0xff]  ;;  %v7514_v26 = vld [vmem:[#allocation4 + $0xe0] sm:$0xff] }
 0x63f   : > { %5211 = vrcp.f32 %v3487_v6  ;;  %v3475_v15 = vmax.f32 %v7506_v51, 1e-30  ;;  %v3474_v34 = vmax.f32 %v7508_v3, 1e-30  ;;  %v7512_v23 = vld [vmem:[#allocation4 + $0x90] sm:$0xff]  ;;  %v7517_v5 = vld [vmem:[#allocation4 + $0x48] sm:$0xff] }
 0x640   : > { %5213 = vrcp.f32 %v3471_v32  ;;  %v3491_v48 = vmax.f32 %v7512_v23, 1e-30  ;;  %v7519_v35 = vld [vmem:[#allocation4 + $0x30] sm:$0xff]  ;;  %v3490_v36 = vmax.f32 %v7514_v26, 1e-30  ;;  %v7522_v24 = vld [vmem:[#allocation4 + $0xc0] sm:$0xff] }
 0x641   : > { %5215 = vrcp.f32 %v3473_v60  ;;  %v3477_v18 = vmax.f32 %v7517_v5, 1e-30  ;;  %v3476_v61 = vmax.f32 %v7519_v35, 1e-30  ;;  %v3493_v4 = vmax.f32 %v7522_v24, 1e-30 }
 0x642   : > { %5217 = vrcp.f32 %v3472_v43  ;;  %v7527_v31 = vld [vmem:[#allocation4 + $0x70] sm:$0xff]  ;;  %v5199_v62 = vld [vmem:[%s8597_s23 + $0x38] sm:$0xff]   ;;  %v7535_v49 = vld [vmem:[#allocation4 + $0x88] sm:$0xff] }
 0x643   : > { %5219 = vrcp.f32 %v3489_v42  ;;  %v5200_v38 = vld [vmem:[%s8597_s23 + $0x30] sm:$0xff]   ;;  %4780 = vmatprep.subr.bf16.mxu0 %v5199_v62  ;;  %4836 = vmatprep.subr.bf16.mxu1 %v5199_v62  ;;  %v3492_v29 = vmax.f32 %v7527_v31, 1e-30  ;;  %v5201_v7 = vld [vmem:[%s8597_s23 + $0x28] sm:$0xff]   ;;  %v7541_v40 = vld [vmem:[#allocation4 + $0x80] sm:$0xff] }
 0x644   : > { %5221 = vrcp.f32 %v3488_v11  ;;  %4781 = vmatpush3.bf16.msra.mxu0 %v5199_v62  ;;  %4844 = vmatpush3.bf16.msra.mxu1 %v5199_v62  ;;  %v3479_v28 = vmax.f32 %v7535_v49, 1e-30  ;;  %v3478_v41 = vmax.f32 %v7541_v40, 1e-30  ;;  %v7545_v22 = vld [vmem:[#allocation4 + $0xd0] sm:$0xff]  ;;  %v5202_v44 = vld [vmem:[%s8597_s23 + $0x20] sm:$0xff]  }
 0x645   : > { %5223 = vrcp.f32 %v3475_v15  ;;  %4782 = vmatprep.subr.bf16.mxu0 %v5200_v38  ;;  %4837 = vmatprep.subr.bf16.mxu1 %v5200_v38  ;;  %v7550_v27 = vld [vmem:[#allocation4 + $0xa8] sm:$0xff]  ;;  %v3495_v20 = vmax.f32 %v7545_v22, 1e-30  ;;  %v7554_v16 = vld [vmem:[#allocation4 + $0xb8] sm:$0xff]  ;;  %v5204_v53 = vld [vmem:[%s8597_s23 + $0x10] sm:$0xff]  }
 0x646   : > { %5225 = vrcp.f32 %v3474_v34  ;;  %v3494_v52 = vmax.f32 %v7550_v27, 1e-30  ;;  %v5203_v55 = vld [vmem:[%s8597_s23 + $0x18] sm:$0xff]   ;;  %v7559_v21 = vld [vmem:[#allocation4 + $0xe8] sm:$0xff]  ;;  %v3481_v63 = vmax.f32 %v7554_v16, 1e-30 }
 0x647   : > { %5227 = vrcp.f32 %v3491_v48  ;;  %v3480_v13 = vmax.f32 %v7559_v21, 1e-30  ;;  %v7563_v59 = vld [vmem:[#allocation4 + $0x28] sm:$0xff]  ;;  %v7568_v25 = vld [vmem:[#allocation4 + $0x10] sm:$0xff]  ;;  %v7577_v15 = vld [vmem:[#allocation4 + $0x60] sm:$0xff] }
 0x648   : > { %5229 = vrcp.f32 %v3490_v36  ;;  %4783 = vmatpush3.bf16.msra.mxu0 %v5200_v38  ;;  %4845 = vmatpush3.bf16.msra.mxu1 %v5200_v38  ;;  %v3497_v6 = vmax.f32 %v7563_v59, 1e-30  ;;  %v3496_v60 = vmax.f32 %v7568_v25, 1e-30  ;;  %v7572_v43 = vld [vmem:[#allocation4 + $0xf0] sm:$0xff]  ;;  %v5205_v42 = vld [vmem:[%s8597_s23 + $0x8] sm:$0xff]  }
 0x649   : > { %5231 = vrcp.f32 %v3477_v18  ;;  %4784 = vmatprep.subr.bf16.mxu0 %v5201_v7  ;;  %4838 = vmatprep.subr.bf16.mxu1 %v5201_v7  ;;  %v3483_v34 = vmax.f32 %v7572_v43, 1e-30  ;;  %v7581_v48 = vld [vmem:[#allocation4 + $0xf8] sm:$0xff] }
 0x64a   : > { %v5208_v56 = vpop.eup %5207  ;;  %5233 = vrcp.f32 %v3476_v61  ;;  %v3499_v18 = vmax.f32 %v7581_v48, 1e-30 }
 0x64b   : > { %v5210_v39 = vpop.eup %5209  ;;  %3616 = vperm.xlu1 %5198, %v5208_v56   ;;  %5235 = vrcp.f32 %v3493_v4 }
 0x64c   : > { %v5212_v37 = vpop.eup %5211  ;;  %3536 = vperm.xlu0 %5197, %v5210_v39   ;;  %5237 = vrcp.f32 %v3492_v29  ;;  %4785 = vmatpush3.bf16.msra.mxu0 %v5201_v7  ;;  %v3482_v39 = vmax.f32 %v7577_v15, 1e-30 }
 0x64d   : > { %v5214_v2 = vpop.eup %5213  ;;  %5239 = vrcp.f32 %v3479_v28  ;;  %4786 = vmatprep.subr.bf16.mxu0 %v5202_v44  ;;  %4846 = vmatpush3.bf16.msra.mxu1 %v5201_v7  ;;  %v7596_v7 = vld [vmem:[#allocation4 + $0x98] sm:$0xff]  ;;  %v7598_v28 = vld [vmem:[#allocation4 + $0x20] sm:$0xff] }
 0x64e   : > { %v5216_v57 = vpop.eup %5215  ;;  %5241 = vrcp.f32 %v3478_v41  ;;  %4839 = vmatprep.subr.bf16.mxu1 %v5202_v44 }
 0x64f   : > { %3621 = vperm.xlu1 %5198, %v5212_v37   ;;  %v5218_v12 = vpop.eup %5217  ;;  %5243 = vrcp.f32 %v3495_v20  ;;  %v5206_v37 = vld [vmem:[%s8597_s23] sm:$0xff]  }
 0x650   : > { %3541 = vperm.xlu0 %5197, %v5214_v2   ;;  %v5220_v47 = vpop.eup %5219  ;;  %4787 = vmatpush3.bf16.msra.mxu0 %v5202_v44  ;;  %5245 = vrcp.f32 %v3494_v52  ;;  %v7586_v2 = vld [vmem:[#allocation4 + $0xa0] sm:$0xff] }
 0x651   : > { %v5222_v50 = vpop.eup %5221  ;;  %4788 = vmatprep.subr.bf16.mxu0 %v5203_v55  ;;  %4847 = vmatpush3.bf16.msra.mxu1 %v5202_v44  ;;  %5247 = vrcp.f32 %v3481_v63  ;;  %v3498_v4 = vmax.f32 %v7586_v2, 1e-30  ;;  %v3500_v44 = vmax.f32 %v7598_v28, 1e-30 }
 0x652   : > { %v5224_v54 = vpop.eup %5223  ;;  %4840 = vmatprep.subr.bf16.mxu1 %v5203_v55  ;;  %5249 = vrcp.f32 %v3480_v13 }
 0x653   : > { %3551 = vperm.xlu1 %5198, %v5216_v57   ;;  %v5226_v19 = vpop.eup %5225  ;;  %5251 = vrcp.f32 %v3497_v6  ;;  %v7590_v57 = vld [vmem:[#allocation4 + $0x78] sm:$0xff] }
 0x654   : > { %3546 = vperm.xlu0 %5197, %v5218_v12   ;;  %v5228_v10 = vpop.eup %5227  ;;  %4789 = vmatpush3.bf16.msra.mxu0 %v5203_v55  ;;  %5253 = vrcp.f32 %v3496_v60  ;;  %v7592_v12 = vld [vmem:[#allocation4 + $0x8] sm:$0xff]  ;;  %v3485_v38 = vmax.f32 %v7590_v57, 1e-30 }
 0x655   : > { %v5230_v58 = vpop.eup %5229  ;;  %4790 = vmatprep.subr.bf16.mxu0 %v5204_v53  ;;  %4848 = vmatpush3.bf16.msra.mxu1 %v5203_v55  ;;  %5255 = vrcp.f32 %v3483_v34 }
 0x656   : > { %v5232_v9 = vpop.eup %5231  ;;  %4841 = vmatprep.subr.bf16.mxu1 %v5204_v53  ;;  %5257 = vrcp.f32 %v3482_v39 }
 0x657   : > { %3631 = vperm.xlu1 %5198, %v5220_v47   ;;  %v5234_v33 = vpop.eup %5233  ;;  %5259 = vrcp.f32 %v3499_v18  ;;  %v3484_v47 = vmax.f32 %v7592_v12, 1e-30 }
 0x658   : > { %3626 = vperm.xlu0 %5197, %v5222_v50   ;;  %v5236_v32 = vpop.eup %5235  ;;  %4791 = vmatpush3.bf16.msra.mxu0 %v5204_v53  ;;  %5261 = vrcp.f32 %v3498_v4 }
 0x659   : > { %v5238_v11 = vpop.eup %5237  ;;  %4792 = vmatprep.subr.bf16.mxu0 %v5205_v42  ;;  %4849 = vmatpush3.bf16.msra.mxu1 %v5204_v53  ;;  %5263 = vrcp.f32 %v3485_v38 }
 0x65a   : > { %v5240_v56 = vpop.eup %5239  ;;  %4842 = vmatprep.subr.bf16.mxu1 %v5205_v42  ;;  %5265 = vrcp.f32 %v3484_v47 }
 0x65b   : > { %3561 = vperm.xlu1 %5198, %v5224_v54   ;;  %v5242_v36 = vpop.eup %5241  ;;  %v3501_v54 = vmax.f32 %v7596_v7, 1e-30 }
 0x65c   : > { %3556 = vperm.xlu0 %5197, %v5226_v19   ;;  %4793 = vmatpush3.bf16.msra.mxu0 %v5205_v42  ;;  %v5244_v61 = vpop.eup %5243 }
 0x65d   : > { %4794 = vmatprep.subr.bf16.mxu0 %v5206_v37  ;;  %v5246_v62 = vpop.eup %5245  ;;  %4850 = vmatpush3.bf16.msra.mxu1 %v5205_v42  ;;  %5267 = vrcp.f32 %v3501_v54 }
 0x65e   : > { %4843 = vmatprep.subr.bf16.mxu1 %v5206_v37  ;;  %v5248_v29 = vpop.eup %5247  ;;  %5269 = vrcp.f32 %v3500_v44 }
 0x65f   : > { %3641 = vperm.xlu1 %5198, %v5228_v10   ;;  %v5250_v50 = vpop.eup %5249 }
 0x660   : > { %3636 = vperm.xlu0 %5197, %v5230_v58   ;;  %4795 = vmatpush3.bf16.msra.mxu0 %v5206_v37  ;;  %v5252_v41 = vpop.eup %5251 }
 0x661   : > { %4851 = vmatpush3.bf16.msra.mxu1 %v5206_v37  ;;  %v5254_v19 = vpop.eup %5253 }
 0x662   : > { %v5256_v20 = vpop.eup %5255 }
 0x663   : > { %3571 = vperm.xlu1 %5198, %v5232_v9   ;;  %v5258_v10 = vpop.eup %5257 }
 0x664   : > { %3566 = vperm.xlu0 %5197, %v5234_v33   ;;  %v5260_v52 = vpop.eup %5259 }
 0x665   : > { %v5262_v55 = vpop.eup %5261 }
 0x666   : > { %v5264_v58 = vpop.eup %5263 }
 0x667   : > { %3651 = vperm.xlu1 %5198, %v5236_v32   ;;  %v5266_v63 = vpop.eup %5265 }
 0x668   : > { %3646 = vperm.xlu0 %5197, %v5238_v11  }
 0x66a   : > { %v5268_v9 = vpop.eup %5267 }
 0x66b   : > { %3581 = vperm.xlu1 %5198, %v5240_v56   ;;  %v5270_v13 = vpop.eup %5269 }
 0x66c   : > { %3576 = vperm.xlu0 %5197, %v5242_v36  }
 0x66f   : > { %3661 = vperm.xlu1 %5198, %v5244_v61  }
 0x670   : > { %3656 = vperm.xlu0 %5197, %v5246_v62  }
 0x673   : > { %3591 = vperm.xlu1 %5198, %v5248_v29  }
 0x674   : > { %3586 = vperm.xlu0 %5197, %v5250_v50  }
 0x677   : > { %3671 = vperm.xlu1 %5198, %v5252_v41  }
 0x678   : > { %3666 = vperm.xlu0 %5197, %v5254_v19  }
 0x67b   : > { %3601 = vperm.xlu1 %5198, %v5256_v20  }
 0x67c   : > { %3596 = vperm.xlu0 %5197, %v5258_v10  }
 0x67f   : > { %3681 = vperm.xlu1 %5198, %v5260_v52  }
 0x680   : > { %3676 = vperm.xlu0 %5197, %v5262_v55  }
 0x683   : > { %3611 = vperm.xlu1 %5198, %v5264_v58  }
 0x684   : > { %3606 = vperm.xlu0 %5197, %v5266_v63  }
 0x687   : > { %3691 = vperm.xlu1 %5198, %v5268_v9  }
 0x688   : > { %3686 = vperm.xlu0 %5197, %v5270_v13  }
 0x6c6   : > { %v3617_v53 = vpop.permute.xlu1 %3616 }
 0x6c7   : > { %v3537_v33 = vpop.permute.xlu0 %3536  ;;  %v3710_v32 = vmul.f32 %v3617_v53, %v7482_v46 }
 0x6c8   : > { %v3694_v11 = vmul.f32 %v3537_v33, %v7484_v0 }
 0x6ca   : > { %v3622_v6 = vpop.permute.xlu1 %3621 }
 0x6cb   : > { %v3711_v60 = vmul.f32 %v3622_v6, %v7486_v17  ;;  %v3542_v42 = vpop.permute.xlu0 %3541 }
 0x6cc   : > { %v3695_v34 = vmul.f32 %v3542_v42, %v7491_v1 }
 0x6cd   : > { %v3734_v56 = vpack.c.bf16 %v3711_v60, %v3710_v32 }
 0x6ce   : > { %v3552_v39 = vpop.permute.xlu1 %3551  ;;  %v3726_v37 = vpack.c.bf16 %v3695_v34, %v3694_v11 }
 0x6cf   : > { %v3697_v36 = vmul.f32 %v3552_v39, %v7493_v30  ;;  %v3547_v18 = vpop.permute.xlu0 %3546  ;;  %4812 = vmatprep.mubr.bf16.mxu1 %v3734_v56 }
 0x6d0   : > { %v3696_v61 = vmul.f32 %v3547_v18, %v7496_v45  ;;  %4796 = vmatprep.mubr.bf16.mxu0 %v3726_v37 }
 0x6d2   : > { %v3727_v4 = vpack.c.bf16 %v3697_v36, %v3696_v61  ;;  %v3632_v62 = vpop.permute.xlu1 %3631 }
 0x6d3   : > { %v3713_v46 = vmul.f32 %v3632_v62, %v7500_v8  ;;  %v3627_v17 = vpop.permute.xlu0 %3626 }
 0x6d4   : > { %v3712_v38 = vmul.f32 %v3627_v17, %v7502_v14  ;;  %4797 = vmatmul.mubr.bf16.vlgmr.msra.gmra.mxu0 %v3727_v4 }
 0x6d6   : > { %v3735_v0 = vpack.c.bf16 %v3713_v46, %v3712_v38  ;;  %v3562_v1 = vpop.permute.xlu1 %3561 }
 0x6d7   : > { %v3699_v29 = vmul.f32 %v3562_v1, %v7506_v51  ;;  %v3557_v47 = vpop.permute.xlu0 %3556 }
 0x6d8   : > { %v3698_v30 = vmul.f32 %v3557_v47, %v7508_v3  ;;  %4813 = vmatmul.mubr.bf16.vlgmr.msra.gmra.mxu1 %v3735_v0 }
 0x6da   : > { %v3728_v50 = vpack.c.bf16 %v3699_v29, %v3698_v30  ;;  %v3642_v54 = vpop.permute.xlu1 %3641 }
 0x6db   : > { %v3715_v45 = vmul.f32 %v3642_v54, %v7512_v23  ;;  %v3637_v41 = vpop.permute.xlu0 %3636 }
 0x6dc   : > { %v3714_v44 = vmul.f32 %v3637_v41, %v7514_v26  ;;  %4800 = vmatprep.mubr.bf16.mxu0 %v3728_v50 }
 0x6de   : > { %v3736_v8 = vpack.c.bf16 %v3715_v45, %v3714_v44  ;;  %v3572_v19 = vpop.permute.xlu1 %3571 }
 0x6df   : > { %v3701_v14 = vmul.f32 %v3572_v19, %v7517_v5  ;;  %v3567_v20 = vpop.permute.xlu0 %3566 }
 0x6e0   : > { %v3700_v10 = vmul.f32 %v3567_v20, %v7519_v35  ;;  %4816 = vmatprep.mubr.bf16.mxu1 %v3736_v8 }
 0x6e2   : > { %v3729_v51 = vpack.c.bf16 %v3701_v14, %v3700_v10  ;;  %v3652_v52 = vpop.permute.xlu1 %3651 }
 0x6e3   : > { %v3717_v3 = vmul.f32 %v3652_v52, %v7522_v24  ;;  %v3647_v55 = vpop.permute.xlu0 %3646 }
 0x6e4   : > { %v3716_v58 = vmul.f32 %v3647_v55, %v7527_v31  ;;  %4801 = vmatmul.mubr.bf16.gmra.mxu0 %v3729_v51 }
 0x6e6   : > { %v3737_v23 = vpack.c.bf16 %v3717_v3, %v3716_v58  ;;  %v3582_v63 = vpop.permute.xlu1 %3581 }
 0x6e7   : > { %v3703_v26 = vmul.f32 %v3582_v63, %v7535_v49  ;;  %v3577_v9 = vpop.permute.xlu0 %3576 }
 0x6e8   : > { %v3702_v13 = vmul.f32 %v3577_v9, %v7541_v40  ;;  %4817 = vmatmul.mubr.bf16.gmra.mxu1 %v3737_v23 }
 0x6ea   : > { %v3730_v5 = vpack.c.bf16 %v3703_v26, %v3702_v13  ;;  %v3662_v53 = vpop.permute.xlu1 %3661 }
 0x6eb   : > { %v3719_v35 = vmul.f32 %v3662_v53, %v7545_v22  ;;  %v3657_v33 = vpop.permute.xlu0 %3656 }
 0x6ec   : > { %v3718_v6 = vmul.f32 %v3657_v33, %v7550_v27  ;;  %4804 = vmatprep.mubr.bf16.mxu0 %v3730_v5 }
 0x6ee   : > { %v3738_v24 = vpack.c.bf16 %v3719_v35, %v3718_v6  ;;  %v3592_v32 = vpop.permute.xlu1 %3591 }
 0x6ef   : > { %v3705_v31 = vmul.f32 %v3592_v32, %v7554_v16  ;;  %v3587_v60 = vpop.permute.xlu0 %3586 }
 0x6f0   : > { %v3704_v42 = vmul.f32 %v3587_v60, %v7559_v21  ;;  %4820 = vmatprep.mubr.bf16.mxu1 %v3738_v24 }
 0x6f2   : > { %v3731_v49 = vpack.c.bf16 %v3705_v31, %v3704_v42  ;;  %v3672_v11 = vpop.permute.xlu1 %3671 }
 0x6f3   : > { %v3721_v40 = vmul.f32 %v3672_v11, %v7563_v59  ;;  %v3667_v34 = vpop.permute.xlu0 %3666 }
 0x6f4   : > { %v3720_v56 = vmul.f32 %v3667_v34, %v7568_v25  ;;  %4805 = vmatmul.mubr.bf16.gmra.mxu0 %v3731_v49 }
 0x6f6   : > { %v3739_v22 = vpack.c.bf16 %v3721_v40, %v3720_v56  ;;  %v3602_v39 = vpop.permute.xlu1 %3601 }
 0x6f7   : > { %v3707_v27 = vmul.f32 %v3602_v39, %v7572_v43  ;;  %v3597_v37 = vpop.permute.xlu0 %3596 }
 0x6f8   : > { %v3706_v36 = vmul.f32 %v3597_v37, %v7577_v15  ;;  %4821 = vmatmul.mubr.bf16.gmra.mxu1 %v3739_v22 }
 0x6fa   : > { %v3732_v16 = vpack.c.bf16 %v3707_v27, %v3706_v36  ;;  %v3682_v18 = vpop.permute.xlu1 %3681 }
 0x6fb   : > { %v3723_v21 = vmul.f32 %v3682_v18, %v7581_v48  ;;  %v3677_v61 = vpop.permute.xlu0 %3676 }
 0x6fc   : > { %v3722_v4 = vmul.f32 %v3677_v61, %v7586_v2  ;;  %4808 = vmatprep.mubr.bf16.mxu0 %v3732_v16  ;;  %v7637_v2 = vld [vmem:[%s8598_s21] ss:$0 sm:$0xff] }
 0x6fe   : > { %v3740_v59 = vpack.c.bf16 %v3723_v21, %v3722_v4  ;;  %v3612_v62 = vpop.permute.xlu1 %3611 }
 0x6ff   : > { %v3709_v25 = vmul.f32 %v3612_v62, %v7590_v57  ;;  %v3607_v46 = vpop.permute.xlu0 %3606 }
 0x700   : > { %v3708_v17 = vmul.f32 %v3607_v46, %v7592_v12  ;;  %4824 = vmatprep.mubr.bf16.mxu1 %v3740_v59 }
 0x702   : > { %v3733_v43 = vpack.c.bf16 %v3709_v25, %v3708_v17  ;;  %v3692_v15 = vpop.permute.xlu1 %3691 }
 0x703   : > { %v3725_v38 = vmul.f32 %v3692_v15, %v7596_v7  ;;  %v3687_v0 = vpop.permute.xlu0 %3686 }
 0x704   : > { %v3724_v48 = vmul.f32 %v3687_v0, %v7598_v28  ;;  %4809 = vmatmul.mubr.bf16.gmra.mxu0 %v3733_v43 }
 0x706   : > { %v3741_v1 = vpack.c.bf16 %v3725_v38, %v3724_v48 }
 0x708   : > { %4825 = vmatmul.mubr.bf16.gmra.mxu1 %v3741_v1 }
 0x794   : > { %v4798_v57 = vpop.f32.mrf.mxu0 }
 0x795   : > { %v3856_v12 = vadd.f32 %v4798_v57, %v7637_v2 }
 0x796   : > { %v3847_v29 = vpop.f32.mrf.mxu0 }
 0x797   : > { %v3976_v47 = vmax.f32 %v3856_v12, 0.0  ;;  %v3848_v7 = vadd.f32 %v7637_v2, %v3847_v29 }
 0x798   : > { %v4799_v30 = vpop.f32.mrf.mxu0  ;;  %v4814_v28 = vpop.f32.mrf.mxu1 }
 0x799   : > { %4008 = vst [vmem:[%s5624_s20 + $0x10] sm:$0xff] %v3976_v47  ;;  %v3974_v50 = vmax.f32 %v3848_v7, 0.0  ;;  %v3859_v54 = vadd.f32 %v4799_v30, %v7637_v2  ;;  %v3920_v45 = vadd.f32 %v4814_v28, %v7637_v2 }
 0x79a   : > { %v3850_v41 = vpop.f32.mrf.mxu0  ;;  %v3911_v44 = vpop.f32.mrf.mxu1 }
 0x79b   : > { %4006 = vst [vmem:[%s5624_s20] sm:$0xff] %v3974_v50  ;;  %v3977_v8 = vmax.f32 %v3859_v54, 0.0  ;;  %v3992_v19 = vmax.f32 %v3920_v45, 0.0  ;;  %v3851_v14 = vadd.f32 %v7637_v2, %v3850_v41  ;;  %v3912_v20 = vadd.f32 %v7637_v2, %v3911_v44 }
 0x79c   : > { %v4815_v10 = vpop.f32.mrf.mxu1 }
 0x79d   : > { %4009 = vst [vmem:[%s5624_s20 + $0x18] sm:$0xff] %v3977_v8  ;;  %4024 = vst [vmem:[%s5624_s20 + $0x90] sm:$0xff] %v3992_v19  ;;  %v3975_v51 = vmax.f32 %v3851_v14, 0.0  ;;  %v3990_v52 = vmax.f32 %v3912_v20, 0.0  ;;  %v3923_v3 = vadd.f32 %v4815_v10, %v7637_v2 }
 0x79e   : > { %v3914_v55 = vpop.f32.mrf.mxu1 }
 0x79f   : > { %4007 = vst [vmem:[%s5624_s20 + $0x8] sm:$0xff] %v3975_v51  ;;  %4022 = vst [vmem:[%s5624_s20 + $0x80] sm:$0xff] %v3990_v52  ;;  %v3993_v58 = vmax.f32 %v3923_v3, 0.0  ;;  %v3915_v23 = vadd.f32 %v7637_v2, %v3914_v55 }
 0x7a1   : > { %4025 = vst [vmem:[%s5624_s20 + $0x98] sm:$0xff] %v3993_v58  ;;  %v3991_v63 = vmax.f32 %v3915_v23, 0.0 }
 0x7a3   : > { %4023 = vst [vmem:[%s5624_s20 + $0x88] sm:$0xff] %v3991_v63 }
 0x7a4   : > { %v4802_v26 = vpop.f32.mrf.mxu0 }
 0x7a5   : > { %v3872_v9 = vadd.f32 %v4802_v26, %v7637_v2 }
 0x7a6   : > { %v3863_v13 = vpop.f32.mrf.mxu0 }
 0x7a7   : > { %v3980_v5 = vmax.f32 %v3872_v9, 0.0  ;;  %v3864_v53 = vadd.f32 %v7637_v2, %v3863_v13 }
 0x7a8   : > { %v4803_v35 = vpop.f32.mrf.mxu0  ;;  %v4818_v33 = vpop.f32.mrf.mxu1 }
 0x7a9   : > { %4012 = vst [vmem:[%s5624_s20 + $0x30] sm:$0xff] %v3980_v5  ;;  %v3978_v6 = vmax.f32 %v3864_v53, 0.0  ;;  %v3875_v24 = vadd.f32 %v4803_v35, %v7637_v2  ;;  %v3936_v32 = vadd.f32 %v4818_v33, %v7637_v2 }
 0x7aa   : > { %v3866_v31 = vpop.f32.mrf.mxu0  ;;  %v3927_v60 = vpop.f32.mrf.mxu1 }
 0x7ab   : > { %4010 = vst [vmem:[%s5624_s20 + $0x20] sm:$0xff] %v3978_v6  ;;  %v3981_v42 = vmax.f32 %v3875_v24, 0.0  ;;  %v3996_v49 = vmax.f32 %v3936_v32, 0.0  ;;  %v3867_v11 = vadd.f32 %v7637_v2, %v3866_v31  ;;  %v3928_v40 = vadd.f32 %v7637_v2, %v3927_v60 }
 0x7ac   : > { %v4819_v34 = vpop.f32.mrf.mxu1 }
 0x7ad   : > { %4013 = vst [vmem:[%s5624_s20 + $0x38] sm:$0xff] %v3981_v42  ;;  %4028 = vst [vmem:[%s5624_s20 + $0xb0] sm:$0xff] %v3996_v49  ;;  %v3979_v56 = vmax.f32 %v3867_v11, 0.0  ;;  %v3994_v22 = vmax.f32 %v3928_v40, 0.0  ;;  %v3939_v39 = vadd.f32 %v4819_v34, %v7637_v2 }
 0x7ae   : > { %v3930_v27 = vpop.f32.mrf.mxu1 }
 0x7af   : > { %4011 = vst [vmem:[%s5624_s20 + $0x28] sm:$0xff] %v3979_v56  ;;  %4026 = vst [vmem:[%s5624_s20 + $0xa0] sm:$0xff] %v3994_v22  ;;  %v3997_v37 = vmax.f32 %v3939_v39, 0.0  ;;  %v3931_v36 = vadd.f32 %v7637_v2, %v3930_v27 }
 0x7b1   : > { %4029 = vst [vmem:[%s5624_s20 + $0xb8] sm:$0xff] %v3997_v37  ;;  %v3995_v16 = vmax.f32 %v3931_v36, 0.0 }
 0x7b3   : > { %4027 = vst [vmem:[%s5624_s20 + $0xa8] sm:$0xff] %v3995_v16 }
 0x7b4   : > { %v4806_v18 = vpop.f32.mrf.mxu0 }
 0x7b5   : > { %v3888_v21 = vadd.f32 %v4806_v18, %v7637_v2 }
 0x7b6   : > { %v3879_v61 = vpop.f32.mrf.mxu0 }
 0x7b7   : > { %v3984_v4 = vmax.f32 %v3888_v21, 0.0  ;;  %v3880_v59 = vadd.f32 %v7637_v2, %v3879_v61 }
 0x7b8   : > { %v4807_v62 = vpop.f32.mrf.mxu0  ;;  %v4822_v25 = vpop.f32.mrf.mxu1 }
 0x7b9   : > { %4016 = vst [vmem:[%s5624_s20 + $0x50] sm:$0xff] %v3984_v4  ;;  %v3982_v46 = vmax.f32 %v3880_v59, 0.0  ;;  %v3891_v17 = vadd.f32 %v4807_v62, %v7637_v2  ;;  %v3952_v43 = vadd.f32 %v4822_v25, %v7637_v2 }
 0x7ba   : > { %v3882_v15 = vpop.f32.mrf.mxu0  ;;  %v3943_v38 = vpop.f32.mrf.mxu1 }
 0x7bb   : > { %4014 = vst [vmem:[%s5624_s20 + $0x40] sm:$0xff] %v3982_v46  ;;  %v3985_v0 = vmax.f32 %v3891_v17, 0.0  ;;  %v4000_v48 = vmax.f32 %v3952_v43, 0.0  ;;  %v3883_v1 = vadd.f32 %v7637_v2, %v3882_v15  ;;  %v3944_v57 = vadd.f32 %v7637_v2, %v3943_v38 }
 0x7bc   : > { %v4823_v12 = vpop.f32.mrf.mxu1 }
 0x7bd   : > { %4017 = vst [vmem:[%s5624_s20 + $0x58] sm:$0xff] %v3985_v0  ;;  %4032 = vst [vmem:[%s5624_s20 + $0xd0] sm:$0xff] %v4000_v48  ;;  %v3983_v29 = vmax.f32 %v3883_v1, 0.0  ;;  %v3998_v47 = vmax.f32 %v3944_v57, 0.0  ;;  %v3955_v7 = vadd.f32 %v4823_v12, %v7637_v2 }
 0x7be   : > { %v3946_v30 = vpop.f32.mrf.mxu1 }
 0x7bf   : > { %4015 = vst [vmem:[%s5624_s20 + $0x48] sm:$0xff] %v3983_v29  ;;  %4030 = vst [vmem:[%s5624_s20 + $0xc0] sm:$0xff] %v3998_v47  ;;  %v4001_v28 = vmax.f32 %v3955_v7, 0.0  ;;  %v3947_v50 = vadd.f32 %v7637_v2, %v3946_v30 }
 0x7c1   : > { %4033 = vst [vmem:[%s5624_s20 + $0xd8] sm:$0xff] %v4001_v28  ;;  %v3999_v54 = vmax.f32 %v3947_v50, 0.0 }
 0x7c3   : > { %4031 = vst [vmem:[%s5624_s20 + $0xc8] sm:$0xff] %v3999_v54 }
 0x7c4   : > { %v4810_v45 = vpop.f32.mrf.mxu0 }
 0x7c5   : > { %v3904_v41 = vadd.f32 %v4810_v45, %v7637_v2 }
 0x7c6   : > { %v3895_v44 = vpop.f32.mrf.mxu0 }
 0x7c7   : > { %v3988_v8 = vmax.f32 %v3904_v41, 0.0  ;;  %v3896_v19 = vadd.f32 %v7637_v2, %v3895_v44 }
 0x7c8   : > { %v4811_v14 = vpop.f32.mrf.mxu0  ;;  %v4826_v20 = vpop.f32.mrf.mxu1 }
 0x7c9   : > { %4020 = vst [vmem:[%s5624_s20 + $0x70] sm:$0xff] %v3988_v8  ;;  %v3986_v10 = vmax.f32 %v3896_v19, 0.0  ;;  %v3907_v51 = vadd.f32 %v4811_v14, %v7637_v2  ;;  %v3968_v52 = vadd.f32 %v4826_v20, %v7637_v2 }
 0x7ca   : > { %v3898_v3 = vpop.f32.mrf.mxu0  ;;  %v3959_v55 = vpop.f32.mrf.mxu1 }
 0x7cb   : > { %4018 = vst [vmem:[%s5624_s20 + $0x60] sm:$0xff] %v3986_v10  ;;  %v3989_v58 = vmax.f32 %v3907_v51, 0.0  ;;  %v4004_v23 = vmax.f32 %v3968_v52, 0.0  ;;  %v3899_v63 = vadd.f32 %v7637_v2, %v3898_v3  ;;  %v3960_v26 = vadd.f32 %v7637_v2, %v3959_v55 }
 0x7cc   : > { %v4827_v9 = vpop.f32.mrf.mxu1 }
 0x7cd   : > { %4021 = vst [vmem:[%s5624_s20 + $0x78] sm:$0xff] %v3989_v58  ;;  %4036 = vst [vmem:[%s5624_s20 + $0xf0] sm:$0xff] %v4004_v23  ;;  %v3987_v13 = vmax.f32 %v3899_v63, 0.0  ;;  %v4002_v5 = vmax.f32 %v3960_v26, 0.0  ;;  %v3971_v53 = vadd.f32 %v4827_v9, %v7637_v2 }
 0x7ce   : > { %v3962_v35 = vpop.f32.mrf.mxu1 }
 0x7cf   : > { %4019 = vst [vmem:[%s5624_s20 + $0x68] sm:$0xff] %v3987_v13  ;;  %4034 = vst [vmem:[%s5624_s20 + $0xe0] sm:$0xff] %v4002_v5  ;;  %v4005_v33 = vmax.f32 %v3971_v53, 0.0  ;;  %v3963_v6 = vadd.f32 %v7637_v2, %v3962_v35 }
 0x7d1   : > { %4037 = vst [vmem:[%s5624_s20 + $0xf8] sm:$0xff] %v4005_v33  ;;  %v4003_v24 = vmax.f32 %v3963_v6, 0.0 }
 0x7d3   : > { %4035 = vst [vmem:[%s5624_s20 + $0xe8] sm:$0xff] %v4003_v24 }
 0x7d4 PF: > { %s4446_s28 = sshll.u32 %s5393_s12, 12  ;;  %s8599_s8 = sld [smem:[#allocation157_spill]] }
 0x7d5   : > { %s4052_s17 = sshll.u32 %s5624_s20, 4  ;;  %s8600_s24 = sand.u32 1, %s5373_s26   ;;  %s7710_s17 = int_to_ptr.vmem [resolvable:$true] %s4052_s17 }
 0x7d6   : > { %s7714_s0 = scalar_lea.sflag [#allocation10], %s8600_s24  ;;  %s5295_s4 = scalar_lea.vmem %s7710_s17, 4096 }
 0x7d7   : > { %p5296_p5 = scmp.ne.s32.totalorder %s7710_s17, %s5295_s4  ;;  %s5413_s12 = smov [#allocation9]  }
 0x7d8   : > { %s5299_s30 = sshll.u32 %s5413_s12, 4  ;;  %s5300_s30 = int_to_ptr.vmem [resolvable:$false] %s5299_s30 }
 0x7d9   : > { %p5297_p6 = pnand %p5296_p5, %p5557_p4  ;;  %s5301_s19 = scalar_lea.vmem %s5300_s30, 8192 }
 0x7da   : > { %s7707_s25 = scalar_lea.hbm %s8599_s8, %s4446_s28  ;;  %p5302_p9 = scmp.lt.s32.totalorder %s7710_s17, %s5300_s30 }
 0x7db   : > { %p5298_p8 = pneg %p5297_p6  ;;  %p5303_p10 = scmp.lt.s32.totalorder %s5301_s19, %s5295_s4 }
 0x7dd   : > { %p5304_p11 = por %p5303_p10, %p5302_p9 }
 0x7df   : > { %p5305_p12 = pnand %p5304_p11, %p5298_p8 }
 0x7e1   : > { %5308 = shalt.err (!%p5305_p12)
}
 0x7e2   : > { %s5309_s20 = scalar_lea.hbm %s7707_s25, 4096  ;;  %s5313_s21 = scalar_lea.hbm %s8599_s8, 8192 }
 0x7e3   : > { %p5310_p13 = scmp.ne.s32.totalorder %s7707_s25, %s5309_s20  ;;  %p5314_p2 = scmp.lt.s32.totalorder %s7707_s25, %s8599_s8 }
 0x7e4   : > { %p5315_p3 = scmp.lt.s32.totalorder %s5313_s21, %s5309_s20 }
 0x7e5   : > { %p5311_p0 = pnand %p5310_p13, %p5557_p4 }
 0x7e6   : > { %p5316_p5 = por %p5315_p3, %p5314_p2 }
 0x7e7   : > { %p5312_p1 = pneg %p5311_p0 }
 0x7e9   : > { %p5317_p6 = pnand %p5316_p5, %p5312_p1 }
 0x7eb   : > { %5320 = shalt.err (!%p5317_p6)
}
 0x7ec   : > { %s5414_s16 = smov 128   ;;  %s5415_s24 = smov 8  }
 0x7ed   : > { %4852 = dma.vmem_to_hbm [thread:$0]  (%p5557_p4), %s7710_s17, 4096, %s7707_s25, %s7714_s0, %s5414_s16, %s5414_s16, %s5415_s24  }
 0x7ee PF: > { %p4858_p8 = scmp.ge.s32.totalorder %s5405_s15, 2  ;;  %s4067_s4 = sand.u32 1, %s5369_s1  }
 0x7ef   : > { %s4068_s12 = scalar_lea.sflag [#allocation10], %s4067_s4 }
 0x7f0   : > { %p4855_p9 = pnand %p4858_p8, %p5566_p7 }
 0x7f2   : > { %p4856_p10 = pneg %p4855_p9 }
 0x7f4   : > { %5364 = dma.done.wait (%p4856_p10), %s4068_s12, 4096  }
 0x7f5   : > { %5366 = vsyncadd (%p4856_p10), %s4068_s12, 4294963200  ;;  %s34_s15 = sadd.s32 1, %s5405_s15   ;;  %s8601_s30 = sld [smem:[#allocation16_spill]] }
 0x7f6   : > { %p31_p11 = scmp.ge.s32.totalorder %s34_s15, 6   ;;  %s8602_s11 = sld [smem:[#allocation13_spill]] }
 0x7f7   : > { %s8603_s13 = sld [smem:[#allocation14_spill]]  ;;  %s8605_s1 = smov %s5373_s26 }
 0x7f8   : > { %s8604_s25 = sld [smem:[#allocation15_spill]]  ;;  %s8606_s26 = smov %s5377_s27 }
 0x7f9   : > { %s8608_s28 = smov %s5385_s29  ;;  %s8609_s29 = smov %s5572_s18 }
 0x7fa   : > { %s8611_s12 = smov %s5401_s14  ;;  %33 = sbr.rel (!%p31_p11) target bundleno = 34 (0x22), region = 137 }
 0x7fb   : > { %s8607_s27 = smov %s8601_s30 }
 0x7fc   : > { %s8610_s30 = smov %s8602_s11 }
 0x7fe   : > { %s8612_s14 = smov %s8604_s25 }
 0x7ff   :  { %4073 = vsyncpa [#allocation10], 1 }
 0x800   :  { %4075 = vsyncpa [#allocation10 + $0x1], 1 }

</bundles_post_ra>
